<compile_context>
chip_gen: v7x
topology: tpu7x:2x2x1
jax: 0.10.0
libtpu: 0.0.40
codegen_flags: <defaults>
</compile_context>

<pallas_src>
import functools

import jax
import jax.numpy as jnp
import numpy as np
from jax.experimental import pallas as pl
from jax.experimental.pallas import tpu as pltpu

# DCGAN architecture constants (ConvTranspose2d with k=4, per the PyTorch spec).
KSIZE = 4
STRIDES = (1, 2, 2, 2, 2)
PADS = (0, 1, 1, 1, 1)
BN_EPS = 1e-5

_TEST_TM_CAP = 128  # only used with force_tiled=True to exercise multi-step grids


# ----------------------------------------------------------------------------
# VMEM budgeting / generation awareness
# ----------------------------------------------------------------------------
def _vmem_capacity_bytes():
    try:
        info = pltpu.get_tpu_info()
        for attr in ("vmem_capacity_bytes", "vmem_size_bytes", "vmem_bytes"):
            v = getattr(info, attr, None)
            if v:
                return int(v)
    except Exception:
        pass
    try:
        kind = jax.devices()[0].device_kind.lower()
        if any(t in kind for t in ("v5 lite", "v5e", "v6", "trillium")):
            return 128 * 1024 * 1024
    except Exception:
        pass
    return 64 * 1024 * 1024  # conservative default (v7x physical VMEM per core)


_VMEM_CAP = _vmem_capacity_bytes()
_VMEM_LIMIT = min((_VMEM_CAP * 3) // 4, 96 * 1024 * 1024)
_VMEM_BUDGET = (_VMEM_LIMIT * 17) // 20          # planning headroom for Mosaic scratch
# Small-VMEM parts (v7x: 64 MiB / core) also have 2 TensorCores per chip, so large
# layers there prefer the tiled path (parallel grid -> both cores busy).
_PREFER_TILED_WHEN_BIG = _VMEM_CAP < 100 * 1024 * 1024
_TILED_MIN_OUT_ELEMS = 1 << 20


def _round_up(x, m):
    return ((x + m - 1) // m) * m


def _fused_fits(P, K, Mp, N):
    """Honest single-buffered footprint of the gridless fused layer kernel:
    bf16 Wt/Pt/out + f32 Y scratch + f32 elementwise temporaries."""
    need = (P * N * K * 2 + P * K * Mp * 2 + P * N * Mp * 2
            + P * N * Mp * 4 + 3 * N * Mp * 4 + (1 << 20))
    return need <= _VMEM_BUDGET


def _choose_tm(Mp, K, N, cap=None):
    """Largest multiple of 128 that divides Mp and fits the tiled kernels'
    double-buffered blocks (+ f32 temporaries) in VMEM.  Always >= 128."""
    per_col = 4 * K + 4 * N + 12 * N            # 2x bf16 Pt + 2x bf16 Y + f32 temps
    fixed = 4 * N * K + (1 << 20)
    limit = Mp if cap is None else max(128, min(Mp, cap))
    best = 128
    for t in range(128, limit + 1, 128):
        if Mp % t == 0 and per_col * t + fixed <= _VMEM_BUDGET:
            best = t
    return best


def _compiler_params(dims=None):
    return pltpu.CompilerParams(dimension_semantics=dims,
                                vmem_limit_bytes=_VMEM_LIMIT)


# ----------------------------------------------------------------------------
# Pallas kernels (lane-dense (Cout, Mp) outputs, bf16 MXU inputs, f32 accum)
# ----------------------------------------------------------------------------
def _fused_phase_bn_relu_kernel(w_ref, p_ref, g_ref, b_ref, a_ref, y_ref,
                                *, n_phases, m_valid):
    """Whole hidden layer in VMEM:  a[p] = relu(BN(W[p] @ P[p])) over phases.

    w_ref: (P, N, K) bf16, p_ref: (P, K, Mp) bf16, g_ref/b_ref: (N, 1) f32,
    a_ref: (P, N, Mp) bf16 out, y_ref: (P, N, Mp) f32 scratch.  BatchNorm uses
    batch statistics over the n_phases * m_valid REAL columns (padded columns
    are structurally zero and masked out of the centered variance).
    """
    n = w_ref.shape[1]
    mp = p_ref.shape[2]
    cnt = float(n_phases * m_valid)

    for ph in range(n_phases):
        y_ref[ph] = jnp.dot(w_ref[ph], p_ref[ph],
                            preferred_element_type=jnp.float32)

    total = jnp.zeros((n, 1), jnp.float32)
    for ph in range(n_phases):
        total = total + jnp.sum(y_ref[ph], axis=1, keepdims=True)
    mean = total * (1.0 / cnt)

    valid = jax.lax.broadcasted_iota(jnp.int32, (1, mp), 1) < m_valid
    vtot = jnp.zeros((n, 1), jnp.float32)
    for ph in range(n_phases):
        d = jnp.where(valid, y_ref[ph] - mean, 0.0)   # centered + padding-masked
        vtot = vtot + jnp.sum(d * d, axis=1, keepdims=True)
    var = vtot * (1.0 / cnt)

    scale = g_ref[...] * jax.lax.rsqrt(var + BN_EPS)
    shift = b_ref[...] - mean * scale
    for ph in range(n_phases):
        a_ref[ph] = jnp.maximum(y_ref[ph] * scale + shift, 0.0).astype(a_ref.dtype)


def _matmul_stats_kernel(w_ref, p_ref, y_ref, st_ref):
    """Tiled pass 1: bf16 pre-BN tile + this tile's per-channel (sum, sumsq).
    Both grid axes are 'parallel' (no cross-step accumulation) so the grid can
    be sharded across both TensorCores on v7x."""
    y = jnp.dot(w_ref[0], p_ref[0], preferred_element_type=jnp.float32)
    y_ref[0] = y.astype(y_ref.dtype)
    s = jnp.sum(y, axis=1, keepdims=True)                                  # (N, 1)
    q = jnp.sum(y * y, axis=1, keepdims=True)                              # (N, 1)
    st_ref[...] = jnp.concatenate([s, q], axis=1)[None, None]              # (1,1,N,2)


def _affine_relu_kernel(y_ref, s_ref, t_ref, a_ref):
    """Tiled pass 2: BN affine (precomputed scale/shift) + ReLU on bf16 Y."""
    y = y_ref[0].astype(jnp.float32)
    a_ref[0] = jnp.maximum(y * s_ref[...] + t_ref[...], 0.0).astype(a_ref.dtype)


def _matmul_tanh_kernel(w_ref, p_ref, o_ref):
    """Final layer tile: o = tanh(W @ P)."""
    o_ref[0] = jnp.tanh(jnp.dot(w_ref[0], p_ref[0],
                                preferred_element_type=jnp.float32))


# ----------------------------------------------------------------------------
# Pallas wrappers
# ----------------------------------------------------------------------------
def fused_phase_bn_relu(Wt, Pt, gamma, beta, m_valid):
    P, N, K = Wt.shape
    Mp = Pt.shape[2]
    kernel = functools.partial(_fused_phase_bn_relu_kernel,
                               n_phases=P, m_valid=m_valid)
    # No grid -> whole arrays land in VMEM single-buffered (no pipeline 2x).
    return pl.pallas_call(
        kernel,
        out_shape=jax.ShapeDtypeStruct((P, N, Mp), jnp.bfloat16),
        scratch_shapes=[pltpu.VMEM((P, N, Mp), jnp.float32)],
        compiler_params=_compiler_params(),
    )(Wt, Pt,
      gamma.reshape(N, 1).astype(jnp.float32),
      beta.reshape(N, 1).astype(jnp.float32))


def matmul_stats(Wt, Pt, tm):
    P, N, K = Wt.shape
    Mp = Pt.shape[2]
    g = Mp // tm
    return pl.pallas_call(
        _matmul_stats_kernel,
        out_shape=(jax.ShapeDtypeStruct((P, N, Mp), jnp.bfloat16),
                   jax.ShapeDtypeStruct((P, g, N, 2), jnp.float32)),
        grid=(P, g),
        in_specs=[pl.BlockSpec((1, N, K), lambda p, m: (p, 0, 0)),
                  pl.BlockSpec((1, K, tm), lambda p, m: (p, 0, m))],
        out_specs=(pl.BlockSpec((1, N, tm), lambda p, m: (p, 0, m)),
                   pl.BlockSpec((1, 1, N, 2), lambda p, m: (p, m, 0, 0))),
        compiler_params=_compiler_params(("parallel", "parallel")),
    )(Wt, Pt)


def affine_relu(Y, scale, shift, tm):
    P, N, Mp = Y.shape
    g = Mp // tm
    return pl.pallas_call(
        _affine_relu_kernel,
        out_shape=jax.ShapeDtypeStruct((P, N, Mp), jnp.bfloat16),
        grid=(P, g),
        in_specs=[pl.BlockSpec((1, N, tm), lambda p, m: (p, 0, m)),
                  pl.BlockSpec((N, 1), lambda p, m: (0, 0)),
                  pl.BlockSpec((N, 1), lambda p, m: (0, 0))],
        out_specs=pl.BlockSpec((1, N, tm), lambda p, m: (p, 0, m)),
        compiler_params=_compiler_params(("parallel", "parallel")),
    )(Y, scale.reshape(N, 1).astype(jnp.float32),
      shift.reshape(N, 1).astype(jnp.float32))


def matmul_tanh(Wt, Pt, tm):
    P, N, K = Wt.shape
    Mp = Pt.shape[2]
    g = Mp // tm
    return pl.pallas_call(
        _matmul_tanh_kernel,
        out_shape=jax.ShapeDtypeStruct((P, N, Mp), jnp.float32),
        grid=(P, g),
        in_specs=[pl.BlockSpec((1, N, K), lambda p, m: (p, 0, 0)),
                  pl.BlockSpec((1, K, tm), lambda p, m: (p, 0, m))],
        out_specs=pl.BlockSpec((1, N, tm), lambda p, m: (p, 0, m)),
        compiler_params=_compiler_params(("parallel", "parallel")),
    )(Wt, Pt)


# ----------------------------------------------------------------------------
# ConvTranspose2d -> GEMM operands (plain-JAX glue, channel-major layout)
# ----------------------------------------------------------------------------
def _stride1_patches(a, w, padding):
    """Dense im2col for the first (stride-1, 1x1-input) layer only.  Data here
    is tiny (K = nz*16, M = B*16) so the zero fill is irrelevant."""
    Cin, B, H, W = a.shape
    _, Cout, k, _ = w.shape
    pad = k - 1 - padding
    ap = jnp.pad(a, ((0, 0), (0, 0), (pad, pad), (pad, pad)))
    Ho = H + 2 * pad - k + 1
    Wo = W + 2 * pad - k + 1
    cols = [ap[:, :, kh:kh + Ho, kw:kw + Wo] for kh in range(k) for kw in range(k)]
    Pt = jnp.stack(cols, axis=1).reshape(Cin * k * k, B * Ho * Wo)
    Wt = w[:, :, ::-1, ::-1].transpose(1, 0, 2, 3).reshape(Cout, Cin * k * k)
    return Pt[None], Wt[None], (B, Ho, Wo, Cout)


def _stride2_phase_patches(a, w):
    """Sub-pixel phase decomposition of ConvTranspose2d(k=4, s=2, p=1).

    Output pixel (2*j_h + ph, 2*j_w + pw) only sees the 4 kernel taps with the
    matching parities, so each of the 4 phases is a plain 2x2 convolution of
    the input (one-sided padded): no zero insertion, 4x fewer patch bytes.
      Pt: (4, Cin*4, B*H*W)  with K rows ordered (ci, dh, dw)
      Wt: (4, Cout, Cin*4)   with Wt[p][co, (ci,dh,dw)] = w[ci,co,3-2dh-ph,3-2dw-pw]
    Phase p = ph*2 + pw maps to output[..., ph::2, pw::2].
    """
    Cin, B, H, W = a.shape
    _, Cout, _, _ = w.shape
    ap = jnp.pad(a, ((0, 0), (0, 0), (1, 1), (1, 1)))            # (Cin, B, H+2, W+2)
    S = [[ap[:, :, r:r + H, c:c + W] for c in range(3)] for r in range(3)]
    pts, wts = [], []
    for ph in range(2):
        for pw in range(2):
            p = jnp.stack([S[ph + dh][pw + dw] for dh in (0, 1) for dw in (0, 1)],
                          axis=1)                                # (Cin, 4, B, H, W)
            pts.append(p.reshape(Cin * 4, B * H * W))
            wsel = w[:, :, [3 - ph, 1 - ph], :][:, :, :, [3 - pw, 1 - pw]]
            wts.append(wsel.transpose(1, 0, 2, 3).reshape(Cout, Cin * 4))
    Pt = jnp.stack(pts)                                          # (4, Cin*4, M)
    Wt = jnp.stack(wts)                                          # (4, Cout, Cin*4)
    return Pt, Wt, (B, 2 * H, 2 * W, Cout)


def _assemble(Y, M, B, Ho, Wo, Cout):
    """(P, Cout, Mp) phase-major columns -> channel-major (Cout, B, Ho, Wo)."""
    P = Y.shape[0]
    Yv = Y[:, :, :M]
    if P == 1:
        return Yv[0].reshape(Cout, B, Ho, Wo)
    h, w = Ho // 2, Wo // 2
    return (Yv.reshape(2, 2, Cout, B, h, w)
              .transpose(2, 3, 4, 0, 5, 1)
              .reshape(Cout, B, Ho, Wo))


# ----------------------------------------------------------------------------
# Generator forward pass
# ----------------------------------------------------------------------------
@functools.partial(jax.jit, static_argnames=("force_tiled",))
def generator_forward(x, weights, bn, force_tiled=False):
    """x: (B, nz, 1, 1) NCHW -> (B, nc, 64, 64) NCHW.  BatchNorm uses batch
    statistics (PyTorch default training-mode forward)."""
    a = jnp.transpose(x, (1, 0, 2, 3))                 # channel-major (C, B, H, W)
    n_layers = len(weights)
    cap = _TEST_TM_CAP if force_tiled else None
    for li in range(n_layers):
        if STRIDES[li] == 1:
            Pt, Wt, (B, Ho, Wo, Cout) = _stride1_patches(a, weights[li], PADS[li])
        else:
            Pt, Wt, (B, Ho, Wo, Cout) = _stride2_phase_patches(a, weights[li])
        P, K, M = Pt.shape
        Mp = _round_up(M, 128)                         # lane-dense stores everywhere
        if Mp != M:
            Pt = jnp.pad(Pt, ((0, 0), (0, 0), (0, Mp - M)))
        Pt = Pt.astype(jnp.bfloat16)
        Wt = Wt.astype(jnp.bfloat16)

        if li == n_layers - 1:
            tm = _choose_tm(Mp, K, Cout, cap)
            Y = matmul_tanh(Wt, Pt, tm)                            # (P, nc, Mp) f32
        else:
            gamma, beta = bn[li]
            big = P * Cout * Mp >= _TILED_MIN_OUT_ELEMS
            use_fused = ((not force_tiled) and _fused_fits(P, K, Mp, Cout)
                         and not (_PREFER_TILED_WHEN_BIG and big))
            if use_fused:
                Y = fused_phase_bn_relu(Wt, Pt, gamma, beta, m_valid=M)
            else:
                tm = _choose_tm(Mp, K, Cout, cap)
                Yh, stats = matmul_stats(Wt, Pt, tm)   # bf16 Y + per-tile stats
                cnt = float(P * M)                     # padded cols contribute zero
                sums = jnp.sum(stats, axis=(0, 1))                 # (Cout, 2)
                mean = sums[:, 0] / cnt
                var = jnp.maximum(sums[:, 1] / cnt - mean * mean, 0.0)
                scale = gamma * jax.lax.rsqrt(var + BN_EPS)
                shift = beta - mean * scale
                Y = affine_relu(Yh, scale, shift, tm)              # (P, Cout, Mp) bf16
        a = _assemble(Y, M, B, Ho, Wo, Cout)
    return jnp.transpose(a, (1, 0, 2, 3)).astype(jnp.float32)     # single NCHW hop


def init_params(key, nz=16, ngf=8, nc=3):
    dims = [nz, ngf * 8, ngf * 4, ngf * 2, ngf, nc]
    keys = jax.random.split(key, len(dims) - 1)
    weights = tuple(
        0.02 * jax.random.normal(keys[i], (dims[i], dims[i + 1], KSIZE, KSIZE),
                                 jnp.float32)
        for i in range(len(dims) - 1))
    bn = tuple((jnp.ones((dims[i + 1],), jnp.float32),
                jnp.zeros((dims[i + 1],), jnp.float32))
               for i in range(len(dims) - 2))
    return weights, bn


# ----------------------------------------------------------------------------
# Pure-JAX reference (f32, HIGHEST precision) for the correctness check
# ----------------------------------------------------------------------------
@jax.jit
def reference_forward(x, weights, bn):
    h = x
    n_layers = len(weights)
    for li in range(n_layers):
        w = weights[li]
        k = w.shape[-1]
        pad = k - 1 - PADS[li]
        wf = w[:, :, ::-1, ::-1].transpose(1, 0, 2, 3)             # (Cout, Cin, k, k)
        y = jax.lax.conv_general_dilated(
            h, wf, window_strides=(1, 1), padding=[(pad, pad), (pad, pad)],
            lhs_dilation=(STRIDES[li], STRIDES[li]),
            dimension_numbers=("NCHW", "OIHW", "NCHW"),
            precision=jax.lax.Precision.HIGHEST)
        if li < n_layers - 1:
            gamma, beta = bn[li]
            mean = y.mean(axis=(0, 2, 3))
            var = y.var(axis=(0, 2, 3))
            y = (y - mean[None, :, None, None]) / jnp.sqrt(
                var[None, :, None, None] + BN_EPS)
            y = y * gamma[None, :, None, None] + beta[None, :, None, None]
            y = jnp.maximum(y, 0.0)
        else:
            y = jnp.tanh(y)
        h = y
    return h


if __name__ == "__main__":
    key = jax.random.PRNGKey(0)
    kp, kx = jax.random.split(key)
    # Small synthetic config: nz=16, ngf=8, nc=3, batch=2 -> output (2, 3, 64, 64)
    nz, ngf, nc, B = 16, 8, 3, 2
    weights, bn = init_params(kp, nz=nz, ngf=ngf, nc=nc)
    x = jax.random.normal(kx, (B, nz, 1, 1), jnp.float32)

    out = jax.block_until_ready(generator_forward(x, weights, bn))
    assert out.shape == (B, nc, 64, 64), out.shape

    ref = jax.block_until_ready(reference_forward(x, weights, bn))
    if not np.allclose(np.asarray(out), np.asarray(ref), atol=2e-2, rtol=2e-2):
        err = float(jnp.max(jnp.abs(out - ref)))
        raise AssertionError(f"Pallas (fused) vs reference mismatch, max |err| = {err}")

    # Also exercise the tiled fallback path (multi-step parallel grids, bf16 Y).
    out_t = jax.block_until_ready(generator_forward(x, weights, bn, force_tiled=True))
    if not np.allclose(np.asarray(out_t), np.asarray(ref), atol=2e-2, rtol=2e-2):
        err = float(jnp.max(jnp.abs(out_t - ref)))
        raise AssertionError(f"Pallas (tiled) vs reference mismatch, max |err| = {err}")

    print("KERNEL_OK")
</pallas_src>

<mosaic_0001>
module attributes {stable_mosaic.version = 11 : i64} {
  func.func @_fused_phase_bn_relu_kernel(%arg0: memref<1x64x256xbf16, #tpu.memory_space<vmem>>, %arg1: memref<1x256x128xbf16, #tpu.memory_space<vmem>>, %arg2: memref<64x1xf32, #tpu.memory_space<vmem>>, %arg3: memref<64x1xf32, #tpu.memory_space<vmem>>, %arg4: memref<1x64x128xbf16, #tpu.memory_space<vmem>>, %arg5: memref<1x64x128xf32, #tpu.memory_space<vmem>>) attributes {dimension_semantics = [], scalar_prefetch = 0 : i64, scratch_operands = 1 : i64, tpu.core_type = #tpu.core_type<tc>} {
    %c0 = arith.constant 0 : index
    %c0_0 = arith.constant 0 : index
    %c0_1 = arith.constant 0 : index
    %0 = vector.load %arg0[%c0, %c0_0, %c0_1] : memref<1x64x256xbf16, #tpu.memory_space<vmem>>, vector<1x64x256xbf16>
    %1 = vector.shape_cast %0 : vector<1x64x256xbf16> to vector<64x256xbf16>
    %c0_2 = arith.constant 0 : index
    %c0_3 = arith.constant 0 : index
    %c0_4 = arith.constant 0 : index
    %2 = vector.load %arg1[%c0_2, %c0_3, %c0_4] : memref<1x256x128xbf16, #tpu.memory_space<vmem>>, vector<1x256x128xbf16>
    %3 = vector.shape_cast %2 : vector<1x256x128xbf16> to vector<256x128xbf16>
    %cst = arith.constant dense<0.000000e+00> : vector<64x128xf32>
    %4 = tpu.matmul %1, %3, %cst {dimension_numbers = #tpu.dot_dimension_numbers<[1], [0], [0], [1], [0, 0, 1, 1], [], []>} : vector<64x256xbf16>, vector<256x128xbf16>, vector<64x128xf32> -> vector<64x128xf32>
    %c0_5 = arith.constant 0 : index
    %c0_6 = arith.constant 0 : index
    %c0_7 = arith.constant 0 : index
    %5 = vector.load %arg5[%c0_5, %c0_6, %c0_7] : memref<1x64x128xf32, #tpu.memory_space<vmem>>, vector<1x64x128xf32>
    %6 = vector.shape_cast %5 : vector<1x64x128xf32> to vector<64x128xf32>
    %7 = vector.shape_cast %4 : vector<64x128xf32> to vector<1x64x128xf32>
    tpu.vector_store %arg5[%c0_5, %c0_6, %c0_7], %7 {strides = array<i32>} : memref<1x64x128xf32, #tpu.memory_space<vmem>>, vector<1x64x128xf32>,
    %cst_8 = arith.constant 0.000000e+00 : f32
    %8 = vector.broadcast %cst_8 : f32 to vector<64x1xf32>
    %c0_9 = arith.constant 0 : index
    %c0_10 = arith.constant 0 : index
    %c0_11 = arith.constant 0 : index
    %9 = vector.load %arg5[%c0_9, %c0_10, %c0_11] : memref<1x64x128xf32, #tpu.memory_space<vmem>>, vector<1x64x128xf32>
    %10 = vector.shape_cast %9 : vector<1x64x128xf32> to vector<64x128xf32>
    %cst_12 = arith.constant dense<0.000000e+00> : vector<64xf32>
    %11 = vector.multi_reduction <add>, %10, %cst_12 [1] : vector<64x128xf32> to vector<64xf32>
    %12 = vector.shape_cast %11 : vector<64xf32> to vector<64x1xf32>
    %13 = arith.addf %8, %12 : vector<64x1xf32>
    %cst_13 = arith.constant 3.125000e-02 : f32
    %14 = vector.broadcast %cst_13 : f32 to vector<64x1xf32>
    %15 = arith.mulf %13, %14 : vector<64x1xf32>
    %16 = tpu.iota {dimensions = array<i32: 1>} : vector<1x128xi32>
    %c32_i32 = arith.constant 32 : i32
    %17 = vector.broadcast %c32_i32 : i32 to vector<1x128xi32>
    %18 = arith.cmpi slt, %16, %17 : vector<1x128xi32>
    %cst_14 = arith.constant 0.000000e+00 : f32
    %19 = vector.broadcast %cst_14 : f32 to vector<64x1xf32>
    %c0_15 = arith.constant 0 : index
    %c0_16 = arith.constant 0 : index
    %c0_17 = arith.constant 0 : index
    %20 = vector.load %arg5[%c0_15, %c0_16, %c0_17] : memref<1x64x128xf32, #tpu.memory_space<vmem>>, vector<1x64x128xf32>
    %21 = vector.shape_cast %20 : vector<1x64x128xf32> to vector<64x128xf32>
    %22 = vector.broadcast %15 : vector<64x1xf32> to vector<64x128xf32>
    %23 = arith.subf %21, %22 : vector<64x128xf32>
    %cst_18 = arith.constant 0.000000e+00 : f32
    %24 = vector.shape_cast %18 : vector<1x128xi1> to vector<1x128xi1>
    %25 = vector.broadcast %24 : vector<1x128xi1> to vector<64x128xi1>
    %26 = vector.broadcast %cst_18 : f32 to vector<64x128xf32>
    %27 = arith.select %25, %23, %26 : vector<64x128xi1>, vector<64x128xf32>
    %28 = arith.mulf %27, %27 : vector<64x128xf32>
    %cst_19 = arith.constant dense<0.000000e+00> : vector<64xf32>
    %29 = vector.multi_reduction <add>, %28, %cst_19 [1] : vector<64x128xf32> to vector<64xf32>
    %30 = vector.shape_cast %29 : vector<64xf32> to vector<64x1xf32>
    %31 = arith.addf %19, %30 : vector<64x1xf32>
    %cst_20 = arith.constant 3.125000e-02 : f32
    %32 = vector.broadcast %cst_20 : f32 to vector<64x1xf32>
    %33 = arith.mulf %31, %32 : vector<64x1xf32>
    %c0_21 = arith.constant 0 : index
    %c0_22 = arith.constant 0 : index
    %34 = vector.load %arg2[%c0_21, %c0_22] : memref<64x1xf32, #tpu.memory_space<vmem>>, vector<64x1xf32>
    %cst_23 = arith.constant 9.99999974E-6 : f32
    %35 = vector.broadcast %cst_23 : f32 to vector<64x1xf32>
    %36 = arith.addf %33, %35 : vector<64x1xf32>
    %37 = math.rsqrt %36 : vector<64x1xf32>
    %38 = arith.mulf %34, %37 : vector<64x1xf32>
    %c0_24 = arith.constant 0 : index
    %c0_25 = arith.constant 0 : index
    %39 = vector.load %arg3[%c0_24, %c0_25] : memref<64x1xf32, #tpu.memory_space<vmem>>, vector<64x1xf32>
    %40 = arith.mulf %15, %38 : vector<64x1xf32>
    %41 = arith.subf %39, %40 : vector<64x1xf32>
    %c0_26 = arith.constant 0 : index
    %c0_27 = arith.constant 0 : index
    %c0_28 = arith.constant 0 : index
    %42 = vector.load %arg5[%c0_26, %c0_27, %c0_28] : memref<1x64x128xf32, #tpu.memory_space<vmem>>, vector<1x64x128xf32>
    %43 = vector.shape_cast %42 : vector<1x64x128xf32> to vector<64x128xf32>
    %44 = vector.broadcast %38 : vector<64x1xf32> to vector<64x128xf32>
    %45 = arith.mulf %43, %44 : vector<64x128xf32>
    %46 = vector.broadcast %41 : vector<64x1xf32> to vector<64x128xf32>
    %47 = arith.addf %45, %46 : vector<64x128xf32>
    %cst_29 = arith.constant 0.000000e+00 : f32
    %48 = vector.broadcast %cst_29 : f32 to vector<64x128xf32>
    %49 = arith.maximumf %47, %48 : vector<64x128xf32>
    %50 = arith.truncf %49 : vector<64x128xf32> to vector<64x128xbf16>
    %c0_30 = arith.constant 0 : index
    %c0_31 = arith.constant 0 : index
    %c0_32 = arith.constant 0 : index
    %51 = vector.load %arg4[%c0_30, %c0_31, %c0_32] : memref<1x64x128xbf16, #tpu.memory_space<vmem>>, vector<1x64x128xbf16>
    %52 = vector.shape_cast %51 : vector<1x64x128xbf16> to vector<64x128xbf16>
    %53 = vector.shape_cast %50 : vector<64x128xbf16> to vector<1x64x128xbf16>
    tpu.vector_store %arg4[%c0_30, %c0_31, %c0_32], %53 {strides = array<i32>} : memref<1x64x128xbf16, #tpu.memory_space<vmem>>, vector<1x64x128xbf16>,
    return
  }
}

module attributes {stable_mosaic.version = 11 : i64} {
  func.func @_fused_phase_bn_relu_kernel(%arg0: memref<4x32x256xbf16, #tpu.memory_space<vmem>>, %arg1: memref<4x256x128xbf16, #tpu.memory_space<vmem>>, %arg2: memref<32x1xf32, #tpu.memory_space<vmem>>, %arg3: memref<32x1xf32, #tpu.memory_space<vmem>>, %arg4: memref<4x32x128xbf16, #tpu.memory_space<vmem>>, %arg5: memref<4x32x128xf32, #tpu.memory_space<vmem>>) attributes {dimension_semantics = [], scalar_prefetch = 0 : i64, scratch_operands = 1 : i64, tpu.core_type = #tpu.core_type<tc>} {
    %c0 = arith.constant 0 : index
    %c0_0 = arith.constant 0 : index
    %c0_1 = arith.constant 0 : index
    %0 = vector.load %arg0[%c0, %c0_0, %c0_1] : memref<4x32x256xbf16, #tpu.memory_space<vmem>>, vector<1x32x256xbf16>
    %1 = vector.shape_cast %0 : vector<1x32x256xbf16> to vector<32x256xbf16>
    %c0_2 = arith.constant 0 : index
    %c0_3 = arith.constant 0 : index
    %c0_4 = arith.constant 0 : index
    %2 = vector.load %arg1[%c0_2, %c0_3, %c0_4] : memref<4x256x128xbf16, #tpu.memory_space<vmem>>, vector<1x256x128xbf16>
    %3 = vector.shape_cast %2 : vector<1x256x128xbf16> to vector<256x128xbf16>
    %cst = arith.constant dense<0.000000e+00> : vector<32x128xf32>
    %4 = tpu.matmul %1, %3, %cst {dimension_numbers = #tpu.dot_dimension_numbers<[1], [0], [0], [1], [0, 0, 1, 1], [], []>} : vector<32x256xbf16>, vector<256x128xbf16>, vector<32x128xf32> -> vector<32x128xf32>
    %c0_5 = arith.constant 0 : index
    %c0_6 = arith.constant 0 : index
    %c0_7 = arith.constant 0 : index
    %5 = vector.load %arg5[%c0_5, %c0_6, %c0_7] : memref<4x32x128xf32, #tpu.memory_space<vmem>>, vector<1x32x128xf32>
    %6 = vector.shape_cast %5 : vector<1x32x128xf32> to vector<32x128xf32>
    %7 = vector.shape_cast %4 : vector<32x128xf32> to vector<1x32x128xf32>
    tpu.vector_store %arg5[%c0_5, %c0_6, %c0_7], %7 {strides = array<i32>} : memref<4x32x128xf32, #tpu.memory_space<vmem>>, vector<1x32x128xf32>,
    %c1 = arith.constant 1 : index
    %c0_8 = arith.constant 0 : index
    %c0_9 = arith.constant 0 : index
    %8 = vector.load %arg0[%c1, %c0_8, %c0_9] : memref<4x32x256xbf16, #tpu.memory_space<vmem>>, vector<1x32x256xbf16>
    %9 = vector.shape_cast %8 : vector<1x32x256xbf16> to vector<32x256xbf16>
    %c1_10 = arith.constant 1 : index
    %c0_11 = arith.constant 0 : index
    %c0_12 = arith.constant 0 : index
    %10 = vector.load %arg1[%c1_10, %c0_11, %c0_12] : memref<4x256x128xbf16, #tpu.memory_space<vmem>>, vector<1x256x128xbf16>
    %11 = vector.shape_cast %10 : vector<1x256x128xbf16> to vector<256x128xbf16>
    %cst_13 = arith.constant dense<0.000000e+00> : vector<32x128xf32>
    %12 = tpu.matmul %9, %11, %cst_13 {dimension_numbers = #tpu.dot_dimension_numbers<[1], [0], [0], [1], [0, 0, 1, 1], [], []>} : vector<32x256xbf16>, vector<256x128xbf16>, vector<32x128xf32> -> vector<32x128xf32>
    %c1_14 = arith.constant 1 : index
    %c0_15 = arith.constant 0 : index
    %c0_16 = arith.constant 0 : index
    %13 = vector.load %arg5[%c1_14, %c0_15, %c0_16] : memref<4x32x128xf32, #tpu.memory_space<vmem>>, vector<1x32x128xf32>
    %14 = vector.shape_cast %13 : vector<1x32x128xf32> to vector<32x128xf32>
    %15 = vector.shape_cast %12 : vector<32x128xf32> to vector<1x32x128xf32>
    tpu.vector_store %arg5[%c1_14, %c0_15, %c0_16], %15 {strides = array<i32>} : memref<4x32x128xf32, #tpu.memory_space<vmem>>, vector<1x32x128xf32>,
    %c2 = arith.constant 2 : index
    %c0_17 = arith.constant 0 : index
    %c0_18 = arith.constant 0 : index
    %16 = vector.load %arg0[%c2, %c0_17, %c0_18] : memref<4x32x256xbf16, #tpu.memory_space<vmem>>, vector<1x32x256xbf16>
    %17 = vector.shape_cast %16 : vector<1x32x256xbf16> to vector<32x256xbf16>
    %c2_19 = arith.constant 2 : index
    %c0_20 = arith.constant 0 : index
    %c0_21 = arith.constant 0 : index
    %18 = vector.load %arg1[%c2_19, %c0_20, %c0_21] : memref<4x256x128xbf16, #tpu.memory_space<vmem>>, vector<1x256x128xbf16>
    %19 = vector.shape_cast %18 : vector<1x256x128xbf16> to vector<256x128xbf16>
    %cst_22 = arith.constant dense<0.000000e+00> : vector<32x128xf32>
    %20 = tpu.matmul %17, %19, %cst_22 {dimension_numbers = #tpu.dot_dimension_numbers<[1], [0], [0], [1], [0, 0, 1, 1], [], []>} : vector<32x256xbf16>, vector<256x128xbf16>, vector<32x128xf32> -> vector<32x128xf32>
    %c2_23 = arith.constant 2 : index
    %c0_24 = arith.constant 0 : index
    %c0_25 = arith.constant 0 : index
    %21 = vector.load %arg5[%c2_23, %c0_24, %c0_25] : memref<4x32x128xf32, #tpu.memory_space<vmem>>, vector<1x32x128xf32>
    %22 = vector.shape_cast %21 : vector<1x32x128xf32> to vector<32x128xf32>
    %23 = vector.shape_cast %20 : vector<32x128xf32> to vector<1x32x128xf32>
    tpu.vector_store %arg5[%c2_23, %c0_24, %c0_25], %23 {strides = array<i32>} : memref<4x32x128xf32, #tpu.memory_space<vmem>>, vector<1x32x128xf32>,
    %c3 = arith.constant 3 : index
    %c0_26 = arith.constant 0 : index
    %c0_27 = arith.constant 0 : index
    %24 = vector.load %arg0[%c3, %c0_26, %c0_27] : memref<4x32x256xbf16, #tpu.memory_space<vmem>>, vector<1x32x256xbf16>
    %25 = vector.shape_cast %24 : vector<1x32x256xbf16> to vector<32x256xbf16>
    %c3_28 = arith.constant 3 : index
    %c0_29 = arith.constant 0 : index
    %c0_30 = arith.constant 0 : index
    %26 = vector.load %arg1[%c3_28, %c0_29, %c0_30] : memref<4x256x128xbf16, #tpu.memory_space<vmem>>, vector<1x256x128xbf16>
    %27 = vector.shape_cast %26 : vector<1x256x128xbf16> to vector<256x128xbf16>
    %cst_31 = arith.constant dense<0.000000e+00> : vector<32x128xf32>
    %28 = tpu.matmul %25, %27, %cst_31 {dimension_numbers = #tpu.dot_dimension_numbers<[1], [0], [0], [1], [0, 0, 1, 1], [], []>} : vector<32x256xbf16>, vector<256x128xbf16>, vector<32x128xf32> -> vector<32x128xf32>
    %c3_32 = arith.constant 3 : index
    %c0_33 = arith.constant 0 : index
    %c0_34 = arith.constant 0 : index
    %29 = vector.load %arg5[%c3_32, %c0_33, %c0_34] : memref<4x32x128xf32, #tpu.memory_space<vmem>>, vector<1x32x128xf32>
    %30 = vector.shape_cast %29 : vector<1x32x128xf32> to vector<32x128xf32>
    %31 = vector.shape_cast %28 : vector<32x128xf32> to vector<1x32x128xf32>
    tpu.vector_store %arg5[%c3_32, %c0_33, %c0_34], %31 {strides = array<i32>} : memref<4x32x128xf32, #tpu.memory_space<vmem>>, vector<1x32x128xf32>,
    %cst_35 = arith.constant 0.000000e+00 : f32
    %32 = vector.broadcast %cst_35 : f32 to vector<32x1xf32>
    %c0_36 = arith.constant 0 : index
    %c0_37 = arith.constant 0 : index
    %c0_38 = arith.constant 0 : index
    %33 = vector.load %arg5[%c0_36, %c0_37, %c0_38] : memref<4x32x128xf32, #tpu.memory_space<vmem>>, vector<1x32x128xf32>
    %34 = vector.shape_cast %33 : vector<1x32x128xf32> to vector<32x128xf32>
    %cst_39 = arith.constant dense<0.000000e+00> : vector<32xf32>
    %35 = vector.multi_reduction <add>, %34, %cst_39 [1] : vector<32x128xf32> to vector<32xf32>
    %36 = vector.shape_cast %35 : vector<32xf32> to vector<32x1xf32>
    %37 = arith.addf %32, %36 : vector<32x1xf32>
    %c1_40 = arith.constant 1 : index
    %c0_41 = arith.constant 0 : index
    %c0_42 = arith.constant 0 : index
    %38 = vector.load %arg5[%c1_40, %c0_41, %c0_42] : memref<4x32x128xf32, #tpu.memory_space<vmem>>, vector<1x32x128xf32>
    %39 = vector.shape_cast %38 : vector<1x32x128xf32> to vector<32x128xf32>
    %cst_43 = arith.constant dense<0.000000e+00> : vector<32xf32>
    %40 = vector.multi_reduction <add>, %39, %cst_43 [1] : vector<32x128xf32> to vector<32xf32>
    %41 = vector.shape_cast %40 : vector<32xf32> to vector<32x1xf32>
    %42 = arith.addf %37, %41 : vector<32x1xf32>
    %c2_44 = arith.constant 2 : index
    %c0_45 = arith.constant 0 : index
    %c0_46 = arith.constant 0 : index
    %43 = vector.load %arg5[%c2_44, %c0_45, %c0_46] : memref<4x32x128xf32, #tpu.memory_space<vmem>>, vector<1x32x128xf32>
    %44 = vector.shape_cast %43 : vector<1x32x128xf32> to vector<32x128xf32>
    %cst_47 = arith.constant dense<0.000000e+00> : vector<32xf32>
    %45 = vector.multi_reduction <add>, %44, %cst_47 [1] : vector<32x128xf32> to vector<32xf32>
    %46 = vector.shape_cast %45 : vector<32xf32> to vector<32x1xf32>
    %47 = arith.addf %42, %46 : vector<32x1xf32>
    %c3_48 = arith.constant 3 : index
    %c0_49 = arith.constant 0 : index
    %c0_50 = arith.constant 0 : index
    %48 = vector.load %arg5[%c3_48, %c0_49, %c0_50] : memref<4x32x128xf32, #tpu.memory_space<vmem>>, vector<1x32x128xf32>
    %49 = vector.shape_cast %48 : vector<1x32x128xf32> to vector<32x128xf32>
    %cst_51 = arith.constant dense<0.000000e+00> : vector<32xf32>
    %50 = vector.multi_reduction <add>, %49, %cst_51 [1] : vector<32x128xf32> to vector<32xf32>
    %51 = vector.shape_cast %50 : vector<32xf32> to vector<32x1xf32>
    %52 = arith.addf %47, %51 : vector<32x1xf32>
    %cst_52 = arith.constant 7.812500e-03 : f32
    %53 = vector.broadcast %cst_52 : f32 to vector<32x1xf32>
    %54 = arith.mulf %52, %53 : vector<32x1xf32>
    %55 = tpu.iota {dimensions = array<i32: 1>} : vector<1x128xi32>
    %c32_i32 = arith.constant 32 : i32
    %56 = vector.broadcast %c32_i32 : i32 to vector<1x128xi32>
    %57 = arith.cmpi slt, %55, %56 : vector<1x128xi32>
    %cst_53 = arith.constant 0.000000e+00 : f32
    %58 = vector.broadcast %cst_53 : f32 to vector<32x1xf32>
    %c0_54 = arith.constant 0 : index
    %c0_55 = arith.constant 0 : index
    %c0_56 = arith.constant 0 : index
    %59 = vector.load %arg5[%c0_54, %c0_55, %c0_56] : memref<4x32x128xf32, #tpu.memory_space<vmem>>, vector<1x32x128xf32>
    %60 = vector.shape_cast %59 : vector<1x32x128xf32> to vector<32x128xf32>
    %61 = vector.broadcast %54 : vector<32x1xf32> to vector<32x128xf32>
    %62 = arith.subf %60, %61 : vector<32x128xf32>
    %cst_57 = arith.constant 0.000000e+00 : f32
    %63 = vector.shape_cast %57 : vector<1x128xi1> to vector<1x128xi1>
    %64 = vector.broadcast %63 : vector<1x128xi1> to vector<32x128xi1>
    %65 = vector.broadcast %cst_57 : f32 to vector<32x128xf32>
    %66 = arith.select %64, %62, %65 : vector<32x128xi1>, vector<32x128xf32>
    %67 = arith.mulf %66, %66 : vector<32x128xf32>
    %cst_58 = arith.constant dense<0.000000e+00> : vector<32xf32>
    %68 = vector.multi_reduction <add>, %67, %cst_58 [1] : vector<32x128xf32> to vector<32xf32>
    %69 = vector.shape_cast %68 : vector<32xf32> to vector<32x1xf32>
    %70 = arith.addf %58, %69 : vector<32x1xf32>
    %c1_59 = arith.constant 1 : index
    %c0_60 = arith.constant 0 : index
    %c0_61 = arith.constant 0 : index
    %71 = vector.load %arg5[%c1_59, %c0_60, %c0_61] : memref<4x32x128xf32, #tpu.memory_space<vmem>>, vector<1x32x128xf32>
    %72 = vector.shape_cast %71 : vector<1x32x128xf32> to vector<32x128xf32>
    %73 = vector.broadcast %54 : vector<32x1xf32> to vector<32x128xf32>
    %74 = arith.subf %72, %73 : vector<32x128xf32>
    %cst_62 = arith.constant 0.000000e+00 : f32
    %75 = vector.shape_cast %57 : vector<1x128xi1> to vector<1x128xi1>
    %76 = vector.broadcast %75 : vector<1x128xi1> to vector<32x128xi1>
    %77 = vector.broadcast %cst_62 : f32 to vector<32x128xf32>
    %78 = arith.select %76, %74, %77 : vector<32x128xi1>, vector<32x128xf32>
    %79 = arith.mulf %78, %78 : vector<32x128xf32>
    %cst_63 = arith.constant dense<0.000000e+00> : vector<32xf32>
    %80 = vector.multi_reduction <add>, %79, %cst_63 [1] : vector<32x128xf32> to vector<32xf32>
    %81 = vector.shape_cast %80 : vector<32xf32> to vector<32x1xf32>
    %82 = arith.addf %70, %81 : vector<32x1xf32>
    %c2_64 = arith.constant 2 : index
    %c0_65 = arith.constant 0 : index
    %c0_66 = arith.constant 0 : index
    %83 = vector.load %arg5[%c2_64, %c0_65, %c0_66] : memref<4x32x128xf32, #tpu.memory_space<vmem>>, vector<1x32x128xf32>
    %84 = vector.shape_cast %83 : vector<1x32x128xf32> to vector<32x128xf32>
    %85 = vector.broadcast %54 : vector<32x1xf32> to vector<32x128xf32>
    %86 = arith.subf %84, %85 : vector<32x128xf32>
    %cst_67 = arith.constant 0.000000e+00 : f32
    %87 = vector.shape_cast %57 : vector<1x128xi1> to vector<1x128xi1>
    %88 = vector.broadcast %87 : vector<1x128xi1> to vector<32x128xi1>
    %89 = vector.broadcast %cst_67 : f32 to vector<32x128xf32>
    %90 = arith.select %88, %86, %89 : vector<32x128xi1>, vector<32x128xf32>
    %91 = arith.mulf %90, %90 : vector<32x128xf32>
    %cst_68 = arith.constant dense<0.000000e+00> : vector<32xf32>
    %92 = vector.multi_reduction <add>, %91, %cst_68 [1] : vector<32x128xf32> to vector<32xf32>
    %93 = vector.shape_cast %92 : vector<32xf32> to vector<32x1xf32>
    %94 = arith.addf %82, %93 : vector<32x1xf32>
    %c3_69 = arith.constant 3 : index
    %c0_70 = arith.constant 0 : index
    %c0_71 = arith.constant 0 : index
    %95 = vector.load %arg5[%c3_69, %c0_70, %c0_71] : memref<4x32x128xf32, #tpu.memory_space<vmem>>, vector<1x32x128xf32>
    %96 = vector.shape_cast %95 : vector<1x32x128xf32> to vector<32x128xf32>
    %97 = vector.broadcast %54 : vector<32x1xf32> to vector<32x128xf32>
    %98 = arith.subf %96, %97 : vector<32x128xf32>
    %cst_72 = arith.constant 0.000000e+00 : f32
    %99 = vector.shape_cast %57 : vector<1x128xi1> to vector<1x128xi1>
    %100 = vector.broadcast %99 : vector<1x128xi1> to vector<32x128xi1>
    %101 = vector.broadcast %cst_72 : f32 to vector<32x128xf32>
    %102 = arith.select %100, %98, %101 : vector<32x128xi1>, vector<32x128xf32>
    %103 = arith.mulf %102, %102 : vector<32x128xf32>
    %cst_73 = arith.constant dense<0.000000e+00> : vector<32xf32>
    %104 = vector.multi_reduction <add>, %103, %cst_73 [1] : vector<32x128xf32> to vector<32xf32>
    %105 = vector.shape_cast %104 : vector<32xf32> to vector<32x1xf32>
    %106 = arith.addf %94, %105 : vector<32x1xf32>
    %cst_74 = arith.constant 7.812500e-03 : f32
    %107 = vector.broadcast %cst_74 : f32 to vector<32x1xf32>
    %108 = arith.mulf %106, %107 : vector<32x1xf32>
    %c0_75 = arith.constant 0 : index
    %c0_76 = arith.constant 0 : index
    %109 = vector.load %arg2[%c0_75, %c0_76] : memref<32x1xf32, #tpu.memory_space<vmem>>, vector<32x1xf32>
    %cst_77 = arith.constant 9.99999974E-6 : f32
    %110 = vector.broadcast %cst_77 : f32 to vector<32x1xf32>
    %111 = arith.addf %108, %110 : vector<32x1xf32>
    %112 = math.rsqrt %111 : vector<32x1xf32>
    %113 = arith.mulf %109, %112 : vector<32x1xf32>
    %c0_78 = arith.constant 0 : index
    %c0_79 = arith.constant 0 : index
    %114 = vector.load %arg3[%c0_78, %c0_79] : memref<32x1xf32, #tpu.memory_space<vmem>>, vector<32x1xf32>
    %115 = arith.mulf %54, %113 : vector<32x1xf32>
    %116 = arith.subf %114, %115 : vector<32x1xf32>
    %c0_80 = arith.constant 0 : index
    %c0_81 = arith.constant 0 : index
    %c0_82 = arith.constant 0 : index
    %117 = vector.load %arg5[%c0_80, %c0_81, %c0_82] : memref<4x32x128xf32, #tpu.memory_space<vmem>>, vector<1x32x128xf32>
    %118 = vector.shape_cast %117 : vector<1x32x128xf32> to vector<32x128xf32>
    %119 = vector.broadcast %113 : vector<32x1xf32> to vector<32x128xf32>
    %120 = arith.mulf %118, %119 : vector<32x128xf32>
    %121 = vector.broadcast %116 : vector<32x1xf32> to vector<32x128xf32>
    %122 = arith.addf %120, %121 : vector<32x128xf32>
    %cst_83 = arith.constant 0.000000e+00 : f32
    %123 = vector.broadcast %cst_83 : f32 to vector<32x128xf32>
    %124 = arith.maximumf %122, %123 : vector<32x128xf32>
    %125 = arith.truncf %124 : vector<32x128xf32> to vector<32x128xbf16>
    %c0_84 = arith.constant 0 : index
    %c0_85 = arith.constant 0 : index
    %c0_86 = arith.constant 0 : index
    %126 = vector.load %arg4[%c0_84, %c0_85, %c0_86] : memref<4x32x128xbf16, #tpu.memory_space<vmem>>, vector<1x32x128xbf16>
    %127 = vector.shape_cast %126 : vector<1x32x128xbf16> to vector<32x128xbf16>
    %128 = vector.shape_cast %125 : vector<32x128xbf16> to vector<1x32x128xbf16>
    tpu.vector_store %arg4[%c0_84, %c0_85, %c0_86], %128 {strides = array<i32>} : memref<4x32x128xbf16, #tpu.memory_space<vmem>>, vector<1x32x128xbf16>,
    %c1_87 = arith.constant 1 : index
    %c0_88 = arith.constant 0 : index
    %c0_89 = arith.constant 0 : index
    %129 = vector.load %arg5[%c1_87, %c0_88, %c0_89] : memref<4x32x128xf32, #tpu.memory_space<vmem>>, vector<1x32x128xf32>
    %130 = vector.shape_cast %129 : vector<1x32x128xf32> to vector<32x128xf32>
    %131 = vector.broadcast %113 : vector<32x1xf32> to vector<32x128xf32>
    %132 = arith.mulf %130, %131 : vector<32x128xf32>
    %133 = vector.broadcast %116 : vector<32x1xf32> to vector<32x128xf32>
    %134 = arith.addf %132, %133 : vector<32x128xf32>
    %cst_90 = arith.constant 0.000000e+00 : f32
    %135 = vector.broadcast %cst_90 : f32 to vector<32x128xf32>
    %136 = arith.maximumf %134, %135 : vector<32x128xf32>
    %137 = arith.truncf %136 : vector<32x128xf32> to vector<32x128xbf16>
    %c1_91 = arith.constant 1 : index
    %c0_92 = arith.constant 0 : index
    %c0_93 = arith.constant 0 : index
    %138 = vector.load %arg4[%c1_91, %c0_92, %c0_93] : memref<4x32x128xbf16, #tpu.memory_space<vmem>>, vector<1x32x128xbf16>
    %139 = vector.shape_cast %138 : vector<1x32x128xbf16> to vector<32x128xbf16>
    %140 = vector.shape_cast %137 : vector<32x128xbf16> to vector<1x32x128xbf16>
    tpu.vector_store %arg4[%c1_91, %c0_92, %c0_93], %140 {strides = array<i32>} : memref<4x32x128xbf16, #tpu.memory_space<vmem>>, vector<1x32x128xbf16>,
    %c2_94 = arith.constant 2 : index
    %c0_95 = arith.constant 0 : index
    %c0_96 = arith.constant 0 : index
    %141 = vector.load %arg5[%c2_94, %c0_95, %c0_96] : memref<4x32x128xf32, #tpu.memory_space<vmem>>, vector<1x32x128xf32>
    %142 = vector.shape_cast %141 : vector<1x32x128xf32> to vector<32x128xf32>
    %143 = vector.broadcast %113 : vector<32x1xf32> to vector<32x128xf32>
    %144 = arith.mulf %142, %143 : vector<32x128xf32>
    %145 = vector.broadcast %116 : vector<32x1xf32> to vector<32x128xf32>
    %146 = arith.addf %144, %145 : vector<32x128xf32>
    %cst_97 = arith.constant 0.000000e+00 : f32
    %147 = vector.broadcast %cst_97 : f32 to vector<32x128xf32>
    %148 = arith.maximumf %146, %147 : vector<32x128xf32>
    %149 = arith.truncf %148 : vector<32x128xf32> to vector<32x128xbf16>
    %c2_98 = arith.constant 2 : index
    %c0_99 = arith.constant 0 : index
    %c0_100 = arith.constant 0 : index
    %150 = vector.load %arg4[%c2_98, %c0_99, %c0_100] : memref<4x32x128xbf16, #tpu.memory_space<vmem>>, vector<1x32x128xbf16>
    %151 = vector.shape_cast %150 : vector<1x32x128xbf16> to vector<32x128xbf16>
    %152 = vector.shape_cast %149 : vector<32x128xbf16> to vector<1x32x128xbf16>
    tpu.vector_store %arg4[%c2_98, %c0_99, %c0_100], %152 {strides = array<i32>} : memref<4x32x128xbf16, #tpu.memory_space<vmem>>, vector<1x32x128xbf16>,
    %c3_101 = arith.constant 3 : index
    %c0_102 = arith.constant 0 : index
    %c0_103 = arith.constant 0 : index
    %153 = vector.load %arg5[%c3_101, %c0_102, %c0_103] : memref<4x32x128xf32, #tpu.memory_space<vmem>>, vector<1x32x128xf32>
    %154 = vector.shape_cast %153 : vector<1x32x128xf32> to vector<32x128xf32>
    %155 = vector.broadcast %113 : vector<32x1xf32> to vector<32x128xf32>
    %156 = arith.mulf %154, %155 : vector<32x128xf32>
    %157 = vector.broadcast %116 : vector<32x1xf32> to vector<32x128xf32>
    %158 = arith.addf %156, %157 : vector<32x128xf32>
    %cst_104 = arith.constant 0.000000e+00 : f32
    %159 = vector.broadcast %cst_104 : f32 to vector<32x128xf32>
    %160 = arith.maximumf %158, %159 : vector<32x128xf32>
    %161 = arith.truncf %160 : vector<32x128xf32> to vector<32x128xbf16>
    %c3_105 = arith.constant 3 : index
    %c0_106 = arith.constant 0 : index
    %c0_107 = arith.constant 0 : index
    %162 = vector.load %arg4[%c3_105, %c0_106, %c0_107] : memref<4x32x128xbf16, #tpu.memory_space<vmem>>, vector<1x32x128xbf16>
    %163 = vector.shape_cast %162 : vector<1x32x128xbf16> to vector<32x128xbf16>
    %164 = vector.shape_cast %161 : vector<32x128xbf16> to vector<1x32x128xbf16>
    tpu.vector_store %arg4[%c3_105, %c0_106, %c0_107], %164 {strides = array<i32>} : memref<4x32x128xbf16, #tpu.memory_space<vmem>>, vector<1x32x128xbf16>,
    return
  }
}

module attributes {stable_mosaic.version = 11 : i64} {
  func.func @_fused_phase_bn_relu_kernel(%arg0: memref<4x16x128xbf16, #tpu.memory_space<vmem>>, %arg1: memref<4x128x128xbf16, #tpu.memory_space<vmem>>, %arg2: memref<16x1xf32, #tpu.memory_space<vmem>>, %arg3: memref<16x1xf32, #tpu.memory_space<vmem>>, %arg4: memref<4x16x128xbf16, #tpu.memory_space<vmem>>, %arg5: memref<4x16x128xf32, #tpu.memory_space<vmem>>) attributes {dimension_semantics = [], scalar_prefetch = 0 : i64, scratch_operands = 1 : i64, tpu.core_type = #tpu.core_type<tc>} {
    %c0 = arith.constant 0 : index
    %c0_0 = arith.constant 0 : index
    %c0_1 = arith.constant 0 : index
    %0 = vector.load %arg0[%c0, %c0_0, %c0_1] : memref<4x16x128xbf16, #tpu.memory_space<vmem>>, vector<1x16x128xbf16>
    %1 = vector.shape_cast %0 : vector<1x16x128xbf16> to vector<16x128xbf16>
    %c0_2 = arith.constant 0 : index
    %c0_3 = arith.constant 0 : index
    %c0_4 = arith.constant 0 : index
    %2 = vector.load %arg1[%c0_2, %c0_3, %c0_4] : memref<4x128x128xbf16, #tpu.memory_space<vmem>>, vector<1x128x128xbf16>
    %3 = vector.shape_cast %2 : vector<1x128x128xbf16> to vector<128x128xbf16>
    %cst = arith.constant dense<0.000000e+00> : vector<16x128xf32>
    %4 = tpu.matmul %1, %3, %cst {dimension_numbers = #tpu.dot_dimension_numbers<[1], [0], [0], [1], [0, 0, 1, 1], [], []>} : vector<16x128xbf16>, vector<128x128xbf16>, vector<16x128xf32> -> vector<16x128xf32>
    %c0_5 = arith.constant 0 : index
    %c0_6 = arith.constant 0 : index
    %c0_7 = arith.constant 0 : index
    %5 = vector.load %arg5[%c0_5, %c0_6, %c0_7] : memref<4x16x128xf32, #tpu.memory_space<vmem>>, vector<1x16x128xf32>
    %6 = vector.shape_cast %5 : vector<1x16x128xf32> to vector<16x128xf32>
    %7 = vector.shape_cast %4 : vector<16x128xf32> to vector<1x16x128xf32>
    tpu.vector_store %arg5[%c0_5, %c0_6, %c0_7], %7 {strides = array<i32>} : memref<4x16x128xf32, #tpu.memory_space<vmem>>, vector<1x16x128xf32>,
    %c1 = arith.constant 1 : index
    %c0_8 = arith.constant 0 : index
    %c0_9 = arith.constant 0 : index
    %8 = vector.load %arg0[%c1, %c0_8, %c0_9] : memref<4x16x128xbf16, #tpu.memory_space<vmem>>, vector<1x16x128xbf16>
    %9 = vector.shape_cast %8 : vector<1x16x128xbf16> to vector<16x128xbf16>
    %c1_10 = arith.constant 1 : index
    %c0_11 = arith.constant 0 : index
    %c0_12 = arith.constant 0 : index
    %10 = vector.load %arg1[%c1_10, %c0_11, %c0_12] : memref<4x128x128xbf16, #tpu.memory_space<vmem>>, vector<1x128x128xbf16>
    %11 = vector.shape_cast %10 : vector<1x128x128xbf16> to vector<128x128xbf16>
    %cst_13 = arith.constant dense<0.000000e+00> : vector<16x128xf32>
    %12 = tpu.matmul %9, %11, %cst_13 {dimension_numbers = #tpu.dot_dimension_numbers<[1], [0], [0], [1], [0, 0, 1, 1], [], []>} : vector<16x128xbf16>, vector<128x128xbf16>, vector<16x128xf32> -> vector<16x128xf32>
    %c1_14 = arith.constant 1 : index
    %c0_15 = arith.constant 0 : index
    %c0_16 = arith.constant 0 : index
    %13 = vector.load %arg5[%c1_14, %c0_15, %c0_16] : memref<4x16x128xf32, #tpu.memory_space<vmem>>, vector<1x16x128xf32>
    %14 = vector.shape_cast %13 : vector<1x16x128xf32> to vector<16x128xf32>
    %15 = vector.shape_cast %12 : vector<16x128xf32> to vector<1x16x128xf32>
    tpu.vector_store %arg5[%c1_14, %c0_15, %c0_16], %15 {strides = array<i32>} : memref<4x16x128xf32, #tpu.memory_space<vmem>>, vector<1x16x128xf32>,
    %c2 = arith.constant 2 : index
    %c0_17 = arith.constant 0 : index
    %c0_18 = arith.constant 0 : index
    %16 = vector.load %arg0[%c2, %c0_17, %c0_18] : memref<4x16x128xbf16, #tpu.memory_space<vmem>>, vector<1x16x128xbf16>
    %17 = vector.shape_cast %16 : vector<1x16x128xbf16> to vector<16x128xbf16>
    %c2_19 = arith.constant 2 : index
    %c0_20 = arith.constant 0 : index
    %c0_21 = arith.constant 0 : index
    %18 = vector.load %arg1[%c2_19, %c0_20, %c0_21] : memref<4x128x128xbf16, #tpu.memory_space<vmem>>, vector<1x128x128xbf16>
    %19 = vector.shape_cast %18 : vector<1x128x128xbf16> to vector<128x128xbf16>
    %cst_22 = arith.constant dense<0.000000e+00> : vector<16x128xf32>
    %20 = tpu.matmul %17, %19, %cst_22 {dimension_numbers = #tpu.dot_dimension_numbers<[1], [0], [0], [1], [0, 0, 1, 1], [], []>} : vector<16x128xbf16>, vector<128x128xbf16>, vector<16x128xf32> -> vector<16x128xf32>
    %c2_23 = arith.constant 2 : index
    %c0_24 = arith.constant 0 : index
    %c0_25 = arith.constant 0 : index
    %21 = vector.load %arg5[%c2_23, %c0_24, %c0_25] : memref<4x16x128xf32, #tpu.memory_space<vmem>>, vector<1x16x128xf32>
    %22 = vector.shape_cast %21 : vector<1x16x128xf32> to vector<16x128xf32>
    %23 = vector.shape_cast %20 : vector<16x128xf32> to vector<1x16x128xf32>
    tpu.vector_store %arg5[%c2_23, %c0_24, %c0_25], %23 {strides = array<i32>} : memref<4x16x128xf32, #tpu.memory_space<vmem>>, vector<1x16x128xf32>,
    %c3 = arith.constant 3 : index
    %c0_26 = arith.constant 0 : index
    %c0_27 = arith.constant 0 : index
    %24 = vector.load %arg0[%c3, %c0_26, %c0_27] : memref<4x16x128xbf16, #tpu.memory_space<vmem>>, vector<1x16x128xbf16>
    %25 = vector.shape_cast %24 : vector<1x16x128xbf16> to vector<16x128xbf16>
    %c3_28 = arith.constant 3 : index
    %c0_29 = arith.constant 0 : index
    %c0_30 = arith.constant 0 : index
    %26 = vector.load %arg1[%c3_28, %c0_29, %c0_30] : memref<4x128x128xbf16, #tpu.memory_space<vmem>>, vector<1x128x128xbf16>
    %27 = vector.shape_cast %26 : vector<1x128x128xbf16> to vector<128x128xbf16>
    %cst_31 = arith.constant dense<0.000000e+00> : vector<16x128xf32>
    %28 = tpu.matmul %25, %27, %cst_31 {dimension_numbers = #tpu.dot_dimension_numbers<[1], [0], [0], [1], [0, 0, 1, 1], [], []>} : vector<16x128xbf16>, vector<128x128xbf16>, vector<16x128xf32> -> vector<16x128xf32>
    %c3_32 = arith.constant 3 : index
    %c0_33 = arith.constant 0 : index
    %c0_34 = arith.constant 0 : index
    %29 = vector.load %arg5[%c3_32, %c0_33, %c0_34] : memref<4x16x128xf32, #tpu.memory_space<vmem>>, vector<1x16x128xf32>
    %30 = vector.shape_cast %29 : vector<1x16x128xf32> to vector<16x128xf32>
    %31 = vector.shape_cast %28 : vector<16x128xf32> to vector<1x16x128xf32>
    tpu.vector_store %arg5[%c3_32, %c0_33, %c0_34], %31 {strides = array<i32>} : memref<4x16x128xf32, #tpu.memory_space<vmem>>, vector<1x16x128xf32>,
    %cst_35 = arith.constant 0.000000e+00 : f32
    %32 = vector.broadcast %cst_35 : f32 to vector<16x1xf32>
    %c0_36 = arith.constant 0 : index
    %c0_37 = arith.constant 0 : index
    %c0_38 = arith.constant 0 : index
    %33 = vector.load %arg5[%c0_36, %c0_37, %c0_38] : memref<4x16x128xf32, #tpu.memory_space<vmem>>, vector<1x16x128xf32>
    %34 = vector.shape_cast %33 : vector<1x16x128xf32> to vector<16x128xf32>
    %cst_39 = arith.constant dense<0.000000e+00> : vector<16xf32>
    %35 = vector.multi_reduction <add>, %34, %cst_39 [1] : vector<16x128xf32> to vector<16xf32>
    %36 = vector.shape_cast %35 : vector<16xf32> to vector<16x1xf32>
    %37 = arith.addf %32, %36 : vector<16x1xf32>
    %c1_40 = arith.constant 1 : index
    %c0_41 = arith.constant 0 : index
    %c0_42 = arith.constant 0 : index
    %38 = vector.load %arg5[%c1_40, %c0_41, %c0_42] : memref<4x16x128xf32, #tpu.memory_space<vmem>>, vector<1x16x128xf32>
    %39 = vector.shape_cast %38 : vector<1x16x128xf32> to vector<16x128xf32>
    %cst_43 = arith.constant dense<0.000000e+00> : vector<16xf32>
    %40 = vector.multi_reduction <add>, %39, %cst_43 [1] : vector<16x128xf32> to vector<16xf32>
    %41 = vector.shape_cast %40 : vector<16xf32> to vector<16x1xf32>
    %42 = arith.addf %37, %41 : vector<16x1xf32>
    %c2_44 = arith.constant 2 : index
    %c0_45 = arith.constant 0 : index
    %c0_46 = arith.constant 0 : index
    %43 = vector.load %arg5[%c2_44, %c0_45, %c0_46] : memref<4x16x128xf32, #tpu.memory_space<vmem>>, vector<1x16x128xf32>
    %44 = vector.shape_cast %43 : vector<1x16x128xf32> to vector<16x128xf32>
    %cst_47 = arith.constant dense<0.000000e+00> : vector<16xf32>
    %45 = vector.multi_reduction <add>, %44, %cst_47 [1] : vector<16x128xf32> to vector<16xf32>
    %46 = vector.shape_cast %45 : vector<16xf32> to vector<16x1xf32>
    %47 = arith.addf %42, %46 : vector<16x1xf32>
    %c3_48 = arith.constant 3 : index
    %c0_49 = arith.constant 0 : index
    %c0_50 = arith.constant 0 : index
    %48 = vector.load %arg5[%c3_48, %c0_49, %c0_50] : memref<4x16x128xf32, #tpu.memory_space<vmem>>, vector<1x16x128xf32>
    %49 = vector.shape_cast %48 : vector<1x16x128xf32> to vector<16x128xf32>
    %cst_51 = arith.constant dense<0.000000e+00> : vector<16xf32>
    %50 = vector.multi_reduction <add>, %49, %cst_51 [1] : vector<16x128xf32> to vector<16xf32>
    %51 = vector.shape_cast %50 : vector<16xf32> to vector<16x1xf32>
    %52 = arith.addf %47, %51 : vector<16x1xf32>
    %cst_52 = arith.constant 0.001953125 : f32
    %53 = vector.broadcast %cst_52 : f32 to vector<16x1xf32>
    %54 = arith.mulf %52, %53 : vector<16x1xf32>
    %55 = tpu.iota {dimensions = array<i32: 1>} : vector<1x128xi32>
    %c128_i32 = arith.constant 128 : i32
    %56 = vector.broadcast %c128_i32 : i32 to vector<1x128xi32>
    %57 = arith.cmpi slt, %55, %56 : vector<1x128xi32>
    %cst_53 = arith.constant 0.000000e+00 : f32
    %58 = vector.broadcast %cst_53 : f32 to vector<16x1xf32>
    %c0_54 = arith.constant 0 : index
    %c0_55 = arith.constant 0 : index
    %c0_56 = arith.constant 0 : index
    %59 = vector.load %arg5[%c0_54, %c0_55, %c0_56] : memref<4x16x128xf32, #tpu.memory_space<vmem>>, vector<1x16x128xf32>
    %60 = vector.shape_cast %59 : vector<1x16x128xf32> to vector<16x128xf32>
    %61 = vector.broadcast %54 : vector<16x1xf32> to vector<16x128xf32>
    %62 = arith.subf %60, %61 : vector<16x128xf32>
    %cst_57 = arith.constant 0.000000e+00 : f32
    %63 = vector.shape_cast %57 : vector<1x128xi1> to vector<1x128xi1>
    %64 = vector.broadcast %63 : vector<1x128xi1> to vector<16x128xi1>
    %65 = vector.broadcast %cst_57 : f32 to vector<16x128xf32>
    %66 = arith.select %64, %62, %65 : vector<16x128xi1>, vector<16x128xf32>
    %67 = arith.mulf %66, %66 : vector<16x128xf32>
    %cst_58 = arith.constant dense<0.000000e+00> : vector<16xf32>
    %68 = vector.multi_reduction <add>, %67, %cst_58 [1] : vector<16x128xf32> to vector<16xf32>
    %69 = vector.shape_cast %68 : vector<16xf32> to vector<16x1xf32>
    %70 = arith.addf %58, %69 : vector<16x1xf32>
    %c1_59 = arith.constant 1 : index
    %c0_60 = arith.constant 0 : index
    %c0_61 = arith.constant 0 : index
    %71 = vector.load %arg5[%c1_59, %c0_60, %c0_61] : memref<4x16x128xf32, #tpu.memory_space<vmem>>, vector<1x16x128xf32>
    %72 = vector.shape_cast %71 : vector<1x16x128xf32> to vector<16x128xf32>
    %73 = vector.broadcast %54 : vector<16x1xf32> to vector<16x128xf32>
    %74 = arith.subf %72, %73 : vector<16x128xf32>
    %cst_62 = arith.constant 0.000000e+00 : f32
    %75 = vector.shape_cast %57 : vector<1x128xi1> to vector<1x128xi1>
    %76 = vector.broadcast %75 : vector<1x128xi1> to vector<16x128xi1>
    %77 = vector.broadcast %cst_62 : f32 to vector<16x128xf32>
    %78 = arith.select %76, %74, %77 : vector<16x128xi1>, vector<16x128xf32>
    %79 = arith.mulf %78, %78 : vector<16x128xf32>
    %cst_63 = arith.constant dense<0.000000e+00> : vector<16xf32>
    %80 = vector.multi_reduction <add>, %79, %cst_63 [1] : vector<16x128xf32> to vector<16xf32>
    %81 = vector.shape_cast %80 : vector<16xf32> to vector<16x1xf32>
    %82 = arith.addf %70, %81 : vector<16x1xf32>
    %c2_64 = arith.constant 2 : index
    %c0_65 = arith.constant 0 : index
    %c0_66 = arith.constant 0 : index
    %83 = vector.load %arg5[%c2_64, %c0_65, %c0_66] : memref<4x16x128xf32, #tpu.memory_space<vmem>>, vector<1x16x128xf32>
    %84 = vector.shape_cast %83 : vector<1x16x128xf32> to vector<16x128xf32>
    %85 = vector.broadcast %54 : vector<16x1xf32> to vector<16x128xf32>
    %86 = arith.subf %84, %85 : vector<16x128xf32>
    %cst_67 = arith.constant 0.000000e+00 : f32
    %87 = vector.shape_cast %57 : vector<1x128xi1> to vector<1x128xi1>
    %88 = vector.broadcast %87 : vector<1x128xi1> to vector<16x128xi1>
    %89 = vector.broadcast %cst_67 : f32 to vector<16x128xf32>
    %90 = arith.select %88, %86, %89 : vector<16x128xi1>, vector<16x128xf32>
    %91 = arith.mulf %90, %90 : vector<16x128xf32>
    %cst_68 = arith.constant dense<0.000000e+00> : vector<16xf32>
    %92 = vector.multi_reduction <add>, %91, %cst_68 [1] : vector<16x128xf32> to vector<16xf32>
    %93 = vector.shape_cast %92 : vector<16xf32> to vector<16x1xf32>
    %94 = arith.addf %82, %93 : vector<16x1xf32>
    %c3_69 = arith.constant 3 : index
    %c0_70 = arith.constant 0 : index
    %c0_71 = arith.constant 0 : index
    %95 = vector.load %arg5[%c3_69, %c0_70, %c0_71] : memref<4x16x128xf32, #tpu.memory_space<vmem>>, vector<1x16x128xf32>
    %96 = vector.shape_cast %95 : vector<1x16x128xf32> to vector<16x128xf32>
    %97 = vector.broadcast %54 : vector<16x1xf32> to vector<16x128xf32>
    %98 = arith.subf %96, %97 : vector<16x128xf32>
    %cst_72 = arith.constant 0.000000e+00 : f32
    %99 = vector.shape_cast %57 : vector<1x128xi1> to vector<1x128xi1>
    %100 = vector.broadcast %99 : vector<1x128xi1> to vector<16x128xi1>
    %101 = vector.broadcast %cst_72 : f32 to vector<16x128xf32>
    %102 = arith.select %100, %98, %101 : vector<16x128xi1>, vector<16x128xf32>
    %103 = arith.mulf %102, %102 : vector<16x128xf32>
    %cst_73 = arith.constant dense<0.000000e+00> : vector<16xf32>
    %104 = vector.multi_reduction <add>, %103, %cst_73 [1] : vector<16x128xf32> to vector<16xf32>
    %105 = vector.shape_cast %104 : vector<16xf32> to vector<16x1xf32>
    %106 = arith.addf %94, %105 : vector<16x1xf32>
    %cst_74 = arith.constant 0.001953125 : f32
    %107 = vector.broadcast %cst_74 : f32 to vector<16x1xf32>
    %108 = arith.mulf %106, %107 : vector<16x1xf32>
    %c0_75 = arith.constant 0 : index
    %c0_76 = arith.constant 0 : index
    %109 = vector.load %arg2[%c0_75, %c0_76] : memref<16x1xf32, #tpu.memory_space<vmem>>, vector<16x1xf32>
    %cst_77 = arith.constant 9.99999974E-6 : f32
    %110 = vector.broadcast %cst_77 : f32 to vector<16x1xf32>
    %111 = arith.addf %108, %110 : vector<16x1xf32>
    %112 = math.rsqrt %111 : vector<16x1xf32>
    %113 = arith.mulf %109, %112 : vector<16x1xf32>
    %c0_78 = arith.constant 0 : index
    %c0_79 = arith.constant 0 : index
    %114 = vector.load %arg3[%c0_78, %c0_79] : memref<16x1xf32, #tpu.memory_space<vmem>>, vector<16x1xf32>
    %115 = arith.mulf %54, %113 : vector<16x1xf32>
    %116 = arith.subf %114, %115 : vector<16x1xf32>
    %c0_80 = arith.constant 0 : index
    %c0_81 = arith.constant 0 : index
    %c0_82 = arith.constant 0 : index
    %117 = vector.load %arg5[%c0_80, %c0_81, %c0_82] : memref<4x16x128xf32, #tpu.memory_space<vmem>>, vector<1x16x128xf32>
    %118 = vector.shape_cast %117 : vector<1x16x128xf32> to vector<16x128xf32>
    %119 = vector.broadcast %113 : vector<16x1xf32> to vector<16x128xf32>
    %120 = arith.mulf %118, %119 : vector<16x128xf32>
    %121 = vector.broadcast %116 : vector<16x1xf32> to vector<16x128xf32>
    %122 = arith.addf %120, %121 : vector<16x128xf32>
    %cst_83 = arith.constant 0.000000e+00 : f32
    %123 = vector.broadcast %cst_83 : f32 to vector<16x128xf32>
    %124 = arith.maximumf %122, %123 : vector<16x128xf32>
    %125 = arith.truncf %124 : vector<16x128xf32> to vector<16x128xbf16>
    %c0_84 = arith.constant 0 : index
    %c0_85 = arith.constant 0 : index
    %c0_86 = arith.constant 0 : index
    %126 = vector.load %arg4[%c0_84, %c0_85, %c0_86] : memref<4x16x128xbf16, #tpu.memory_space<vmem>>, vector<1x16x128xbf16>
    %127 = vector.shape_cast %126 : vector<1x16x128xbf16> to vector<16x128xbf16>
    %128 = vector.shape_cast %125 : vector<16x128xbf16> to vector<1x16x128xbf16>
    tpu.vector_store %arg4[%c0_84, %c0_85, %c0_86], %128 {strides = array<i32>} : memref<4x16x128xbf16, #tpu.memory_space<vmem>>, vector<1x16x128xbf16>,
    %c1_87 = arith.constant 1 : index
    %c0_88 = arith.constant 0 : index
    %c0_89 = arith.constant 0 : index
    %129 = vector.load %arg5[%c1_87, %c0_88, %c0_89] : memref<4x16x128xf32, #tpu.memory_space<vmem>>, vector<1x16x128xf32>
    %130 = vector.shape_cast %129 : vector<1x16x128xf32> to vector<16x128xf32>
    %131 = vector.broadcast %113 : vector<16x1xf32> to vector<16x128xf32>
    %132 = arith.mulf %130, %131 : vector<16x128xf32>
    %133 = vector.broadcast %116 : vector<16x1xf32> to vector<16x128xf32>
    %134 = arith.addf %132, %133 : vector<16x128xf32>
    %cst_90 = arith.constant 0.000000e+00 : f32
    %135 = vector.broadcast %cst_90 : f32 to vector<16x128xf32>
    %136 = arith.maximumf %134, %135 : vector<16x128xf32>
    %137 = arith.truncf %136 : vector<16x128xf32> to vector<16x128xbf16>
    %c1_91 = arith.constant 1 : index
    %c0_92 = arith.constant 0 : index
    %c0_93 = arith.constant 0 : index
    %138 = vector.load %arg4[%c1_91, %c0_92, %c0_93] : memref<4x16x128xbf16, #tpu.memory_space<vmem>>, vector<1x16x128xbf16>
    %139 = vector.shape_cast %138 : vector<1x16x128xbf16> to vector<16x128xbf16>
    %140 = vector.shape_cast %137 : vector<16x128xbf16> to vector<1x16x128xbf16>
    tpu.vector_store %arg4[%c1_91, %c0_92, %c0_93], %140 {strides = array<i32>} : memref<4x16x128xbf16, #tpu.memory_space<vmem>>, vector<1x16x128xbf16>,
    %c2_94 = arith.constant 2 : index
    %c0_95 = arith.constant 0 : index
    %c0_96 = arith.constant 0 : index
    %141 = vector.load %arg5[%c2_94, %c0_95, %c0_96] : memref<4x16x128xf32, #tpu.memory_space<vmem>>, vector<1x16x128xf32>
    %142 = vector.shape_cast %141 : vector<1x16x128xf32> to vector<16x128xf32>
    %143 = vector.broadcast %113 : vector<16x1xf32> to vector<16x128xf32>
    %144 = arith.mulf %142, %143 : vector<16x128xf32>
    %145 = vector.broadcast %116 : vector<16x1xf32> to vector<16x128xf32>
    %146 = arith.addf %144, %145 : vector<16x128xf32>
    %cst_97 = arith.constant 0.000000e+00 : f32
    %147 = vector.broadcast %cst_97 : f32 to vector<16x128xf32>
    %148 = arith.maximumf %146, %147 : vector<16x128xf32>
    %149 = arith.truncf %148 : vector<16x128xf32> to vector<16x128xbf16>
    %c2_98 = arith.constant 2 : index
    %c0_99 = arith.constant 0 : index
    %c0_100 = arith.constant 0 : index
    %150 = vector.load %arg4[%c2_98, %c0_99, %c0_100] : memref<4x16x128xbf16, #tpu.memory_space<vmem>>, vector<1x16x128xbf16>
    %151 = vector.shape_cast %150 : vector<1x16x128xbf16> to vector<16x128xbf16>
    %152 = vector.shape_cast %149 : vector<16x128xbf16> to vector<1x16x128xbf16>
    tpu.vector_store %arg4[%c2_98, %c0_99, %c0_100], %152 {strides = array<i32>} : memref<4x16x128xbf16, #tpu.memory_space<vmem>>, vector<1x16x128xbf16>,
    %c3_101 = arith.constant 3 : index
    %c0_102 = arith.constant 0 : index
    %c0_103 = arith.constant 0 : index
    %153 = vector.load %arg5[%c3_101, %c0_102, %c0_103] : memref<4x16x128xf32, #tpu.memory_space<vmem>>, vector<1x16x128xf32>
    %154 = vector.shape_cast %153 : vector<1x16x128xf32> to vector<16x128xf32>
    %155 = vector.broadcast %113 : vector<16x1xf32> to vector<16x128xf32>
    %156 = arith.mulf %154, %155 : vector<16x128xf32>
    %157 = vector.broadcast %116 : vector<16x1xf32> to vector<16x128xf32>
    %158 = arith.addf %156, %157 : vector<16x128xf32>
    %cst_104 = arith.constant 0.000000e+00 : f32
    %159 = vector.broadcast %cst_104 : f32 to vector<16x128xf32>
    %160 = arith.maximumf %158, %159 : vector<16x128xf32>
    %161 = arith.truncf %160 : vector<16x128xf32> to vector<16x128xbf16>
    %c3_105 = arith.constant 3 : index
    %c0_106 = arith.constant 0 : index
    %c0_107 = arith.constant 0 : index
    %162 = vector.load %arg4[%c3_105, %c0_106, %c0_107] : memref<4x16x128xbf16, #tpu.memory_space<vmem>>, vector<1x16x128xbf16>
    %163 = vector.shape_cast %162 : vector<1x16x128xbf16> to vector<16x128xbf16>
    %164 = vector.shape_cast %161 : vector<16x128xbf16> to vector<1x16x128xbf16>
    tpu.vector_store %arg4[%c3_105, %c0_106, %c0_107], %164 {strides = array<i32>} : memref<4x16x128xbf16, #tpu.memory_space<vmem>>, vector<1x16x128xbf16>,
    return
  }
}

module attributes {stable_mosaic.version = 11 : i64} {
  func.func @_fused_phase_bn_relu_kernel(%arg0: memref<4x8x64xbf16, #tpu.memory_space<vmem>>, %arg1: memref<4x64x512xbf16, #tpu.memory_space<vmem>>, %arg2: memref<8x1xf32, #tpu.memory_space<vmem>>, %arg3: memref<8x1xf32, #tpu.memory_space<vmem>>, %arg4: memref<4x8x512xbf16, #tpu.memory_space<vmem>>, %arg5: memref<4x8x512xf32, #tpu.memory_space<vmem>>) attributes {dimension_semantics = [], scalar_prefetch = 0 : i64, scratch_operands = 1 : i64, tpu.core_type = #tpu.core_type<tc>} {
    %c0 = arith.constant 0 : index
    %c0_0 = arith.constant 0 : index
    %c0_1 = arith.constant 0 : index
    %0 = vector.load %arg0[%c0, %c0_0, %c0_1] : memref<4x8x64xbf16, #tpu.memory_space<vmem>>, vector<1x8x64xbf16>
    %1 = vector.shape_cast %0 : vector<1x8x64xbf16> to vector<8x64xbf16>
    %c0_2 = arith.constant 0 : index
    %c0_3 = arith.constant 0 : index
    %c0_4 = arith.constant 0 : index
    %2 = vector.load %arg1[%c0_2, %c0_3, %c0_4] : memref<4x64x512xbf16, #tpu.memory_space<vmem>>, vector<1x64x512xbf16>
    %3 = vector.shape_cast %2 : vector<1x64x512xbf16> to vector<64x512xbf16>
    %cst = arith.constant dense<0.000000e+00> : vector<8x512xf32>
    %4 = tpu.matmul %1, %3, %cst {dimension_numbers = #tpu.dot_dimension_numbers<[1], [0], [0], [1], [0, 0, 1, 1], [], []>} : vector<8x64xbf16>, vector<64x512xbf16>, vector<8x512xf32> -> vector<8x512xf32>
    %c0_5 = arith.constant 0 : index
    %c0_6 = arith.constant 0 : index
    %c0_7 = arith.constant 0 : index
    %5 = vector.load %arg5[%c0_5, %c0_6, %c0_7] : memref<4x8x512xf32, #tpu.memory_space<vmem>>, vector<1x8x512xf32>
    %6 = vector.shape_cast %5 : vector<1x8x512xf32> to vector<8x512xf32>
    %7 = vector.shape_cast %4 : vector<8x512xf32> to vector<1x8x512xf32>
    tpu.vector_store %arg5[%c0_5, %c0_6, %c0_7], %7 {strides = array<i32>} : memref<4x8x512xf32, #tpu.memory_space<vmem>>, vector<1x8x512xf32>,
    %c1 = arith.constant 1 : index
    %c0_8 = arith.constant 0 : index
    %c0_9 = arith.constant 0 : index
    %8 = vector.load %arg0[%c1, %c0_8, %c0_9] : memref<4x8x64xbf16, #tpu.memory_space<vmem>>, vector<1x8x64xbf16>
    %9 = vector.shape_cast %8 : vector<1x8x64xbf16> to vector<8x64xbf16>
    %c1_10 = arith.constant 1 : index
    %c0_11 = arith.constant 0 : index
    %c0_12 = arith.constant 0 : index
    %10 = vector.load %arg1[%c1_10, %c0_11, %c0_12] : memref<4x64x512xbf16, #tpu.memory_space<vmem>>, vector<1x64x512xbf16>
    %11 = vector.shape_cast %10 : vector<1x64x512xbf16> to vector<64x512xbf16>
    %cst_13 = arith.constant dense<0.000000e+00> : vector<8x512xf32>
    %12 = tpu.matmul %9, %11, %cst_13 {dimension_numbers = #tpu.dot_dimension_numbers<[1], [0], [0], [1], [0, 0, 1, 1], [], []>} : vector<8x64xbf16>, vector<64x512xbf16>, vector<8x512xf32> -> vector<8x512xf32>
    %c1_14 = arith.constant 1 : index
    %c0_15 = arith.constant 0 : index
    %c0_16 = arith.constant 0 : index
    %13 = vector.load %arg5[%c1_14, %c0_15, %c0_16] : memref<4x8x512xf32, #tpu.memory_space<vmem>>, vector<1x8x512xf32>
    %14 = vector.shape_cast %13 : vector<1x8x512xf32> to vector<8x512xf32>
    %15 = vector.shape_cast %12 : vector<8x512xf32> to vector<1x8x512xf32>
    tpu.vector_store %arg5[%c1_14, %c0_15, %c0_16], %15 {strides = array<i32>} : memref<4x8x512xf32, #tpu.memory_space<vmem>>, vector<1x8x512xf32>,
    %c2 = arith.constant 2 : index
    %c0_17 = arith.constant 0 : index
    %c0_18 = arith.constant 0 : index
    %16 = vector.load %arg0[%c2, %c0_17, %c0_18] : memref<4x8x64xbf16, #tpu.memory_space<vmem>>, vector<1x8x64xbf16>
    %17 = vector.shape_cast %16 : vector<1x8x64xbf16> to vector<8x64xbf16>
    %c2_19 = arith.constant 2 : index
    %c0_20 = arith.constant 0 : index
    %c0_21 = arith.constant 0 : index
    %18 = vector.load %arg1[%c2_19, %c0_20, %c0_21] : memref<4x64x512xbf16, #tpu.memory_space<vmem>>, vector<1x64x512xbf16>
    %19 = vector.shape_cast %18 : vector<1x64x512xbf16> to vector<64x512xbf16>
    %cst_22 = arith.constant dense<0.000000e+00> : vector<8x512xf32>
    %20 = tpu.matmul %17, %19, %cst_22 {dimension_numbers = #tpu.dot_dimension_numbers<[1], [0], [0], [1], [0, 0, 1, 1], [], []>} : vector<8x64xbf16>, vector<64x512xbf16>, vector<8x512xf32> -> vector<8x512xf32>
    %c2_23 = arith.constant 2 : index
    %c0_24 = arith.constant 0 : index
    %c0_25 = arith.constant 0 : index
    %21 = vector.load %arg5[%c2_23, %c0_24, %c0_25] : memref<4x8x512xf32, #tpu.memory_space<vmem>>, vector<1x8x512xf32>
    %22 = vector.shape_cast %21 : vector<1x8x512xf32> to vector<8x512xf32>
    %23 = vector.shape_cast %20 : vector<8x512xf32> to vector<1x8x512xf32>
    tpu.vector_store %arg5[%c2_23, %c0_24, %c0_25], %23 {strides = array<i32>} : memref<4x8x512xf32, #tpu.memory_space<vmem>>, vector<1x8x512xf32>,
    %c3 = arith.constant 3 : index
    %c0_26 = arith.constant 0 : index
    %c0_27 = arith.constant 0 : index
    %24 = vector.load %arg0[%c3, %c0_26, %c0_27] : memref<4x8x64xbf16, #tpu.memory_space<vmem>>, vector<1x8x64xbf16>
    %25 = vector.shape_cast %24 : vector<1x8x64xbf16> to vector<8x64xbf16>
    %c3_28 = arith.constant 3 : index
    %c0_29 = arith.constant 0 : index
    %c0_30 = arith.constant 0 : index
    %26 = vector.load %arg1[%c3_28, %c0_29, %c0_30] : memref<4x64x512xbf16, #tpu.memory_space<vmem>>, vector<1x64x512xbf16>
    %27 = vector.shape_cast %26 : vector<1x64x512xbf16> to vector<64x512xbf16>
    %cst_31 = arith.constant dense<0.000000e+00> : vector<8x512xf32>
    %28 = tpu.matmul %25, %27, %cst_31 {dimension_numbers = #tpu.dot_dimension_numbers<[1], [0], [0], [1], [0, 0, 1, 1], [], []>} : vector<8x64xbf16>, vector<64x512xbf16>, vector<8x512xf32> -> vector<8x512xf32>
    %c3_32 = arith.constant 3 : index
    %c0_33 = arith.constant 0 : index
    %c0_34 = arith.constant 0 : index
    %29 = vector.load %arg5[%c3_32, %c0_33, %c0_34] : memref<4x8x512xf32, #tpu.memory_space<vmem>>, vector<1x8x512xf32>
    %30 = vector.shape_cast %29 : vector<1x8x512xf32> to vector<8x512xf32>
    %31 = vector.shape_cast %28 : vector<8x512xf32> to vector<1x8x512xf32>
    tpu.vector_store %arg5[%c3_32, %c0_33, %c0_34], %31 {strides = array<i32>} : memref<4x8x512xf32, #tpu.memory_space<vmem>>, vector<1x8x512xf32>,
    %cst_35 = arith.constant 0.000000e+00 : f32
    %32 = vector.broadcast %cst_35 : f32 to vector<8x1xf32>
    %c0_36 = arith.constant 0 : index
    %c0_37 = arith.constant 0 : index
    %c0_38 = arith.constant 0 : index
    %33 = vector.load %arg5[%c0_36, %c0_37, %c0_38] : memref<4x8x512xf32, #tpu.memory_space<vmem>>, vector<1x8x512xf32>
    %34 = vector.shape_cast %33 : vector<1x8x512xf32> to vector<8x512xf32>
    %cst_39 = arith.constant dense<0.000000e+00> : vector<8xf32>
    %35 = vector.multi_reduction <add>, %34, %cst_39 [1] : vector<8x512xf32> to vector<8xf32>
    %36 = vector.shape_cast %35 : vector<8xf32> to vector<8x1xf32>
    %37 = arith.addf %32, %36 : vector<8x1xf32>
    %c1_40 = arith.constant 1 : index
    %c0_41 = arith.constant 0 : index
    %c0_42 = arith.constant 0 : index
    %38 = vector.load %arg5[%c1_40, %c0_41, %c0_42] : memref<4x8x512xf32, #tpu.memory_space<vmem>>, vector<1x8x512xf32>
    %39 = vector.shape_cast %38 : vector<1x8x512xf32> to vector<8x512xf32>
    %cst_43 = arith.constant dense<0.000000e+00> : vector<8xf32>
    %40 = vector.multi_reduction <add>, %39, %cst_43 [1] : vector<8x512xf32> to vector<8xf32>
    %41 = vector.shape_cast %40 : vector<8xf32> to vector<8x1xf32>
    %42 = arith.addf %37, %41 : vector<8x1xf32>
    %c2_44 = arith.constant 2 : index
    %c0_45 = arith.constant 0 : index
    %c0_46 = arith.constant 0 : index
    %43 = vector.load %arg5[%c2_44, %c0_45, %c0_46] : memref<4x8x512xf32, #tpu.memory_space<vmem>>, vector<1x8x512xf32>
    %44 = vector.shape_cast %43 : vector<1x8x512xf32> to vector<8x512xf32>
    %cst_47 = arith.constant dense<0.000000e+00> : vector<8xf32>
    %45 = vector.multi_reduction <add>, %44, %cst_47 [1] : vector<8x512xf32> to vector<8xf32>
    %46 = vector.shape_cast %45 : vector<8xf32> to vector<8x1xf32>
    %47 = arith.addf %42, %46 : vector<8x1xf32>
    %c3_48 = arith.constant 3 : index
    %c0_49 = arith.constant 0 : index
    %c0_50 = arith.constant 0 : index
    %48 = vector.load %arg5[%c3_48, %c0_49, %c0_50] : memref<4x8x512xf32, #tpu.memory_space<vmem>>, vector<1x8x512xf32>
    %49 = vector.shape_cast %48 : vector<1x8x512xf32> to vector<8x512xf32>
    %cst_51 = arith.constant dense<0.000000e+00> : vector<8xf32>
    %50 = vector.multi_reduction <add>, %49, %cst_51 [1] : vector<8x512xf32> to vector<8xf32>
    %51 = vector.shape_cast %50 : vector<8xf32> to vector<8x1xf32>
    %52 = arith.addf %47, %51 : vector<8x1xf32>
    %cst_52 = arith.constant 4.8828125E-4 : f32
    %53 = vector.broadcast %cst_52 : f32 to vector<8x1xf32>
    %54 = arith.mulf %52, %53 : vector<8x1xf32>
    %55 = tpu.iota {dimensions = array<i32: 1>} : vector<1x512xi32>
    %c512_i32 = arith.constant 512 : i32
    %56 = vector.broadcast %c512_i32 : i32 to vector<1x512xi32>
    %57 = arith.cmpi slt, %55, %56 : vector<1x512xi32>
    %cst_53 = arith.constant 0.000000e+00 : f32
    %58 = vector.broadcast %cst_53 : f32 to vector<8x1xf32>
    %c0_54 = arith.constant 0 : index
    %c0_55 = arith.constant 0 : index
    %c0_56 = arith.constant 0 : index
    %59 = vector.load %arg5[%c0_54, %c0_55, %c0_56] : memref<4x8x512xf32, #tpu.memory_space<vmem>>, vector<1x8x512xf32>
    %60 = vector.shape_cast %59 : vector<1x8x512xf32> to vector<8x512xf32>
    %61 = vector.broadcast %54 : vector<8x1xf32> to vector<8x512xf32>
    %62 = arith.subf %60, %61 : vector<8x512xf32>
    %cst_57 = arith.constant 0.000000e+00 : f32
    %63 = vector.shape_cast %57 : vector<1x512xi1> to vector<1x512xi1>
    %64 = vector.broadcast %63 : vector<1x512xi1> to vector<8x512xi1>
    %65 = vector.broadcast %cst_57 : f32 to vector<8x512xf32>
    %66 = arith.select %64, %62, %65 : vector<8x512xi1>, vector<8x512xf32>
    %67 = arith.mulf %66, %66 : vector<8x512xf32>
    %cst_58 = arith.constant dense<0.000000e+00> : vector<8xf32>
    %68 = vector.multi_reduction <add>, %67, %cst_58 [1] : vector<8x512xf32> to vector<8xf32>
    %69 = vector.shape_cast %68 : vector<8xf32> to vector<8x1xf32>
    %70 = arith.addf %58, %69 : vector<8x1xf32>
    %c1_59 = arith.constant 1 : index
    %c0_60 = arith.constant 0 : index
    %c0_61 = arith.constant 0 : index
    %71 = vector.load %arg5[%c1_59, %c0_60, %c0_61] : memref<4x8x512xf32, #tpu.memory_space<vmem>>, vector<1x8x512xf32>
    %72 = vector.shape_cast %71 : vector<1x8x512xf32> to vector<8x512xf32>
    %73 = vector.broadcast %54 : vector<8x1xf32> to vector<8x512xf32>
    %74 = arith.subf %72, %73 : vector<8x512xf32>
    %cst_62 = arith.constant 0.000000e+00 : f32
    %75 = vector.shape_cast %57 : vector<1x512xi1> to vector<1x512xi1>
    %76 = vector.broadcast %75 : vector<1x512xi1> to vector<8x512xi1>
    %77 = vector.broadcast %cst_62 : f32 to vector<8x512xf32>
    %78 = arith.select %76, %74, %77 : vector<8x512xi1>, vector<8x512xf32>
    %79 = arith.mulf %78, %78 : vector<8x512xf32>
    %cst_63 = arith.constant dense<0.000000e+00> : vector<8xf32>
    %80 = vector.multi_reduction <add>, %79, %cst_63 [1] : vector<8x512xf32> to vector<8xf32>
    %81 = vector.shape_cast %80 : vector<8xf32> to vector<8x1xf32>
    %82 = arith.addf %70, %81 : vector<8x1xf32>
    %c2_64 = arith.constant 2 : index
    %c0_65 = arith.constant 0 : index
    %c0_66 = arith.constant 0 : index
    %83 = vector.load %arg5[%c2_64, %c0_65, %c0_66] : memref<4x8x512xf32, #tpu.memory_space<vmem>>, vector<1x8x512xf32>
    %84 = vector.shape_cast %83 : vector<1x8x512xf32> to vector<8x512xf32>
    %85 = vector.broadcast %54 : vector<8x1xf32> to vector<8x512xf32>
    %86 = arith.subf %84, %85 : vector<8x512xf32>
    %cst_67 = arith.constant 0.000000e+00 : f32
    %87 = vector.shape_cast %57 : vector<1x512xi1> to vector<1x512xi1>
    %88 = vector.broadcast %87 : vector<1x512xi1> to vector<8x512xi1>
    %89 = vector.broadcast %cst_67 : f32 to vector<8x512xf32>
    %90 = arith.select %88, %86, %89 : vector<8x512xi1>, vector<8x512xf32>
    %91 = arith.mulf %90, %90 : vector<8x512xf32>
    %cst_68 = arith.constant dense<0.000000e+00> : vector<8xf32>
    %92 = vector.multi_reduction <add>, %91, %cst_68 [1] : vector<8x512xf32> to vector<8xf32>
    %93 = vector.shape_cast %92 : vector<8xf32> to vector<8x1xf32>
    %94 = arith.addf %82, %93 : vector<8x1xf32>
    %c3_69 = arith.constant 3 : index
    %c0_70 = arith.constant 0 : index
    %c0_71 = arith.constant 0 : index
    %95 = vector.load %arg5[%c3_69, %c0_70, %c0_71] : memref<4x8x512xf32, #tpu.memory_space<vmem>>, vector<1x8x512xf32>
    %96 = vector.shape_cast %95 : vector<1x8x512xf32> to vector<8x512xf32>
    %97 = vector.broadcast %54 : vector<8x1xf32> to vector<8x512xf32>
    %98 = arith.subf %96, %97 : vector<8x512xf32>
    %cst_72 = arith.constant 0.000000e+00 : f32
    %99 = vector.shape_cast %57 : vector<1x512xi1> to vector<1x512xi1>
    %100 = vector.broadcast %99 : vector<1x512xi1> to vector<8x512xi1>
    %101 = vector.broadcast %cst_72 : f32 to vector<8x512xf32>
    %102 = arith.select %100, %98, %101 : vector<8x512xi1>, vector<8x512xf32>
    %103 = arith.mulf %102, %102 : vector<8x512xf32>
    %cst_73 = arith.constant dense<0.000000e+00> : vector<8xf32>
    %104 = vector.multi_reduction <add>, %103, %cst_73 [1] : vector<8x512xf32> to vector<8xf32>
    %105 = vector.shape_cast %104 : vector<8xf32> to vector<8x1xf32>
    %106 = arith.addf %94, %105 : vector<8x1xf32>
    %cst_74 = arith.constant 4.8828125E-4 : f32
    %107 = vector.broadcast %cst_74 : f32 to vector<8x1xf32>
    %108 = arith.mulf %106, %107 : vector<8x1xf32>
    %c0_75 = arith.constant 0 : index
    %c0_76 = arith.constant 0 : index
    %109 = vector.load %arg2[%c0_75, %c0_76] : memref<8x1xf32, #tpu.memory_space<vmem>>, vector<8x1xf32>
    %cst_77 = arith.constant 9.99999974E-6 : f32
    %110 = vector.broadcast %cst_77 : f32 to vector<8x1xf32>
    %111 = arith.addf %108, %110 : vector<8x1xf32>
    %112 = math.rsqrt %111 : vector<8x1xf32>
    %113 = arith.mulf %109, %112 : vector<8x1xf32>
    %c0_78 = arith.constant 0 : index
    %c0_79 = arith.constant 0 : index
    %114 = vector.load %arg3[%c0_78, %c0_79] : memref<8x1xf32, #tpu.memory_space<vmem>>, vector<8x1xf32>
    %115 = arith.mulf %54, %113 : vector<8x1xf32>
    %116 = arith.subf %114, %115 : vector<8x1xf32>
    %c0_80 = arith.constant 0 : index
    %c0_81 = arith.constant 0 : index
    %c0_82 = arith.constant 0 : index
    %117 = vector.load %arg5[%c0_80, %c0_81, %c0_82] : memref<4x8x512xf32, #tpu.memory_space<vmem>>, vector<1x8x512xf32>
    %118 = vector.shape_cast %117 : vector<1x8x512xf32> to vector<8x512xf32>
    %119 = vector.broadcast %113 : vector<8x1xf32> to vector<8x512xf32>
    %120 = arith.mulf %118, %119 : vector<8x512xf32>
    %121 = vector.broadcast %116 : vector<8x1xf32> to vector<8x512xf32>
    %122 = arith.addf %120, %121 : vector<8x512xf32>
    %cst_83 = arith.constant 0.000000e+00 : f32
    %123 = vector.broadcast %cst_83 : f32 to vector<8x512xf32>
    %124 = arith.maximumf %122, %123 : vector<8x512xf32>
    %125 = arith.truncf %124 : vector<8x512xf32> to vector<8x512xbf16>
    %c0_84 = arith.constant 0 : index
    %c0_85 = arith.constant 0 : index
    %c0_86 = arith.constant 0 : index
    %126 = vector.load %arg4[%c0_84, %c0_85, %c0_86] : memref<4x8x512xbf16, #tpu.memory_space<vmem>>, vector<1x8x512xbf16>
    %127 = vector.shape_cast %126 : vector<1x8x512xbf16> to vector<8x512xbf16>
    %128 = vector.shape_cast %125 : vector<8x512xbf16> to vector<1x8x512xbf16>
    tpu.vector_store %arg4[%c0_84, %c0_85, %c0_86], %128 {strides = array<i32>} : memref<4x8x512xbf16, #tpu.memory_space<vmem>>, vector<1x8x512xbf16>,
    %c1_87 = arith.constant 1 : index
    %c0_88 = arith.constant 0 : index
    %c0_89 = arith.constant 0 : index
    %129 = vector.load %arg5[%c1_87, %c0_88, %c0_89] : memref<4x8x512xf32, #tpu.memory_space<vmem>>, vector<1x8x512xf32>
    %130 = vector.shape_cast %129 : vector<1x8x512xf32> to vector<8x512xf32>
    %131 = vector.broadcast %113 : vector<8x1xf32> to vector<8x512xf32>
    %132 = arith.mulf %130, %131 : vector<8x512xf32>
    %133 = vector.broadcast %116 : vector<8x1xf32> to vector<8x512xf32>
    %134 = arith.addf %132, %133 : vector<8x512xf32>
    %cst_90 = arith.constant 0.000000e+00 : f32
    %135 = vector.broadcast %cst_90 : f32 to vector<8x512xf32>
    %136 = arith.maximumf %134, %135 : vector<8x512xf32>
    %137 = arith.truncf %136 : vector<8x512xf32> to vector<8x512xbf16>
    %c1_91 = arith.constant 1 : index
    %c0_92 = arith.constant 0 : index
    %c0_93 = arith.constant 0 : index
    %138 = vector.load %arg4[%c1_91, %c0_92, %c0_93] : memref<4x8x512xbf16, #tpu.memory_space<vmem>>, vector<1x8x512xbf16>
    %139 = vector.shape_cast %138 : vector<1x8x512xbf16> to vector<8x512xbf16>
    %140 = vector.shape_cast %137 : vector<8x512xbf16> to vector<1x8x512xbf16>
    tpu.vector_store %arg4[%c1_91, %c0_92, %c0_93], %140 {strides = array<i32>} : memref<4x8x512xbf16, #tpu.memory_space<vmem>>, vector<1x8x512xbf16>,
    %c2_94 = arith.constant 2 : index
    %c0_95 = arith.constant 0 : index
    %c0_96 = arith.constant 0 : index
    %141 = vector.load %arg5[%c2_94, %c0_95, %c0_96] : memref<4x8x512xf32, #tpu.memory_space<vmem>>, vector<1x8x512xf32>
    %142 = vector.shape_cast %141 : vector<1x8x512xf32> to vector<8x512xf32>
    %143 = vector.broadcast %113 : vector<8x1xf32> to vector<8x512xf32>
    %144 = arith.mulf %142, %143 : vector<8x512xf32>
    %145 = vector.broadcast %116 : vector<8x1xf32> to vector<8x512xf32>
    %146 = arith.addf %144, %145 : vector<8x512xf32>
    %cst_97 = arith.constant 0.000000e+00 : f32
    %147 = vector.broadcast %cst_97 : f32 to vector<8x512xf32>
    %148 = arith.maximumf %146, %147 : vector<8x512xf32>
    %149 = arith.truncf %148 : vector<8x512xf32> to vector<8x512xbf16>
    %c2_98 = arith.constant 2 : index
    %c0_99 = arith.constant 0 : index
    %c0_100 = arith.constant 0 : index
    %150 = vector.load %arg4[%c2_98, %c0_99, %c0_100] : memref<4x8x512xbf16, #tpu.memory_space<vmem>>, vector<1x8x512xbf16>
    %151 = vector.shape_cast %150 : vector<1x8x512xbf16> to vector<8x512xbf16>
    %152 = vector.shape_cast %149 : vector<8x512xbf16> to vector<1x8x512xbf16>
    tpu.vector_store %arg4[%c2_98, %c0_99, %c0_100], %152 {strides = array<i32>} : memref<4x8x512xbf16, #tpu.memory_space<vmem>>, vector<1x8x512xbf16>,
    %c3_101 = arith.constant 3 : index
    %c0_102 = arith.constant 0 : index
    %c0_103 = arith.constant 0 : index
    %153 = vector.load %arg5[%c3_101, %c0_102, %c0_103] : memref<4x8x512xf32, #tpu.memory_space<vmem>>, vector<1x8x512xf32>
    %154 = vector.shape_cast %153 : vector<1x8x512xf32> to vector<8x512xf32>
    %155 = vector.broadcast %113 : vector<8x1xf32> to vector<8x512xf32>
    %156 = arith.mulf %154, %155 : vector<8x512xf32>
    %157 = vector.broadcast %116 : vector<8x1xf32> to vector<8x512xf32>
    %158 = arith.addf %156, %157 : vector<8x512xf32>
    %cst_104 = arith.constant 0.000000e+00 : f32
    %159 = vector.broadcast %cst_104 : f32 to vector<8x512xf32>
    %160 = arith.maximumf %158, %159 : vector<8x512xf32>
    %161 = arith.truncf %160 : vector<8x512xf32> to vector<8x512xbf16>
    %c3_105 = arith.constant 3 : index
    %c0_106 = arith.constant 0 : index
    %c0_107 = arith.constant 0 : index
    %162 = vector.load %arg4[%c3_105, %c0_106, %c0_107] : memref<4x8x512xbf16, #tpu.memory_space<vmem>>, vector<1x8x512xbf16>
    %163 = vector.shape_cast %162 : vector<1x8x512xbf16> to vector<8x512xbf16>
    %164 = vector.shape_cast %161 : vector<8x512xbf16> to vector<1x8x512xbf16>
    tpu.vector_store %arg4[%c3_105, %c0_106, %c0_107], %164 {strides = array<i32>} : memref<4x8x512xbf16, #tpu.memory_space<vmem>>, vector<1x8x512xbf16>,
    return
  }
}

module attributes {stable_mosaic.version = 11 : i64} {
  func.func @_matmul_tanh_kernel(%arg0: i32, %arg1: i32, %arg2: memref<1x3x32xbf16, #tpu.memory_space<vmem>>, %arg3: memref<1x32x2048xbf16, #tpu.memory_space<vmem>>, %arg4: memref<1x3x2048xf32, #tpu.memory_space<vmem>>) attributes {dimension_semantics = [#tpu.dimension_semantics<parallel>, #tpu.dimension_semantics<parallel>], iteration_bounds = array<i64: 4, 1>, scalar_prefetch = 0 : i64, scratch_operands = 0 : i64, tpu.core_type = #tpu.core_type<tc>, window_params = [{transform_indices = @transform_0, window_bounds = array<i64: 1, 3, 32>}, {transform_indices = @transform_1, window_bounds = array<i64: 1, 32, 2048>}, {transform_indices = @transform_2, window_bounds = array<i64: 1, 3, 2048>}]} {
    %c0 = arith.constant 0 : index
    %c0_0 = arith.constant 0 : index
    %c0_1 = arith.constant 0 : index
    %0 = vector.load %arg2[%c0, %c0_0, %c0_1] : memref<1x3x32xbf16, #tpu.memory_space<vmem>>, vector<1x3x32xbf16>
    %1 = vector.shape_cast %0 : vector<1x3x32xbf16> to vector<3x32xbf16>
    %c0_2 = arith.constant 0 : index
    %c0_3 = arith.constant 0 : index
    %c0_4 = arith.constant 0 : index
    %2 = vector.load %arg3[%c0_2, %c0_3, %c0_4] : memref<1x32x2048xbf16, #tpu.memory_space<vmem>>, vector<1x32x2048xbf16>
    %3 = vector.shape_cast %2 : vector<1x32x2048xbf16> to vector<32x2048xbf16>
    %cst = arith.constant dense<0.000000e+00> : vector<3x2048xf32>
    %4 = tpu.matmul %1, %3, %cst {dimension_numbers = #tpu.dot_dimension_numbers<[1], [0], [0], [1], [0, 0, 1, 1], [], []>} : vector<3x32xbf16>, vector<32x2048xbf16>, vector<3x2048xf32> -> vector<3x2048xf32>
    %5 = math.tanh %4 : vector<3x2048xf32>
    %c0_5 = arith.constant 0 : index
    %c0_6 = arith.constant 0 : index
    %c0_7 = arith.constant 0 : index
    %6 = vector.load %arg4[%c0_5, %c0_6, %c0_7] : memref<1x3x2048xf32, #tpu.memory_space<vmem>>, vector<1x3x2048xf32>
    %7 = vector.shape_cast %6 : vector<1x3x2048xf32> to vector<3x2048xf32>
    %8 = vector.shape_cast %5 : vector<3x2048xf32> to vector<1x3x2048xf32>
    tpu.vector_store %arg4[%c0_5, %c0_6, %c0_7], %8 {strides = array<i32>} : memref<1x3x2048xf32, #tpu.memory_space<vmem>>, vector<1x3x2048xf32>,
    return
  }
  func.func @transform_0(%arg0: i32, %arg1: i32) -> (i32, i32, i32) {
    %c0_i32 = arith.constant 0 : i32
    %c0_i32_0 = arith.constant 0 : i32
    %c0_i32_1 = arith.constant 0 : i32
    return %arg0, %c0_i32, %c0_i32_0 : i32, i32, i32
  }
  func.func @transform_1(%arg0: i32, %arg1: i32) -> (i32, i32, i32) {
    %c0_i32 = arith.constant 0 : i32
    %c0_i32_0 = arith.constant 0 : i32
    return %arg0, %c0_i32, %arg1 : i32, i32, i32
  }
  func.func @transform_2(%arg0: i32, %arg1: i32) -> (i32, i32, i32) {
    %c0_i32 = arith.constant 0 : i32
    %c0_i32_0 = arith.constant 0 : i32
    return %arg0, %c0_i32, %arg1 : i32, i32, i32
  }
}

</mosaic_0001>

<bundles_post_ra>
// kernel: generator_forward.5
= control target key start
LH: loop header
LB: loop body
LE: loop exit
PB: predicated region body
PF: predicated region fallthrough
CT: control target
= control target key end

     0   :  { %v307_v48 = vlaneseq  ;;  %s976_s1 = inlined_call_operand.vmem [shape: bf16[1,256,128], index: 1, kind: input, shape index: {}]   ;;  %s977_s0 = inlined_call_operand.vmem [shape: bf16[1,64,256], index: 0, kind: input, shape index: {}]   ;;  %s978_s2 = inlined_call_operand.vmem [shape: f32[64,1], index: 2, kind: input, shape index: {}]   ;;  %s979_s3 = inlined_call_operand.vmem [shape: f32[64,1], index: 3, kind: input, shape index: {}]   ;;  %s980_s4 = inlined_call_operand.vmem [shape: bf16[1,64,128], index: 4, kind: output, shape index: {}]  }
   0x1   :  { %v694_v0 = vld [vmem:[%s976_s1 + $0x40] sm:$0xff]   ;;  %v696_v2 = vld [vmem:[%s976_s1 + $0x48] sm:$0xff]   ;;  %v698_v4 = vld [vmem:[%s976_s1 + $0x50] sm:$0xff]  }
   0x2   :  { %v695_v1 = vld [vmem:[%s976_s1] sm:$0xff]   ;;  %635 = vmatprep.subr.bf16.mxu0 %v694_v0  ;;  %675 = vmatprep.subr.bf16.mxu1 %v694_v0  ;;  %v697_v3 = vld [vmem:[%s976_s1 + $0x8] sm:$0xff]   ;;  %v699_v5 = vld [vmem:[%s976_s1 + $0x10] sm:$0xff]   ;;  %v308_v49 = vand.u32 127, %v307_v48 }
   0x3   :  { %636 = vmatpush3.bf16.msra.mxu0 %v695_v1  ;;  %683 = vmatpush3.bf16.msra.mxu1 %v695_v1  ;;  %v700_v6 = vld [vmem:[%s976_s1 + $0x58] sm:$0xff]   ;;  %v702_v8 = vld [vmem:[%s976_s1 + $0x60] sm:$0xff]   ;;  %v704_v10 = vld [vmem:[%s976_s1 + $0x68] sm:$0xff]  }
   0x4   :  { %637 = vmatprep.subr.bf16.mxu0 %v696_v2  ;;  %676 = vmatprep.subr.bf16.mxu1 %v696_v2  ;;  %v701_v7 = vld [vmem:[%s976_s1 + $0x18] sm:$0xff]   ;;  %v703_v9 = vld [vmem:[%s976_s1 + $0x20] sm:$0xff]   ;;  %v705_v13 = vld [vmem:[%s976_s1 + $0x28] sm:$0xff]   ;;  %vm309_vm0 = vcmp.lt.s32.totalorder %v308_v49, 32 }
   0x5   :  { %v712_v11 = vld [vmem:[%s977_s0 + $0x4] ss:$8 sps:$4 sm:$0xff]   ;;  %v706_v14 = vld [vmem:[%s976_s1 + $0x70] sm:$0xff]   ;;  %v708_v16 = vld [vmem:[%s976_s1 + $0x78] sm:$0xff]  }
   0x6   :  { %v715_v12 = vld [vmem:[%s977_s0 + $0x24] ss:$8 sps:$4 sm:$0xff]   ;;  %226 = vmatprep.mubr.bf16.mxu0 %v712_v11  ;;  %v707_v15 = vld [vmem:[%s976_s1 + $0x30] sm:$0xff]   ;;  %v709_v17 = vld [vmem:[%s976_s1 + $0x38] sm:$0xff]  }
   0x7   :  { %638 = vmatpush3.bf16.msra.mxu0 %v697_v3  ;;  %684 = vmatpush3.bf16.msra.mxu1 %v697_v3  ;;  %v710_v18 = vld [vmem:[%s977_s0] ss:$8 sps:$4 sm:$0xff]   ;;  %v716_v20 = vld [vmem:[%s977_s0 + $0x14] ss:$8 sps:$4 sm:$0xff]   ;;  %v718_v22 = vld [vmem:[%s977_s0 + $0x10] ss:$8 sps:$4 sm:$0xff]  }
   0x8   :  { %639 = vmatprep.subr.bf16.mxu0 %v698_v4  ;;  %677 = vmatprep.subr.bf16.mxu1 %v698_v4  ;;  %v713_v19 = vld [vmem:[%s977_s0 + $0x20] ss:$8 sps:$4 sm:$0xff]   ;;  %v719_v21 = vld [vmem:[%s977_s0 + $0x34] ss:$8 sps:$4 sm:$0xff]   ;;  %v721_v23 = vld [vmem:[%s977_s0 + $0x30] ss:$8 sps:$4 sm:$0xff]  }
   0x9   :  { %242 = vmatprep.mubr.bf16.mxu1 %v715_v12 }
   0xb   :  { %640 = vmatpush3.bf16.msra.mxu0 %v699_v5  ;;  %685 = vmatpush3.bf16.msra.mxu1 %v699_v5 }
   0xc   :  { %641 = vmatprep.subr.bf16.mxu0 %v700_v6  ;;  %678 = vmatprep.subr.bf16.mxu1 %v700_v6 }
   0xf   :  { %642 = vmatpush3.bf16.msra.mxu0 %v701_v7  ;;  %686 = vmatpush3.bf16.msra.mxu1 %v701_v7 }
  0x10   :  { %643 = vmatprep.subr.bf16.mxu0 %v702_v8  ;;  %679 = vmatprep.subr.bf16.mxu1 %v702_v8 }
  0x13   :  { %644 = vmatpush3.bf16.msra.mxu0 %v703_v9  ;;  %687 = vmatpush3.bf16.msra.mxu1 %v703_v9 }
  0x14   :  { %645 = vmatprep.subr.bf16.mxu0 %v704_v10  ;;  %680 = vmatprep.subr.bf16.mxu1 %v704_v10 }
  0x17   :  { %646 = vmatpush3.bf16.msra.mxu0 %v705_v13  ;;  %688 = vmatpush3.bf16.msra.mxu1 %v705_v13 }
  0x18   :  { %647 = vmatprep.subr.bf16.mxu0 %v706_v14  ;;  %681 = vmatprep.subr.bf16.mxu1 %v706_v14 }
  0x1b   :  { %648 = vmatpush3.bf16.msra.mxu0 %v707_v15  ;;  %689 = vmatpush3.bf16.msra.mxu1 %v707_v15 }
  0x1c   :  { %649 = vmatprep.subr.bf16.mxu0 %v708_v16  ;;  %682 = vmatprep.subr.bf16.mxu1 %v708_v16 }
  0x1f   :  { %650 = vmatpush3.bf16.msra.mxu0 %v709_v17  ;;  %690 = vmatpush3.bf16.msra.mxu1 %v709_v17 }
  0x22   :  { %227 = vmatmul.mubr.bf16.vlgmr.msra.gmra.mrb[0].mxu0 %v710_v18  ;;  %243 = vmatmul.mubr.bf16.vlgmr.msra.gmra.mrb[0].mxu1 %v713_v19 }
  0x23   :  { %234 = vmatprep.mubr.bf16.mxu0 %v716_v20  ;;  %250 = vmatprep.mubr.bf16.mxu1 %v719_v21 }
  0x2a   :  { %235 = vmatmul.mubr.bf16.gmra.mrb[4].mxu0 %v718_v22  ;;  %251 = vmatmul.mubr.bf16.gmra.mrb[4].mxu1 %v721_v23 }
  0xf5   :  { %v651_v24 = vpop.f32.mrb[0].mxu0  ;;  %v663_v25 = vpop.f32.mrb[0].mxu1 }
  0xf6   :  { %v652_v26 = vpop.f32.mrb[1].mxu0  ;;  %v664_v27 = vpop.f32.mrb[1].mxu1 }
  0xf7   :  { %v836_v28 = vadd.f32 %v652_v26, %v651_v24  ;;  %v838_v29 = vadd.f32 %v664_v27, %v663_v25  ;;  %v654_v30 = vpop.f32.mrb[2].mxu0  ;;  %v666_v31 = vpop.f32.mrb[2].mxu1  ;;  %v738_v26 = vmov 0  }
  0xf8   :  { %v655_v32 = vpop.f32.mrb[3].mxu0  ;;  %v667_v33 = vpop.f32.mrb[3].mxu1  ;;  %692 = vset.pattern.permute.xlu0 %v738_v26  ;;  %693 = vset.pattern.permute.xlu1 %v738_v26  ;;  %v403_v26 = vld [vmem:[%s979_s3 + $0x18] sm:$0xff] }
  0xf9   :  { %v840_v34 = vadd.f32 %v655_v32, %v654_v30  ;;  %v842_v35 = vadd.f32 %v667_v33, %v666_v31  ;;  %275 = vadd.xlane.f32.xlu0 %v836_v28 }
  0xfb   :  { %285 = vadd.xlane.f32.xlu1 %v842_v35 }
  0xfd   :  { %v657_v36 = vpop.f32.mrb[4].mxu0  ;;  %283 = vadd.xlane.f32.xlu0 %v838_v29  ;;  %v669_v37 = vpop.f32.mrb[4].mxu1 }
  0xfe   :  { %v658_v38 = vpop.f32.mrb[5].mxu0  ;;  %v670_v39 = vpop.f32.mrb[5].mxu1 }
  0xff   :  { %v847_v40 = vadd.f32 %v658_v38, %v657_v36  ;;  %v660_v41 = vpop.f32.mrb[6].mxu0  ;;  %v849_v42 = vadd.f32 %v670_v39, %v669_v37  ;;  %v672_v43 = vpop.f32.mrb[6].mxu1 }
 0x100   :  { %v661_v44 = vpop.f32.mrb[7].mxu0  ;;  %v673_v45 = vpop.f32.mrb[7].mxu1 }
 0x101   :  { %279 = vadd.xlane.f32.xlu1 %v847_v40  ;;  %277 = vadd.xlane.f32.xlu0 %v840_v34  ;;  %v853_v46 = vadd.f32 %v661_v44, %v660_v41  ;;  %v855_v47 = vadd.f32 %v673_v45, %v672_v43  ;;  %v368_v44 = vld [vmem:[%s978_s2] sm:$0xff] }
 0x105   :  { %281 = vadd.xlane.f32.xlu1 %v853_v46  ;;  %287 = vadd.xlane.f32.xlu0 %v849_v42 }
 0x109   :  { %289 = vadd.xlane.f32.xlu1 %v855_v47 }
 0x186   :  { %v276_v50 = vpop.xlane.xlu0 %275 }
 0x187   :  { %v860_v51 = vmul.f32 0.03125, %v276_v50 }
 0x188   :  { %v286_v53 = vpop.xlane.xlu1 %285 }
 0x189   :  { %v310_v52 = vsub.f32 %v836_v28, %v860_v51  ;;  %v867_v58 = vmul.f32 0.03125, %v286_v53 }
 0x18a   :  { %v284_v54 = vpop.xlane.xlu0 %283 }
 0x18b   :  { %v864_v55 = vmul.f32 0.03125, %v284_v54  ;;  %v320_v56 = vsel %vm309_vm0, %v310_v52, 0.0  ;;  %v315_v2 = vsub.f32 %v842_v35, %v867_v58  ;;  %v372_v54 = vld [vmem:[%s978_s2 + $0x20] sm:$0xff] }
 0x18c   :  { %v328_v57 = vmul.f32 %v320_v56, %v320_v56 }
 0x18d   :  { %v314_v59 = vsub.f32 %v838_v29, %v864_v55  ;;  %v325_v15 = vsel %vm309_vm0, %v315_v2, 0.0  ;;  %v369_v2 = vld [vmem:[%s978_s2 + $0x8] sm:$0xff] }
 0x18e   :  { %v280_v60 = vpop.xlane.xlu1 %279  ;;  %336 = vadd.xlane.f32.xlu0 %v328_v57  ;;  %v278_v61 = vpop.xlane.xlu0 %277  ;;  %v333_v19 = vmul.f32 %v325_v15, %v325_v15 }
 0x18f   :  { %v871_v62 = vmul.f32 0.03125, %v280_v60  ;;  %v873_v63 = vmul.f32 0.03125, %v278_v61  ;;  %v324_v0 = vsel %vm309_vm0, %v314_v59, 0.0 }
 0x190   :  { %v332_v1 = vmul.f32 %v324_v0, %v324_v0 }
 0x191   :  { %v312_v3 = vsub.f32 %v847_v40, %v871_v62  ;;  %v311_v4 = vsub.f32 %v840_v34, %v873_v63 }
 0x192   :  { %v282_v5 = vpop.xlane.xlu1 %281  ;;  %344 = vadd.xlane.f32.xlu0 %v332_v1  ;;  %v288_v6 = vpop.xlane.xlu0 %287 }
 0x193   :  { %v882_v7 = vmul.f32 0.03125, %v282_v5  ;;  %v884_v8 = vmul.f32 0.03125, %v288_v6  ;;  %v322_v9 = vsel %vm309_vm0, %v312_v3, 0.0  ;;  %v321_v10 = vsel %vm309_vm0, %v311_v4, 0.0 }
 0x194   :  { %v330_v11 = vmul.f32 %v322_v9, %v322_v9  ;;  %v329_v12 = vmul.f32 %v321_v10, %v321_v10  ;;  %v401_v10 = vld [vmem:[%s979_s3 + $0x8] sm:$0xff] }
 0x195   :  { %v313_v13 = vsub.f32 %v853_v46, %v882_v7  ;;  %v316_v14 = vsub.f32 %v849_v42, %v884_v8 }
 0x196   :  { %v290_v16 = vpop.xlane.xlu1 %289  ;;  %340 = vadd.xlane.f32.xlu0 %v330_v11  ;;  %338 = vadd.xlane.f32.xlu1 %v329_v12  ;;  %v373_v11 = vld [vmem:[%s978_s2 + $0x28] sm:$0xff] }
 0x197   :  { %v893_v17 = vmul.f32 0.03125, %v290_v16  ;;  %v326_v18 = vsel %vm309_vm0, %v316_v14, 0.0  ;;  %v323_v22 = vsel %vm309_vm0, %v313_v13, 0.0 }
 0x198   :  { %v334_v20 = vmul.f32 %v326_v18, %v326_v18  ;;  %v331_v23 = vmul.f32 %v323_v22, %v323_v22 }
 0x199   :  { %v317_v21 = vsub.f32 %v855_v47, %v893_v17 }
 0x19a   :  { %346 = vadd.xlane.f32.xlu1 %v333_v19  ;;  %348 = vadd.xlane.f32.xlu0 %v334_v20  ;;  %v405_v19 = vld [vmem:[%s979_s3 + $0x28] sm:$0xff]  ;;  %v400_v20 = vld [vmem:[%s979_s3] sm:$0xff] }
 0x19b   :  { %v327_v24 = vsel %vm309_vm0, %v317_v21, 0.0  ;;  %v371_v21 = vld [vmem:[%s978_s2 + $0x18] sm:$0xff] }
 0x19c   :  { %v335_v25 = vmul.f32 %v327_v24, %v327_v24 }
 0x19e   :  { %342 = vadd.xlane.f32.xlu1 %v331_v23 }
 0x1a2   :  { %350 = vadd.xlane.f32.xlu1 %v335_v25 }
 0x21b   :  { %v337_v27 = vpop.xlane.xlu0 %336 }
 0x21c   :  { %v360_v30 = vmul.f32 0.03125, %v337_v27  ;;  %v404_v27 = vld [vmem:[%s979_s3 + $0x20] sm:$0xff] }
 0x21e   :  { %v376_v31 = vadd.f32 1e-05, %v360_v30  ;;  %v375_v30 = vld [vmem:[%s978_s2 + $0x38] sm:$0xff] }
 0x21f   :  { %v345_v32 = vpop.xlane.xlu0 %344 }
 0x220   :  { %722 = vrsqrt.f32 %v376_v31  ;;  %v364_v33 = vmul.f32 0.03125, %v345_v32 }
 0x222   :  { %v380_v36 = vadd.f32 1e-05, %v364_v33 }
 0x223   :  { %v339_v37 = vpop.xlane.xlu1 %338  ;;  %v341_v45 = vpop.xlane.xlu0 %340 }
 0x224   :  { %724 = vrsqrt.f32 %v380_v36  ;;  %v361_v38 = vmul.f32 0.03125, %v339_v37  ;;  %v362_v57 = vmul.f32 0.03125, %v341_v45  ;;  %v407_v37 = vld [vmem:[%s979_s3 + $0x38] sm:$0xff] }
 0x226   :  { %v377_v39 = vadd.f32 1e-05, %v361_v38  ;;  %v378_v4 = vadd.f32 1e-05, %v362_v57  ;;  %v370_v38 = vld [vmem:[%s978_s2 + $0x10] sm:$0xff] }
 0x227   :  { %v347_v41 = vpop.xlane.xlu1 %346  ;;  %v349_v60 = vpop.xlane.xlu0 %348 }
 0x228   :  { %726 = vrsqrt.f32 %v377_v39  ;;  %v365_v43 = vmul.f32 0.03125, %v347_v41  ;;  %v366_v5 = vmul.f32 0.03125, %v349_v60 }
 0x22a   :  { %v723_v48 = vpop.eup %722  ;;  %v381_v49 = vadd.f32 1e-05, %v365_v43  ;;  %v382_v14 = vadd.f32 1e-05, %v366_v5 }
 0x22b   :  { %v343_v50 = vpop.xlane.xlu1 %342  ;;  %v392_v52 = vmul.f32 %v723_v48, %v368_v44  ;;  %v374_v44 = vld [vmem:[%s978_s2 + $0x30] sm:$0xff] }
 0x22c   :  { %728 = vrsqrt.f32 %v381_v49  ;;  %v363_v53 = vmul.f32 0.03125, %v343_v50  ;;  %v402_v49 = vld [vmem:[%s979_s3 + $0x10] sm:$0xff] }
 0x22d   :  { %426 = vperm.xlu0 %692, %v392_v52   ;;  %v408_v18 = vmul.f32 %v392_v52, %v860_v51  ;;  %v406_v52 = vld [vmem:[%s979_s3 + $0x30] sm:$0xff] }
 0x22e   :  { %v725_v56 = vpop.eup %724  ;;  %v379_v59 = vadd.f32 1e-05, %v363_v53 }
 0x22f   :  { %v351_v61 = vpop.xlane.xlu1 %350  ;;  %v396_v0 = vmul.f32 %v725_v56, %v372_v54  ;;  %v416_v51 = vsub.f32 %v400_v20, %v408_v18 }
 0x230   :  { %730 = vrsqrt.f32 %v379_v59  ;;  %v367_v1 = vmul.f32 0.03125, %v351_v61 }
 0x231   :  { %446 = vperm.xlu1 %693, %v396_v0   ;;  %v412_v25 = vmul.f32 %v396_v0, %v864_v55 }
 0x232   :  { %v727_v3 = vpop.eup %726  ;;  %v383_v6 = vadd.f32 1e-05, %v367_v1 }
 0x233   :  { %v393_v9 = vmul.f32 %v727_v3, %v369_v2  ;;  %v420_v33 = vsub.f32 %v404_v27, %v412_v25 }
 0x234   :  { %732 = vrsqrt.f32 %v383_v6 }
 0x235   :  { %431 = vperm.xlu1 %693, %v393_v9   ;;  %v409_v12 = vmul.f32 %v393_v9, %v873_v63  ;;  %734 = vrsqrt.f32 %v378_v4 }
 0x236   :  { %v729_v13 = vpop.eup %728  ;;  %736 = vrsqrt.f32 %v382_v14 }
 0x237   :  { %v417_v15 = vsub.f32 %v401_v10, %v409_v12  ;;  %v397_v16 = vmul.f32 %v729_v13, %v373_v11 }
 0x239   :  { %479 = vperm.xlu0 %692, %v417_v15   ;;  %451 = vperm.xlu1 %693, %v397_v16   ;;  %v413_v63 = vmul.f32 %v397_v16, %v867_v58 }
 0x23a   :  { %v731_v22 = vpop.eup %730 }
 0x23b   :  { %v421_v23 = vsub.f32 %v405_v19, %v413_v63  ;;  %v395_v24 = vmul.f32 %v731_v22, %v371_v21 }
 0x23d   :  { %499 = vperm.xlu0 %692, %v421_v23   ;;  %474 = vperm.xlu1 %693, %v416_v51   ;;  %v411_v58 = vmul.f32 %v395_v24, %v882_v7 }
 0x23e   :  { %v733_v31 = vpop.eup %732 }
 0x23f   :  { %v419_v32 = vsub.f32 %v403_v26, %v411_v58  ;;  %v399_v55 = vmul.f32 %v733_v31, %v375_v30  ;;  %v735_v36 = vpop.eup %734 }
 0x240   :  { %v394_v43 = vmul.f32 %v735_v36, %v370_v38  ;;  %v737_v7 = vpop.eup %736 }
 0x241   :  { %489 = vperm.xlu0 %692, %v419_v32   ;;  %494 = vperm.xlu1 %693, %v420_v33   ;;  %v415_v39 = vmul.f32 %v399_v55, %v893_v17  ;;  %v398_v45 = vmul.f32 %v737_v7, %v374_v44 }
 0x242   :  { %v410_v48 = vmul.f32 %v394_v43, %v871_v62 }
 0x243   :  { %v423_v41 = vsub.f32 %v407_v37, %v415_v39  ;;  %v414_v50 = vmul.f32 %v398_v45, %v884_v8 }
 0x244   :  { %v418_v17 = vsub.f32 %v402_v49, %v410_v48 }
 0x245   :  { %509 = vperm.xlu0 %692, %v423_v41   ;;  %436 = vperm.xlu1 %693, %v394_v43   ;;  %v422_v53 = vsub.f32 %v406_v52, %v414_v50 }
 0x249   :  { %456 = vperm.xlu1 %693, %v398_v45  }
 0x24d   :  { %441 = vperm.xlu1 %693, %v395_v24  }
 0x251   :  { %461 = vperm.xlu1 %693, %v399_v55  }
 0x255   :  { %484 = vperm.xlu1 %693, %v418_v17  }
 0x259   :  { %504 = vperm.xlu1 %693, %v422_v53  }
 0x2ac   :  { %v427_v56 = vpop.permute.xlu0 %426 }
 0x2ad   :  { %v464_v61 = vmul.f32 %v836_v28, %v427_v56 }
 0x2b0   :  { %v447_v54 = vpop.permute.xlu1 %446 }
 0x2b1   :  { %v468_v4 = vmul.f32 %v838_v29, %v447_v54 }
 0x2b4   :  { %v432_v57 = vpop.permute.xlu1 %431 }
 0x2b5   :  { %v465_v60 = vmul.f32 %v840_v34, %v432_v57 }
 0x2b8   :  { %v452_v59 = vpop.permute.xlu1 %451  ;;  %v480_v62 = vpop.permute.xlu0 %479 }
 0x2b9   :  { %v513_v0 = vadd.f32 %v480_v62, %v465_v60  ;;  %v469_v8 = vmul.f32 %v842_v35, %v452_v59 }
 0x2bb   :  { %v521_v5 = vmax.f32 %v513_v0, 0.0 }
 0x2bc   :  { %v475_v1 = vpop.permute.xlu1 %474  ;;  %v500_v2 = vpop.permute.xlu0 %499 }
 0x2bd   :  { %v512_v3 = vadd.f32 %v475_v1, %v464_v61  ;;  %v517_v9 = vadd.f32 %v500_v2, %v469_v8 }
 0x2bf   :  { %v520_v6 = vmax.f32 %v512_v3, 0.0  ;;  %v525_v34 = vmax.f32 %v517_v9, 0.0 }
 0x2c0   :  { %v495_v10 = vpop.permute.xlu1 %494  ;;  %v490_v16 = vpop.permute.xlu0 %489 }
 0x2c1   :  { %v615_v11 = vpack.c.bf16 %v521_v5, %v520_v6  ;;  %v516_v12 = vadd.f32 %v495_v10, %v468_v4 }
 0x2c3   :  { %616 = vst [vmem:[%s980_s4] sm:$0xff] %v615_v11   ;;  %v524_v28 = vmax.f32 %v516_v12, 0.0 }
 0x2c4   :  { %v437_v13 = vpop.permute.xlu1 %436  ;;  %v510_v23 = vpop.permute.xlu0 %509 }
 0x2c5   :  { %v625_v14 = vpack.c.bf16 %v525_v34, %v524_v28  ;;  %v466_v19 = vmul.f32 %v847_v40, %v437_v13 }
 0x2c7   :  { %633 = vst [vmem:[%s980_s4 + $0x10] sm:$0xff] %v625_v14  }
 0x2c8   :  { %v457_v35 = vpop.permute.xlu1 %456 }
 0x2c9   :  { %v470_v51 = vmul.f32 %v849_v42, %v457_v35 }
 0x2cc   :  { %v442_v29 = vpop.permute.xlu1 %441 }
 0x2cd   :  { %v467_v15 = vmul.f32 %v853_v46, %v442_v29 }
 0x2cf   :  { %v515_v20 = vadd.f32 %v490_v16, %v467_v15 }
 0x2d0   :  { %v462_v18 = vpop.permute.xlu1 %461 }
 0x2d1   :  { %v471_v21 = vmul.f32 %v855_v47, %v462_v18  ;;  %v523_v24 = vmax.f32 %v515_v20, 0.0 }
 0x2d3   :  { %v519_v25 = vadd.f32 %v510_v23, %v471_v21 }
 0x2d4   :  { %v485_v63 = vpop.permute.xlu1 %484 }
 0x2d5   :  { %v514_v22 = vadd.f32 %v485_v63, %v466_v19  ;;  %v527_v31 = vmax.f32 %v519_v25, 0.0 }
 0x2d7   :  { %v522_v26 = vmax.f32 %v514_v22, 0.0 }
 0x2d8   :  { %v505_v27 = vpop.permute.xlu1 %504 }
 0x2d9   :  { %v620_v30 = vpack.c.bf16 %v523_v24, %v522_v26  ;;  %v518_v58 = vadd.f32 %v505_v27, %v470_v51 }
 0x2db   :  { %632 = vst [vmem:[%s980_s4 + $0x8] sm:$0xff] %v620_v30   ;;  %v526_v40 = vmax.f32 %v518_v58, 0.0 }
 0x2dd   :  { %v630_v46 = vpack.c.bf16 %v527_v31, %v526_v40 }
 0x2df   :  { %634 = vst [vmem:[%s980_s4 + $0x18] sm:$0xff] %v630_v46  }

// kernel: generator_forward.6
= control target key start
LH: loop header
LB: loop body
LE: loop exit
PB: predicated region body
PF: predicated region fallthrough
CT: control target
= control target key end

     0   :  { %s2182_s1 = inlined_call_operand.vmem [shape: bf16[4,256,128], index: 1, kind: input, shape index: {}]   ;;  %s2183_s0 = inlined_call_operand.vmem [shape: bf16[4,32,256], index: 0, kind: input, shape index: {}]   ;;  %s2184_s2 = inlined_call_operand.vmem [shape: f32[32,1], index: 2, kind: input, shape index: {}]   ;;  %s2185_s3 = inlined_call_operand.vmem [shape: f32[32,1], index: 3, kind: input, shape index: {}]   ;;  %s2186_s4 = inlined_call_operand.vmem [shape: bf16[4,32,128], index: 4, kind: output, shape index: {}]  }
   0x1   :  { %v1629_v0 = vld [vmem:[%s2182_s1 + $0x40] sm:$0xff]   ;;  %v1633_v4 = vld [vmem:[%s2182_s1 + $0x48] sm:$0xff]   ;;  %v1637_v8 = vld [vmem:[%s2182_s1 + $0x50] sm:$0xff]  }
   0x2   :  { %v1630_v1 = vld [vmem:[%s2182_s1] sm:$0xff]   ;;  %1514 = vmatprep.subr.bf16.mxu0 %v1629_v0  ;;  %v1634_v5 = vld [vmem:[%s2182_s1 + $0x8] sm:$0xff]   ;;  %v1638_v9 = vld [vmem:[%s2182_s1 + $0x10] sm:$0xff]  }
   0x3   :  { %v1631_v2 = vld [vmem:[%s2182_s1 + $0xc0] sm:$0xff]   ;;  %1515 = vmatpush3.bf16.msra.mxu0 %v1630_v1  ;;  %v1635_v6 = vld [vmem:[%s2182_s1 + $0xc8] sm:$0xff]   ;;  %v1639_v10 = vld [vmem:[%s2182_s1 + $0xd0] sm:$0xff]  }
   0x4   :  { %v1632_v3 = vld [vmem:[%s2182_s1 + $0x80] sm:$0xff]   ;;  %1542 = vmatprep.subr.bf16.mxu1 %v1631_v2  ;;  %1516 = vmatprep.subr.bf16.mxu0 %v1633_v4  ;;  %v1636_v7 = vld [vmem:[%s2182_s1 + $0x88] sm:$0xff]   ;;  %v1640_v11 = vld [vmem:[%s2182_s1 + $0x90] sm:$0xff]  }
   0x5   :  { %1543 = vmatpush3.bf16.msra.mxu1 %v1632_v3  ;;  %v1641_v12 = vld [vmem:[%s2182_s1 + $0x58] sm:$0xff]   ;;  %v1645_v16 = vld [vmem:[%s2182_s1 + $0x60] sm:$0xff]   ;;  %v1649_v20 = vld [vmem:[%s2182_s1 + $0x68] sm:$0xff]  }
   0x6   :  { %1544 = vmatprep.subr.bf16.mxu1 %v1635_v6  ;;  %v1642_v13 = vld [vmem:[%s2182_s1 + $0x18] sm:$0xff]   ;;  %v1646_v17 = vld [vmem:[%s2182_s1 + $0x20] sm:$0xff]   ;;  %v1650_v21 = vld [vmem:[%s2182_s1 + $0x28] sm:$0xff]  }
   0x7   :  { %1517 = vmatpush3.bf16.msra.mxu0 %v1634_v5  ;;  %v1643_v14 = vld [vmem:[%s2182_s1 + $0xd8] sm:$0xff]   ;;  %v1647_v18 = vld [vmem:[%s2182_s1 + $0xe0] sm:$0xff]   ;;  %v1651_v22 = vld [vmem:[%s2182_s1 + $0xe8] sm:$0xff]  }
   0x8   :  { %1518 = vmatprep.subr.bf16.mxu0 %v1637_v8  ;;  %v1644_v15 = vld [vmem:[%s2182_s1 + $0x98] sm:$0xff]   ;;  %v1648_v19 = vld [vmem:[%s2182_s1 + $0xa0] sm:$0xff]   ;;  %v1652_v23 = vld [vmem:[%s2182_s1 + $0xa8] sm:$0xff]  }
   0x9   :  { %1545 = vmatpush3.bf16.msra.mxu1 %v1636_v7  ;;  %v1653_v24 = vld [vmem:[%s2182_s1 + $0x70] sm:$0xff]   ;;  %v1657_v28 = vld [vmem:[%s2182_s1 + $0x78] sm:$0xff]   ;;  %v1661_v32 = vld [vmem:[%s2183_s0] ss:$8 sps:$4 sm:$0xff]  }
   0xa   :  { %1546 = vmatprep.subr.bf16.mxu1 %v1639_v10  ;;  %v1654_v25 = vld [vmem:[%s2182_s1 + $0x30] sm:$0xff]   ;;  %v1658_v29 = vld [vmem:[%s2182_s1 + $0x38] sm:$0xff]   ;;  %v1663_v33 = vld [vmem:[%s2183_s0 + $0x4] ss:$8 sps:$4 sm:$0xff]  }
   0xb   :  { %1519 = vmatpush3.bf16.msra.mxu0 %v1638_v9  ;;  %v1655_v26 = vld [vmem:[%s2182_s1 + $0xf0] sm:$0xff]   ;;  %v1659_v30 = vld [vmem:[%s2182_s1 + $0xf8] sm:$0xff]   ;;  %v1664_v34 = vld [vmem:[%s2182_s1 + $0x140] sm:$0xff]   ;;  %202 = vmatprep.mubr.bf16.mxu0 %v1663_v33 }
   0xc   :  { %1520 = vmatprep.subr.bf16.mxu0 %v1641_v12  ;;  %v1656_v27 = vld [vmem:[%s2182_s1 + $0xb0] sm:$0xff]   ;;  %v1660_v31 = vld [vmem:[%s2182_s1 + $0xb8] sm:$0xff]   ;;  %v1665_v35 = vld [vmem:[%s2183_s0 + $0x20] ss:$8 sps:$4 sm:$0xff]  }
   0xd   :  { %1547 = vmatpush3.bf16.msra.mxu1 %v1640_v11  ;;  %v1667_v36 = vld [vmem:[%s2183_s0 + $0x24] ss:$8 sps:$4 sm:$0xff]   ;;  %v1675_v44 = vld [vmem:[%s2182_s1 + $0x150] sm:$0xff]   ;;  %v1679_v48 = vld [vmem:[%s2182_s1 + $0x158] sm:$0xff]  }
   0xe   :  { %1548 = vmatprep.subr.bf16.mxu1 %v1643_v14  ;;  %v1668_v37 = vld [vmem:[%s2182_s1 + $0x100] sm:$0xff]   ;;  %409 = vmatprep.mubr.bf16.mxu1 %v1667_v36  ;;  %v1671_v40 = vld [vmem:[%s2182_s1 + $0x148] sm:$0xff]   ;;  %v1676_v45 = vld [vmem:[%s2182_s1 + $0x110] sm:$0xff]  }
   0xf   :  { %1521 = vmatpush3.bf16.msra.mxu0 %v1642_v13  ;;  %v1669_v38 = vld [vmem:[%s2182_s1 + $0x1c0] sm:$0xff]   ;;  %v1672_v41 = vld [vmem:[%s2182_s1 + $0x108] sm:$0xff]   ;;  %v1677_v46 = vld [vmem:[%s2182_s1 + $0x1d0] sm:$0xff]  }
  0x10   :  { %1522 = vmatprep.subr.bf16.mxu0 %v1645_v16  ;;  %v1670_v39 = vld [vmem:[%s2182_s1 + $0x180] sm:$0xff]   ;;  %v1673_v42 = vld [vmem:[%s2182_s1 + $0x1c8] sm:$0xff]   ;;  %v1678_v47 = vld [vmem:[%s2182_s1 + $0x190] sm:$0xff]  }
  0x11   :  { %1549 = vmatpush3.bf16.msra.mxu1 %v1644_v15  ;;  %v1674_v43 = vld [vmem:[%s2182_s1 + $0x188] sm:$0xff]   ;;  %v1680_v49 = vld [vmem:[%s2182_s1 + $0x118] sm:$0xff]   ;;  %v1686_v54 = vld [vmem:[%s2182_s1 + $0x160] sm:$0xff]  }
  0x12   :  { %1550 = vmatprep.subr.bf16.mxu1 %v1647_v18  ;;  %v1681_v50 = vld [vmem:[%s2182_s1 + $0x1d8] sm:$0xff]   ;;  %v1687_v55 = vld [vmem:[%s2182_s1 + $0x120] sm:$0xff]   ;;  %v1692_v59 = vld [vmem:[%s2182_s1 + $0x168] sm:$0xff]  }
  0x13   :  { %1523 = vmatpush3.bf16.msra.mxu0 %v1646_v17  ;;  %v1682_v51 = vld [vmem:[%s2183_s0 + $0x14] ss:$8 sps:$4 sm:$0xff]   ;;  %v1685_v53 = vld [vmem:[%s2183_s0 + $0x10] ss:$8 sps:$4 sm:$0xff]   ;;  %v1688_v56 = vld [vmem:[%s2182_s1 + $0x1e0] sm:$0xff]  }
  0x14   :  { %1524 = vmatprep.subr.bf16.mxu0 %v1649_v20  ;;  %v1684_v52 = vld [vmem:[%s2182_s1 + $0x198] sm:$0xff]   ;;  %v1689_v57 = vld [vmem:[%s2182_s1 + $0x1a0] sm:$0xff]   ;;  %v1694_v61 = vld [vmem:[%s2182_s1 + $0x128] sm:$0xff]  }
  0x15   :  { %1551 = vmatpush3.bf16.msra.mxu1 %v1648_v19  ;;  %v1690_v58 = vld [vmem:[%s2183_s0 + $0x34] ss:$8 sps:$4 sm:$0xff]   ;;  %v1693_v60 = vld [vmem:[%s2183_s0 + $0x30] ss:$8 sps:$4 sm:$0xff]   ;;  %v1695_v62 = vld [vmem:[%s2182_s1 + $0x1e8] sm:$0xff]  }
  0x16   :  { %1552 = vmatprep.subr.bf16.mxu1 %v1651_v22  ;;  %v1696_v63 = vld [vmem:[%s2182_s1 + $0x1a8] sm:$0xff]   ;;  %v1697_v0 = vld [vmem:[%s2182_s1 + $0x170] sm:$0xff]   ;;  %v1701_v4 = vld [vmem:[%s2182_s1 + $0x178] sm:$0xff]  }
  0x17   :  { %1525 = vmatpush3.bf16.msra.mxu0 %v1650_v21  ;;  %v1698_v1 = vld [vmem:[%s2182_s1 + $0x130] sm:$0xff]   ;;  %v1702_v5 = vld [vmem:[%s2182_s1 + $0x138] sm:$0xff]   ;;  %v1705_v8 = vld [vmem:[%s2183_s0 + $0x40] ss:$8 sps:$4 sm:$0xff]  }
  0x18   :  { %1526 = vmatprep.subr.bf16.mxu0 %v1653_v24  ;;  %v1699_v2 = vld [vmem:[%s2182_s1 + $0x1f0] sm:$0xff]   ;;  %v1703_v6 = vld [vmem:[%s2182_s1 + $0x1f8] sm:$0xff]   ;;  %v1707_v9 = vld [vmem:[%s2183_s0 + $0x44] ss:$8 sps:$4 sm:$0xff]  }
  0x19   :  { %1553 = vmatpush3.bf16.msra.mxu1 %v1652_v23  ;;  %v1700_v3 = vld [vmem:[%s2182_s1 + $0x1b0] sm:$0xff]   ;;  %v1704_v7 = vld [vmem:[%s2182_s1 + $0x1b8] sm:$0xff]   ;;  %v1708_v10 = vld [vmem:[%s2183_s0 + $0x60] ss:$8 sps:$4 sm:$0xff]  }
  0x1a   :  { %1554 = vmatprep.subr.bf16.mxu1 %v1655_v26  ;;  %v1710_v11 = vld [vmem:[%s2183_s0 + $0x64] ss:$8 sps:$4 sm:$0xff]   ;;  %v1711_v12 = vld [vmem:[%s2183_s0 + $0x54] ss:$8 sps:$4 sm:$0xff]   ;;  %v1713_v14 = vld [vmem:[%s2183_s0 + $0x50] ss:$8 sps:$4 sm:$0xff]  }
  0x1b   :  { %1527 = vmatpush3.bf16.msra.mxu0 %v1654_v25  ;;  %v1714_v13 = vld [vmem:[%s2183_s0 + $0x74] ss:$8 sps:$4 sm:$0xff]   ;;  %v1716_v15 = vld [vmem:[%s2183_s0 + $0x70] ss:$8 sps:$4 sm:$0xff]  }
  0x1c   :  { %1528 = vmatprep.subr.bf16.mxu0 %v1657_v28 }
  0x1d   :  { %1555 = vmatpush3.bf16.msra.mxu1 %v1656_v27 }
  0x1e   :  { %1556 = vmatprep.subr.bf16.mxu1 %v1659_v30 }
  0x1f   :  { %1529 = vmatpush3.bf16.msra.mxu0 %v1658_v29 }
  0x20   :  { %1570 = vmatprep.subr.bf16.mxu0 %v1664_v34 }
  0x21   :  { %1557 = vmatpush3.bf16.msra.mxu1 %v1660_v31 }
  0x22   :  { %203 = vmatmul.mubr.bf16.vlgmr.msra.gmra.mrb[0].mxu0 %v1661_v32  ;;  %1598 = vmatprep.subr.bf16.mxu1 %v1669_v38 }
  0x23   :  { %1571 = vmatpush3.bf16.msra.mxu0 %v1668_v37  ;;  %210 = vmatprep.mubr.bf16.mxu0 %v1682_v51 }
  0x24   :  { %410 = vmatmul.mubr.bf16.vlgmr.msra.gmra.mrb[0].mxu1 %v1665_v35  ;;  %1572 = vmatprep.subr.bf16.mxu0 %v1671_v40 }
  0x25   :  { %1599 = vmatpush3.bf16.msra.mxu1 %v1670_v39  ;;  %417 = vmatprep.mubr.bf16.mxu1 %v1690_v58 }
  0x26   :  { %1600 = vmatprep.subr.bf16.mxu1 %v1673_v42 }
  0x27   :  { %1573 = vmatpush3.bf16.msra.mxu0 %v1672_v41 }
  0x28   :  { %1574 = vmatprep.subr.bf16.mxu0 %v1675_v44 }
  0x29   :  { %1601 = vmatpush3.bf16.msra.mxu1 %v1674_v43 }
  0x2a   :  { %1602 = vmatprep.subr.bf16.mxu1 %v1677_v46  ;;  %211 = vmatmul.mubr.bf16.gmra.mrb[4].mxu0 %v1685_v53 }
  0x2b   :  { %1575 = vmatpush3.bf16.msra.mxu0 %v1676_v45  ;;  %617 = vmatprep.mubr.bf16.mxu0 %v1707_v9  ;;  %v915_v9 = vlaneseq }
  0x2c   :  { %1576 = vmatprep.subr.bf16.mxu0 %v1679_v48  ;;  %418 = vmatmul.mubr.bf16.gmra.mrb[4].mxu1 %v1693_v60 }
  0x2d   :  { %1603 = vmatpush3.bf16.msra.mxu1 %v1678_v47  ;;  %825 = vmatprep.mubr.bf16.mxu1 %v1710_v11 }
  0x2e   :  { %1604 = vmatprep.subr.bf16.mxu1 %v1681_v50 }
  0x2f   :  { %1577 = vmatpush3.bf16.msra.mxu0 %v1680_v49 }
  0x30   :  { %1578 = vmatprep.subr.bf16.mxu0 %v1686_v54 }
  0x31   :  { %1605 = vmatpush3.bf16.msra.mxu1 %v1684_v52 }
  0x32   :  { %1606 = vmatprep.subr.bf16.mxu1 %v1688_v56 }
  0x33   :  { %1579 = vmatpush3.bf16.msra.mxu0 %v1687_v55 }
  0x34   :  { %1580 = vmatprep.subr.bf16.mxu0 %v1692_v59 }
  0x35   :  { %1607 = vmatpush3.bf16.msra.mxu1 %v1689_v57 }
  0x36   :  { %1608 = vmatprep.subr.bf16.mxu1 %v1695_v62 }
  0x37   :  { %1581 = vmatpush3.bf16.msra.mxu0 %v1694_v61 }
  0x38   :  { %1582 = vmatprep.subr.bf16.mxu0 %v1697_v0 }
  0x39   :  { %1609 = vmatpush3.bf16.msra.mxu1 %v1696_v63 }
  0x3a   :  { %1610 = vmatprep.subr.bf16.mxu1 %v1699_v2 }
  0x3b   :  { %1583 = vmatpush3.bf16.msra.mxu0 %v1698_v1 }
  0x3c   :  { %1584 = vmatprep.subr.bf16.mxu0 %v1701_v4 }
  0x3d   :  { %1611 = vmatpush3.bf16.msra.mxu1 %v1700_v3 }
  0x3e   :  { %1612 = vmatprep.subr.bf16.mxu1 %v1703_v6 }
  0x3f   :  { %1585 = vmatpush3.bf16.msra.mxu0 %v1702_v5 }
  0x41   :  { %1613 = vmatpush3.bf16.msra.mxu1 %v1704_v7 }
  0x42   :  { %618 = vmatmul.mubr.bf16.vlgmr.msra.gmra.mrb[8].mxu0 %v1705_v8 }
  0x43   :  { %625 = vmatprep.mubr.bf16.mxu0 %v1711_v12 }
  0x44   :  { %826 = vmatmul.mubr.bf16.vlgmr.msra.gmra.mrb[8].mxu1 %v1708_v10 }
  0x45   :  { %833 = vmatprep.mubr.bf16.mxu1 %v1714_v13 }
  0x4a   :  { %626 = vmatmul.mubr.bf16.gmra.mrb[12].mxu0 %v1713_v14 }
  0x4c   :  { %834 = vmatmul.mubr.bf16.gmra.mrb[12].mxu1 %v1716_v15  ;;  %v2039_v15 = vand.u32 127, %v915_v9 }
  0x4e   :  { %vm917_vm0 = vcmp.lt.s32.totalorder %v2039_v15, 32 }
  0xf5   :  { %v1530_v16 = vpop.f32.mrb[0].mxu0 }
  0xf6   :  { %v1531_v17 = vpop.f32.mrb[1].mxu0 }
  0xf7   :  { %v1991_v18 = vadd.f32 %v1531_v17, %v1530_v16  ;;  %v1533_v19 = vpop.f32.mrb[2].mxu0  ;;  %v1558_v20 = vpop.f32.mrb[0].mxu1 }
  0xf8   :  { %v1534_v21 = vpop.f32.mrb[3].mxu0  ;;  %v1559_v22 = vpop.f32.mrb[1].mxu1 }
  0xf9   :  { %v1993_v23 = vadd.f32 %v1534_v21, %v1533_v19  ;;  %v1995_v24 = vadd.f32 %v1559_v22, %v1558_v20  ;;  %v1561_v25 = vpop.f32.mrb[2].mxu1  ;;  %851 = vadd.xlane.f32.xlu0 %v1991_v18 }
  0xfa   :  { %v1562_v26 = vpop.f32.mrb[3].mxu1 }
  0xfb   :  { %v1998_v27 = vadd.f32 %v1562_v26, %v1561_v25 }
  0xfd   :  { %869 = vadd.xlane.f32.xlu1 %v1998_v27  ;;  %867 = vadd.xlane.f32.xlu0 %v1995_v24  ;;  %v1536_v28 = vpop.f32.mrb[4].mxu0 }
  0xfe   :  { %v1537_v29 = vpop.f32.mrb[5].mxu0 }
  0xff   :  { %v2003_v30 = vadd.f32 %v1537_v29, %v1536_v28  ;;  %v1539_v31 = vpop.f32.mrb[6].mxu0  ;;  %v1564_v34 = vpop.f32.mrb[4].mxu1 }
 0x100   :  { %v1540_v32 = vpop.f32.mrb[7].mxu0  ;;  %v1565_v35 = vpop.f32.mrb[5].mxu1 }
 0x101   :  { %853 = vadd.xlane.f32.xlu0 %v1993_v23  ;;  %855 = vadd.xlane.f32.xlu1 %v2003_v30  ;;  %v2006_v33 = vadd.f32 %v1540_v32, %v1539_v31  ;;  %v2009_v36 = vadd.f32 %v1565_v35, %v1564_v34  ;;  %v1567_v37 = vpop.f32.mrb[6].mxu1 }
 0x102   :  { %v1568_v38 = vpop.f32.mrb[7].mxu1 }
 0x103   :  { %v2011_v39 = vadd.f32 %v1568_v38, %v1567_v37 }
 0x105   :  { %857 = vadd.xlane.f32.xlu1 %v2006_v33  ;;  %871 = vadd.xlane.f32.xlu0 %v2009_v36 }
 0x109   :  { %873 = vadd.xlane.f32.xlu1 %v2011_v39 }
 0x115   :  { %v1586_v40 = vpop.f32.mrb[8].mxu0 }
 0x116   :  { %v1587_v41 = vpop.f32.mrb[9].mxu0 }
 0x117   :  { %v1614_v42 = vpop.f32.mrb[8].mxu1  ;;  %v2015_v43 = vadd.f32 %v1587_v41, %v1586_v40  ;;  %v1589_v44 = vpop.f32.mrb[10].mxu0 }
 0x118   :  { %v1615_v45 = vpop.f32.mrb[9].mxu1  ;;  %v1590_v47 = vpop.f32.mrb[11].mxu0 }
 0x119   :  { %v2017_v46 = vadd.f32 %v1615_v45, %v1614_v42  ;;  %v1617_v48 = vpop.f32.mrb[10].mxu1  ;;  %v2019_v49 = vadd.f32 %v1590_v47, %v1589_v44  ;;  %883 = vadd.xlane.f32.xlu0 %v2015_v43 }
 0x11a   :  { %v1618_v50 = vpop.f32.mrb[11].mxu1 }
 0x11b   :  { %v2022_v51 = vadd.f32 %v1618_v50, %v1617_v48  ;;  %885 = vadd.xlane.f32.xlu1 %v2019_v49 }
 0x11d   :  { %v1592_v52 = vpop.f32.mrb[12].mxu0  ;;  %899 = vadd.xlane.f32.xlu0 %v2017_v46 }
 0x11e   :  { %v1593_v53 = vpop.f32.mrb[13].mxu0 }
 0x11f   :  { %v1620_v54 = vpop.f32.mrb[12].mxu1  ;;  %v2026_v55 = vadd.f32 %v1593_v53, %v1592_v52  ;;  %v1595_v56 = vpop.f32.mrb[14].mxu0  ;;  %901 = vadd.xlane.f32.xlu1 %v2022_v51 }
 0x120   :  { %v1621_v57 = vpop.f32.mrb[13].mxu1  ;;  %v1596_v58 = vpop.f32.mrb[15].mxu0 }
 0x121   :  { %v2029_v59 = vadd.f32 %v1621_v57, %v1620_v54  ;;  %v1623_v60 = vpop.f32.mrb[14].mxu1  ;;  %v2031_v61 = vadd.f32 %v1596_v58, %v1595_v56  ;;  %887 = vadd.xlane.f32.xlu0 %v2026_v55 }
 0x122   :  { %v1624_v62 = vpop.f32.mrb[15].mxu1 }
 0x123   :  { %v2034_v63 = vadd.f32 %v1624_v62, %v1623_v60  ;;  %889 = vadd.xlane.f32.xlu1 %v2031_v61 }
 0x125   :  { %903 = vadd.xlane.f32.xlu0 %v2029_v59 }
 0x127   :  { %905 = vadd.xlane.f32.xlu1 %v2034_v63 }
 0x186   :  { %v852_v0 = vpop.xlane.xlu0 %851 }
 0x18a   :  { %v870_v1 = vpop.xlane.xlu1 %869  ;;  %v868_v2 = vpop.xlane.xlu0 %867 }
 0x18b   :  { %v875_v10 = vadd.f32 %v868_v2, %v852_v0 }
 0x18e   :  { %v856_v3 = vpop.xlane.xlu1 %855  ;;  %v854_v4 = vpop.xlane.xlu0 %853 }
 0x18f   :  { %v876_v12 = vadd.f32 %v870_v1, %v854_v4 }
 0x192   :  { %v858_v5 = vpop.xlane.xlu1 %857  ;;  %v872_v6 = vpop.xlane.xlu0 %871 }
 0x193   :  { %v877_v25 = vadd.f32 %v872_v6, %v856_v3 }
 0x196   :  { %v874_v7 = vpop.xlane.xlu1 %873 }
 0x197   :  { %v878_v32 = vadd.f32 %v874_v7, %v858_v5 }
 0x1a6   :  { %v884_v8 = vpop.xlane.xlu0 %883 }
 0x1a7   :  { %v891_v13 = vadd.f32 %v884_v8, %v875_v10 }
 0x1a8   :  { %v886_v11 = vpop.xlane.xlu1 %885 }
 0x1a9   :  { %v892_v16 = vadd.f32 %v886_v11, %v876_v12 }
 0x1aa   :  { %v900_v14 = vpop.xlane.xlu0 %899 }
 0x1ab   :  { %v907_v17 = vadd.f32 %v900_v14, %v891_v13 }
 0x1ac   :  { %v902_v19 = vpop.xlane.xlu1 %901 }
 0x1ad   :  { %v2041_v20 = vmul.f32 0.0078125, %v907_v17  ;;  %v908_v21 = vadd.f32 %v902_v19, %v892_v16 }
 0x1ae   :  { %v888_v22 = vpop.xlane.xlu0 %887 }
 0x1af   :  { %v2044_v26 = vmul.f32 0.0078125, %v908_v21  ;;  %v918_v28 = vsub.f32 %v1991_v18, %v2041_v20  ;;  %v944_v29 = vsub.f32 %v1995_v24, %v2041_v20  ;;  %v893_v34 = vadd.f32 %v888_v22, %v877_v25 }
 0x1b0   :  { %v890_v31 = vpop.xlane.xlu1 %889  ;;  %v968_v42 = vsub.f32 %v2015_v43, %v2041_v20  ;;  %v992_v62 = vsub.f32 %v2017_v46, %v2041_v20 }
 0x1b1   :  { %v924_v35 = vsel %vm917_vm0, %v918_v28, 0.0  ;;  %v919_v37 = vsub.f32 %v1993_v23, %v2044_v26  ;;  %v945_v41 = vsub.f32 %v1998_v27, %v2044_v26  ;;  %v894_v44 = vadd.f32 %v890_v31, %v878_v32 }
 0x1b2   :  { %v904_v38 = vpop.xlane.xlu0 %903  ;;  %v928_v40 = vmul.f32 %v924_v35, %v924_v35  ;;  %v948_v48 = vsel %vm917_vm0, %v944_v29, 0.0  ;;  %v969_v56 = vsub.f32 %v2019_v49, %v2044_v26  ;;  %v972_v60 = vsel %vm917_vm0, %v968_v42, 0.0 }
 0x1b3   :  { %v909_v45 = vadd.f32 %v904_v38, %v893_v34  ;;  %v925_v47 = vsel %vm917_vm0, %v919_v37, 0.0  ;;  %v949_v54 = vsel %vm917_vm0, %v945_v41, 0.0  ;;  %v952_v57 = vmul.f32 %v948_v48, %v948_v48 }
 0x1b4   :  { %v906_v50 = vpop.xlane.xlu1 %905  ;;  %932 = vadd.xlane.f32.xlu0 %v928_v40  ;;  %v929_v52 = vmul.f32 %v925_v47, %v925_v47  ;;  %v953_v0 = vmul.f32 %v949_v54, %v949_v54  ;;  %v973_v2 = vsel %vm917_vm0, %v969_v56, 0.0  ;;  %v993_v3 = vsub.f32 %v2022_v51, %v2044_v26 }
 0x1b5   :  { %v910_v53 = vadd.f32 %v906_v50, %v894_v44  ;;  %v2066_v58 = vmul.f32 0.0078125, %v909_v45  ;;  %v976_v4 = vmul.f32 %v972_v60, %v972_v60  ;;  %v996_v5 = vsel %vm917_vm0, %v992_v62, 0.0 }
 0x1b6   :  { %934 = vadd.xlane.f32.xlu1 %v929_v52  ;;  %v977_v7 = vmul.f32 %v973_v2, %v973_v2  ;;  %v997_v8 = vsel %vm917_vm0, %v993_v3, 0.0  ;;  %v1000_v10 = vmul.f32 %v996_v5, %v996_v5  ;;  %v1725_v47 = vmov 0  }
 0x1b7   :  { %v2072_v1 = vmul.f32 0.0078125, %v910_v53  ;;  %v920_v6 = vsub.f32 %v2003_v30, %v2066_v58  ;;  %v946_v12 = vsub.f32 %v2009_v36, %v2066_v58  ;;  %v1001_v13 = vmul.f32 %v997_v8, %v997_v8  ;;  %1627 = vset.pattern.permute.xlu0 %v1725_v47  ;;  %1628 = vset.pattern.permute.xlu1 %v1725_v47 }
 0x1b8   :  { %956 = vadd.xlane.f32.xlu0 %v952_v57  ;;  %v970_v21 = vsub.f32 %v2026_v55, %v2066_v58  ;;  %v994_v32 = vsub.f32 %v2029_v59, %v2066_v58 }
 0x1b9   :  { %v921_v9 = vsub.f32 %v2006_v33, %v2072_v1  ;;  %v926_v11 = vsel %vm917_vm0, %v920_v6, 0.0  ;;  %v947_v16 = vsub.f32 %v2011_v39, %v2072_v1  ;;  %v950_v19 = vsel %vm917_vm0, %v946_v12, 0.0 }
 0x1ba   :  { %958 = vadd.xlane.f32.xlu1 %v953_v0  ;;  %v930_v17 = vmul.f32 %v926_v11, %v926_v11  ;;  %v971_v28 = vsub.f32 %v2031_v61, %v2072_v1  ;;  %v954_v29 = vmul.f32 %v950_v19, %v950_v19  ;;  %v974_v31 = vsel %vm917_vm0, %v970_v21, 0.0  ;;  %v1020_v21 = vld [vmem:[%s2184_s2] sm:$0xff] }
 0x1bb   :  { %v927_v14 = vsel %vm917_vm0, %v921_v9, 0.0  ;;  %v951_v25 = vsel %vm917_vm0, %v947_v16, 0.0  ;;  %v995_v37 = vsub.f32 %v2034_v63, %v2072_v1  ;;  %v978_v38 = vmul.f32 %v974_v31, %v974_v31  ;;  %v1021_v31 = vld [vmem:[%s2184_s2 + $0x8] sm:$0xff] }
 0x1bc   :  { %980 = vadd.xlane.f32.xlu0 %v976_v4  ;;  %v931_v22 = vmul.f32 %v927_v14, %v927_v14  ;;  %v955_v34 = vmul.f32 %v951_v25, %v951_v25  ;;  %v975_v35 = vsel %vm917_vm0, %v971_v28, 0.0  ;;  %v998_v40 = vsel %vm917_vm0, %v994_v32, 0.0 }
 0x1bd   :  { %v979_v41 = vmul.f32 %v975_v35, %v975_v35  ;;  %v999_v42 = vsel %vm917_vm0, %v995_v37, 0.0  ;;  %v1002_v44 = vmul.f32 %v998_v40, %v998_v40 }
 0x1be   :  { %982 = vadd.xlane.f32.xlu1 %v977_v7  ;;  %v1003_v45 = vmul.f32 %v999_v42, %v999_v42 }
 0x1c0   :  { %1004 = vadd.xlane.f32.xlu0 %v1000_v10 }
 0x1c2   :  { %1006 = vadd.xlane.f32.xlu1 %v1001_v13 }
 0x1c4   :  { %936 = vadd.xlane.f32.xlu0 %v930_v17 }
 0x1c6   :  { %938 = vadd.xlane.f32.xlu1 %v931_v22 }
 0x1c8   :  { %960 = vadd.xlane.f32.xlu0 %v954_v29 }
 0x1ca   :  { %962 = vadd.xlane.f32.xlu1 %v955_v34 }
 0x1cc   :  { %984 = vadd.xlane.f32.xlu0 %v978_v38 }
 0x1ce   :  { %986 = vadd.xlane.f32.xlu1 %v979_v41 }
 0x1d0   :  { %1008 = vadd.xlane.f32.xlu0 %v1002_v44 }
 0x1d2   :  { %1010 = vadd.xlane.f32.xlu1 %v1003_v45  ;;  %v1036_v45 = vld [vmem:[%s2185_s3] sm:$0xff] }
 0x241   :  { %v933_v48 = vpop.xlane.xlu0 %932 }
 0x243   :  { %v935_v50 = vpop.xlane.xlu1 %934 }
 0x245   :  { %v957_v52 = vpop.xlane.xlu0 %956 }
 0x246   :  { %v964_v56 = vadd.f32 %v957_v52, %v933_v48  ;;  %v1037_v52 = vld [vmem:[%s2185_s3 + $0x8] sm:$0xff] }
 0x247   :  { %v959_v53 = vpop.xlane.xlu1 %958 }
 0x248   :  { %v965_v60 = vadd.f32 %v959_v53, %v935_v50 }
 0x249   :  { %v981_v54 = vpop.xlane.xlu0 %980 }
 0x24a   :  { %v988_v62 = vadd.f32 %v981_v54, %v964_v56 }
 0x24b   :  { %v983_v57 = vpop.xlane.xlu1 %982 }
 0x24c   :  { %v989_v15 = vadd.f32 %v983_v57, %v965_v60  ;;  %v1023_v60 = vld [vmem:[%s2184_s2 + $0x18] sm:$0xff] }
 0x24d   :  { %v1005_v0 = vpop.xlane.xlu0 %1004 }
 0x24e   :  { %v1012_v2 = vadd.f32 %v1005_v0, %v988_v62  ;;  %v1038_v0 = vld [vmem:[%s2185_s3 + $0x10] sm:$0xff] }
 0x24f   :  { %v1007_v3 = vpop.xlane.xlu1 %1006 }
 0x250   :  { %v1016_v4 = vmul.f32 0.0078125, %v1012_v2  ;;  %v1013_v5 = vadd.f32 %v1007_v3, %v989_v15  ;;  %v1039_v3 = vld [vmem:[%s2185_s3 + $0x18] sm:$0xff] }
 0x251   :  { %v937_v6 = vpop.xlane.xlu0 %936 }
 0x252   :  { %v1024_v7 = vadd.f32 1e-05, %v1016_v4  ;;  %v1017_v8 = vmul.f32 0.0078125, %v1013_v5 }
 0x253   :  { %v939_v9 = vpop.xlane.xlu1 %938 }
 0x254   :  { %1717 = vrsqrt.f32 %v1024_v7  ;;  %v1025_v10 = vadd.f32 1e-05, %v1017_v8 }
 0x255   :  { %v961_v11 = vpop.xlane.xlu0 %960 }
 0x256   :  { %1719 = vrsqrt.f32 %v1025_v10  ;;  %v966_v14 = vadd.f32 %v961_v11, %v937_v6 }
 0x257   :  { %v963_v12 = vpop.xlane.xlu1 %962 }
 0x258   :  { %v967_v17 = vadd.f32 %v963_v12, %v939_v9 }
 0x259   :  { %v985_v13 = vpop.xlane.xlu0 %984 }
 0x25a   :  { %v990_v19 = vadd.f32 %v985_v13, %v966_v14 }
 0x25b   :  { %v987_v16 = vpop.xlane.xlu1 %986 }
 0x25c   :  { %v991_v28 = vadd.f32 %v987_v16, %v967_v17 }
 0x25d   :  { %v1009_v22 = vpop.xlane.xlu0 %1008 }
 0x25e   :  { %v1718_v25 = vpop.eup %1717  ;;  %v1014_v29 = vadd.f32 %v1009_v22, %v990_v19 }
 0x25f   :  { %v1011_v32 = vpop.xlane.xlu1 %1010  ;;  %v1032_v34 = vmul.f32 %v1718_v25, %v1020_v21 }
 0x260   :  { %v1720_v35 = vpop.eup %1719  ;;  %v1018_v37 = vmul.f32 0.0078125, %v1014_v29  ;;  %v1015_v38 = vadd.f32 %v1011_v32, %v991_v28 }
 0x261   :  { %1050 = vperm.xlu0 %1627, %v1032_v34   ;;  %v1033_v40 = vmul.f32 %v1720_v35, %v1021_v31  ;;  %v1040_v41 = vmul.f32 %v1032_v34, %v2041_v20  ;;  %v1022_v20 = vld [vmem:[%s2184_s2 + $0x10] sm:$0xff] }
 0x262   :  { %v1026_v42 = vadd.f32 1e-05, %v1018_v37  ;;  %v1019_v44 = vmul.f32 0.0078125, %v1015_v38 }
 0x263   :  { %1055 = vperm.xlu1 %1628, %v1033_v40   ;;  %v1044_v48 = vsub.f32 %v1036_v45, %v1040_v41  ;;  %v1041_v50 = vmul.f32 %v1033_v40, %v2044_v26 }
 0x264   :  { %1721 = vrsqrt.f32 %v1026_v42  ;;  %v1027_v47 = vadd.f32 1e-05, %v1019_v44 }
 0x265   :  { %v1045_v53 = vsub.f32 %v1037_v52, %v1041_v50 }
 0x266   :  { %1723 = vrsqrt.f32 %v1027_v47 }
 0x267   :  { %1074 = vperm.xlu1 %1628, %v1044_v48  }
 0x26b   :  { %1079 = vperm.xlu1 %1628, %v1045_v53  }
 0x26e   :  { %v1722_v54 = vpop.eup %1721 }
 0x26f   :  { %v1034_v56 = vmul.f32 %v1722_v54, %v1022_v20 }
 0x270   :  { %v1724_v57 = vpop.eup %1723 }
 0x271   :  { %1060 = vperm.xlu1 %1628, %v1034_v56   ;;  %v1035_v26 = vmul.f32 %v1724_v57, %v1023_v60  ;;  %v1042_v62 = vmul.f32 %v1034_v56, %v2066_v58 }
 0x273   :  { %v1046_v15 = vsub.f32 %v1038_v0, %v1042_v62  ;;  %v1043_v2 = vmul.f32 %v1035_v26, %v2072_v1 }
 0x275   :  { %1065 = vperm.xlu1 %1628, %v1035_v26   ;;  %v1047_v4 = vsub.f32 %v1039_v3, %v1043_v2 }
 0x279   :  { %1084 = vperm.xlu1 %1628, %v1046_v15  }
 0x27d   :  { %1089 = vperm.xlu1 %1628, %v1047_v4  }
 0x2e0   :  { %v1051_v6 = vpop.permute.xlu0 %1050 }
 0x2e1   :  { %v1068_v7 = vmul.f32 %v1991_v18, %v1051_v6  ;;  %v1124_v58 = vmul.f32 %v1995_v24, %v1051_v6  ;;  %v1161_v8 = vmul.f32 %v2015_v43, %v1051_v6  ;;  %v1198_v9 = vmul.f32 %v2017_v46, %v1051_v6 }
 0x2e2   :  { %v1056_v5 = vpop.permute.xlu1 %1055 }
 0x2e3   :  { %v1069_v14 = vmul.f32 %v1993_v23, %v1056_v5  ;;  %v1125_v16 = vmul.f32 %v1998_v27, %v1056_v5  ;;  %v1162_v17 = vmul.f32 %v2019_v49, %v1056_v5  ;;  %v1199_v19 = vmul.f32 %v2022_v51, %v1056_v5 }
 0x2e6   :  { %v1075_v10 = vpop.permute.xlu1 %1074 }
 0x2e7   :  { %v1092_v11 = vadd.f32 %v1075_v10, %v1068_v7  ;;  %v1128_v1 = vadd.f32 %v1124_v58, %v1075_v10  ;;  %v1165_v12 = vadd.f32 %v1161_v8, %v1075_v10  ;;  %v1202_v13 = vadd.f32 %v1198_v9, %v1075_v10 }
 0x2e9   :  { %v1096_v25 = vmax.f32 %v1092_v11, 0.0  ;;  %v1132_v46 = vmax.f32 %v1128_v1, 0.0  ;;  %v1169_v28 = vmax.f32 %v1165_v12, 0.0  ;;  %v1206_v29 = vmax.f32 %v1202_v13, 0.0 }
 0x2ea   :  { %v1080_v18 = vpop.permute.xlu1 %1079 }
 0x2eb   :  { %v1093_v21 = vadd.f32 %v1080_v18, %v1069_v14  ;;  %v1129_v24 = vadd.f32 %v1125_v16, %v1080_v18  ;;  %v1166_v22 = vadd.f32 %v1162_v17, %v1080_v18  ;;  %v1203_v43 = vadd.f32 %v1199_v19, %v1080_v18 }
 0x2ed   :  { %v1097_v31 = vmax.f32 %v1093_v21, 0.0  ;;  %v1133_v32 = vmax.f32 %v1129_v24, 0.0  ;;  %v1170_v34 = vmax.f32 %v1166_v22, 0.0  ;;  %v1207_v35 = vmax.f32 %v1203_v43, 0.0 }
 0x2ef   :  { %v1470_v23 = vpack.c.bf16 %v1097_v31, %v1096_v25  ;;  %v1480_v37 = vpack.c.bf16 %v1133_v32, %v1132_v46  ;;  %v1490_v27 = vpack.c.bf16 %v1170_v34, %v1169_v28  ;;  %v1500_v38 = vpack.c.bf16 %v1207_v35, %v1206_v29 }
 0x2f0   :  { %v1061_v49 = vpop.permute.xlu1 %1060 }
 0x2f1   :  { %1471 = vst [vmem:[%s2186_s4] sm:$0xff] %v1470_v23   ;;  %1508 = vst [vmem:[%s2186_s4 + $0x10] sm:$0xff] %v1480_v37   ;;  %v1070_v40 = vmul.f32 %v2003_v30, %v1061_v49  ;;  %v1126_v41 = vmul.f32 %v2009_v36, %v1061_v49  ;;  %v1163_v42 = vmul.f32 %v2026_v55, %v1061_v49 }
 0x2f2   :  { %1510 = vst [vmem:[%s2186_s4 + $0x20] sm:$0xff] %v1490_v27   ;;  %1512 = vst [vmem:[%s2186_s4 + $0x30] sm:$0xff] %v1500_v38   ;;  %v1200_v44 = vmul.f32 %v2029_v59, %v1061_v49 }
 0x2f4   :  { %v1066_v51 = vpop.permute.xlu1 %1065 }
 0x2f5   :  { %v1071_v53 = vmul.f32 %v2006_v33, %v1066_v51  ;;  %v1127_v20 = vmul.f32 %v2011_v39, %v1066_v51  ;;  %v1164_v54 = vmul.f32 %v2031_v61, %v1066_v51  ;;  %v1201_v56 = vmul.f32 %v2034_v63, %v1066_v51 }
 0x2f8   :  { %v1085_v45 = vpop.permute.xlu1 %1084 }
 0x2f9   :  { %v1094_v47 = vadd.f32 %v1085_v45, %v1070_v40  ;;  %v1130_v48 = vadd.f32 %v1126_v41, %v1085_v45  ;;  %v1167_v50 = vadd.f32 %v1163_v42, %v1085_v45  ;;  %v1204_v52 = vadd.f32 %v1200_v44, %v1085_v45 }
 0x2fb   :  { %v1098_v26 = vmax.f32 %v1094_v47, 0.0  ;;  %v1134_v59 = vmax.f32 %v1130_v48, 0.0  ;;  %v1171_v62 = vmax.f32 %v1167_v50, 0.0  ;;  %v1208_v0 = vmax.f32 %v1204_v52, 0.0 }
 0x2fc   :  { %v1090_v30 = vpop.permute.xlu1 %1089 }
 0x2fd   :  { %v1095_v57 = vadd.f32 %v1090_v30, %v1071_v53  ;;  %v1131_v36 = vadd.f32 %v1127_v20, %v1090_v30  ;;  %v1168_v60 = vadd.f32 %v1164_v54, %v1090_v30  ;;  %v1205_v55 = vadd.f32 %v1201_v56, %v1090_v30 }
 0x2ff   :  { %v1099_v15 = vmax.f32 %v1095_v57, 0.0  ;;  %v1135_v2 = vmax.f32 %v1131_v36, 0.0  ;;  %v1172_v3 = vmax.f32 %v1168_v60, 0.0  ;;  %v1209_v4 = vmax.f32 %v1205_v55, 0.0 }
 0x301   :  { %v1475_v33 = vpack.c.bf16 %v1099_v15, %v1098_v26  ;;  %v1485_v5 = vpack.c.bf16 %v1135_v2, %v1134_v59  ;;  %v1495_v39 = vpack.c.bf16 %v1172_v3, %v1171_v62  ;;  %v1505_v6 = vpack.c.bf16 %v1209_v4, %v1208_v0 }
 0x303   :  { %1507 = vst [vmem:[%s2186_s4 + $0x8] sm:$0xff] %v1475_v33   ;;  %1509 = vst [vmem:[%s2186_s4 + $0x18] sm:$0xff] %v1485_v5  }
 0x304   :  { %1511 = vst [vmem:[%s2186_s4 + $0x28] sm:$0xff] %v1495_v39   ;;  %1513 = vst [vmem:[%s2186_s4 + $0x38] sm:$0xff] %v1505_v6  }

// kernel: generator_forward.7
= control target key start
LH: loop header
LB: loop body
LE: loop exit
PB: predicated region body
PF: predicated region fallthrough
CT: control target
= control target key end

     0   :  { %v983_v0 = vmov 0.0   ;;  %vm984_vm0 = vmmov 0   ;;  %s1223_s1 = inlined_call_operand.vmem [shape: bf16[4,128,128], index: 1, kind: input, shape index: {}]   ;;  %s1224_s0 = inlined_call_operand.vmem [shape: bf16[4,16,128], index: 0, kind: input, shape index: {}]   ;;  %s1225_s2 = inlined_call_operand.vmem [shape: f32[16,1], index: 2, kind: input, shape index: {}]   ;;  %s1226_s3 = inlined_call_operand.vmem [shape: f32[16,1], index: 3, kind: input, shape index: {}]   ;;  %s1227_s4 = inlined_call_operand.vmem [shape: bf16[4,16,128], index: 4, kind: output, shape index: {}]  }
   0x1   :  { %858 = vmatprep.subr.bf16.mxu0 %v983_v0  ;;  %878 = vmatprep.subr.bf16.mxu1 %v983_v0  ;;  %v943_v1 = vld [vmem:[%s1223_s1] sm:$0xff]   ;;  %v945_v3 = vld [vmem:[%s1223_s1 + $0x8] sm:$0xff]   ;;  %v947_v5 = vld [vmem:[%s1223_s1 + $0x10] sm:$0xff]  }
   0x2   :  { %v944_v2 = vld [vmem:[%s1223_s1 + $0x40] sm:$0xff]   ;;  %874 = vmatprep.mubr.msk.bf16.mxu0 %vm984_vm0, %v983_v0  ;;  %894 = vmatprep.mubr.msk.bf16.mxu1 %vm984_vm0, %v983_v0  ;;  %v946_v4 = vld [vmem:[%s1223_s1 + $0x48] sm:$0xff]   ;;  %v948_v6 = vld [vmem:[%s1223_s1 + $0x50] sm:$0xff]  }
   0x3   :  { %859 = vmatpush3.bf16.msra.mxu0 %v943_v1  ;;  %879 = vmatpush3.bf16.msra.mxu1 %v944_v2  ;;  %v949_v7 = vld [vmem:[%s1223_s1 + $0x18] sm:$0xff]   ;;  %v951_v9 = vld [vmem:[%s1223_s1 + $0x20] sm:$0xff]   ;;  %v953_v11 = vld [vmem:[%s1223_s1 + $0x28] sm:$0xff]  }
   0x4   :  { %860 = vmatprep.subr.bf16.mxu0 %v983_v0  ;;  %880 = vmatprep.subr.bf16.mxu1 %v983_v0  ;;  %v950_v8 = vld [vmem:[%s1223_s1 + $0x58] sm:$0xff]   ;;  %v952_v10 = vld [vmem:[%s1223_s1 + $0x60] sm:$0xff]   ;;  %v954_v12 = vld [vmem:[%s1223_s1 + $0x68] sm:$0xff]  }
   0x5   :  { %v955_v13 = vld [vmem:[%s1223_s1 + $0x30] sm:$0xff]   ;;  %v957_v15 = vld [vmem:[%s1223_s1 + $0x38] sm:$0xff]   ;;  %v959_v17 = vld [vmem:[%s1224_s0] sm:$0xff]  }
   0x6   :  { %v956_v14 = vld [vmem:[%s1223_s1 + $0x70] sm:$0xff]   ;;  %v958_v16 = vld [vmem:[%s1223_s1 + $0x78] sm:$0xff]   ;;  %v960_v18 = vld [vmem:[%s1224_s0 + $0x8] sm:$0xff]  }
   0x7   :  { %861 = vmatpush3.bf16.msra.mxu0 %v945_v3  ;;  %881 = vmatpush3.bf16.msra.mxu1 %v946_v4  ;;  %v961_v19 = vld [vmem:[%s1223_s1 + $0x80] sm:$0xff]   ;;  %v963_v21 = vld [vmem:[%s1223_s1 + $0x88] sm:$0xff]   ;;  %v965_v23 = vld [vmem:[%s1223_s1 + $0x90] sm:$0xff]  }
   0x8   :  { %862 = vmatprep.subr.bf16.mxu0 %v983_v0  ;;  %882 = vmatprep.subr.bf16.mxu1 %v983_v0  ;;  %v962_v20 = vld [vmem:[%s1223_s1 + $0xc0] sm:$0xff]   ;;  %v964_v22 = vld [vmem:[%s1223_s1 + $0xc8] sm:$0xff]   ;;  %v966_v24 = vld [vmem:[%s1223_s1 + $0xd0] sm:$0xff]  }
   0x9   :  { %v967_v25 = vld [vmem:[%s1223_s1 + $0x98] sm:$0xff]   ;;  %v969_v27 = vld [vmem:[%s1223_s1 + $0xa0] sm:$0xff]   ;;  %v971_v29 = vld [vmem:[%s1223_s1 + $0xa8] sm:$0xff]  }
   0xa   :  { %v968_v26 = vld [vmem:[%s1223_s1 + $0xd8] sm:$0xff]   ;;  %v970_v28 = vld [vmem:[%s1223_s1 + $0xe0] sm:$0xff]   ;;  %v972_v30 = vld [vmem:[%s1223_s1 + $0xe8] sm:$0xff]  }
   0xb   :  { %863 = vmatpush3.bf16.msra.mxu0 %v947_v5  ;;  %883 = vmatpush3.bf16.msra.mxu1 %v948_v6  ;;  %v973_v31 = vld [vmem:[%s1223_s1 + $0xb0] sm:$0xff]   ;;  %v975_v33 = vld [vmem:[%s1223_s1 + $0xb8] sm:$0xff]  }
   0xc   :  { %864 = vmatprep.subr.bf16.mxu0 %v983_v0  ;;  %884 = vmatprep.subr.bf16.mxu1 %v983_v0  ;;  %v974_v32 = vld [vmem:[%s1223_s1 + $0xf0] sm:$0xff]   ;;  %v976_v34 = vld [vmem:[%s1223_s1 + $0xf8] sm:$0xff]  }
   0xd   :  { %v977_v35 = vld [vmem:[%s1224_s0 + $0x10] sm:$0xff]   ;;  %v978_v36 = vld [vmem:[%s1224_s0 + $0x18] sm:$0xff]  }
   0xf   :  { %865 = vmatpush3.bf16.msra.mxu0 %v949_v7  ;;  %885 = vmatpush3.bf16.msra.mxu1 %v950_v8 }
  0x10   :  { %866 = vmatprep.subr.bf16.mxu0 %v983_v0  ;;  %886 = vmatprep.subr.bf16.mxu1 %v983_v0 }
  0x13   :  { %867 = vmatpush3.bf16.msra.mxu0 %v951_v9  ;;  %887 = vmatpush3.bf16.msra.mxu1 %v952_v10 }
  0x14   :  { %868 = vmatprep.subr.bf16.mxu0 %v983_v0  ;;  %888 = vmatprep.subr.bf16.mxu1 %v983_v0 }
  0x17   :  { %869 = vmatpush3.bf16.msra.mxu0 %v953_v11  ;;  %889 = vmatpush3.bf16.msra.mxu1 %v954_v12 }
  0x18   :  { %870 = vmatprep.subr.bf16.mxu0 %v983_v0  ;;  %890 = vmatprep.subr.bf16.mxu1 %v983_v0 }
  0x1b   :  { %871 = vmatpush3.bf16.msra.mxu0 %v955_v13  ;;  %891 = vmatpush3.bf16.msra.mxu1 %v956_v14 }
  0x1c   :  { %872 = vmatprep.subr.bf16.mxu0 %v983_v0  ;;  %892 = vmatprep.subr.bf16.mxu1 %v983_v0 }
  0x1f   :  { %873 = vmatpush3.bf16.msra.mxu0 %v957_v15  ;;  %893 = vmatpush3.bf16.msra.mxu1 %v958_v16 }
  0x20   :  { %898 = vmatprep.subr.bf16.mxu0 %v983_v0  ;;  %918 = vmatprep.subr.bf16.mxu1 %v983_v0 }
  0x22   :  { %875 = vmatmul.mubr.bf16.vlgmr.msra.gmra.mrb[0].mxu0 %v959_v17  ;;  %895 = vmatmul.mubr.bf16.vlgmr.msra.gmra.mrb[0].mxu1 %v960_v18 }
  0x23   :  { %899 = vmatpush3.bf16.msra.mxu0 %v961_v19  ;;  %919 = vmatpush3.bf16.msra.mxu1 %v962_v20 }
  0x24   :  { %900 = vmatprep.subr.bf16.mxu0 %v983_v0  ;;  %920 = vmatprep.subr.bf16.mxu1 %v983_v0 }
  0x25   :  { %914 = vmatprep.mubr.msk.bf16.mxu0 %vm984_vm0, %v983_v0  ;;  %934 = vmatprep.mubr.msk.bf16.mxu1 %vm984_vm0, %v983_v0 }
  0x27   :  { %901 = vmatpush3.bf16.msra.mxu0 %v963_v21  ;;  %921 = vmatpush3.bf16.msra.mxu1 %v964_v22  ;;  %v985_v21 = vmov 0  }
  0x28   :  { %902 = vmatprep.subr.bf16.mxu0 %v983_v0  ;;  %922 = vmatprep.subr.bf16.mxu1 %v983_v0 }
  0x29   :  { %941 = vset.pattern.permute.xlu0 %v985_v21  ;;  %942 = vset.pattern.permute.xlu1 %v985_v21 }
  0x2b   :  { %903 = vmatpush3.bf16.msra.mxu0 %v965_v23  ;;  %923 = vmatpush3.bf16.msra.mxu1 %v966_v24 }
  0x2c   :  { %904 = vmatprep.subr.bf16.mxu0 %v983_v0  ;;  %924 = vmatprep.subr.bf16.mxu1 %v983_v0 }
  0x2f   :  { %905 = vmatpush3.bf16.msra.mxu0 %v967_v25  ;;  %925 = vmatpush3.bf16.msra.mxu1 %v968_v26 }
  0x30   :  { %906 = vmatprep.subr.bf16.mxu0 %v983_v0  ;;  %926 = vmatprep.subr.bf16.mxu1 %v983_v0 }
  0x33   :  { %907 = vmatpush3.bf16.msra.mxu0 %v969_v27  ;;  %927 = vmatpush3.bf16.msra.mxu1 %v970_v28 }
  0x34   :  { %908 = vmatprep.subr.bf16.mxu0 %v983_v0  ;;  %928 = vmatprep.subr.bf16.mxu1 %v983_v0 }
  0x37   :  { %909 = vmatpush3.bf16.msra.mxu0 %v971_v29  ;;  %929 = vmatpush3.bf16.msra.mxu1 %v972_v30 }
  0x38   :  { %910 = vmatprep.subr.bf16.mxu0 %v983_v0  ;;  %930 = vmatprep.subr.bf16.mxu1 %v983_v0 }
  0x3b   :  { %911 = vmatpush3.bf16.msra.mxu0 %v973_v31  ;;  %931 = vmatpush3.bf16.msra.mxu1 %v974_v32 }
  0x3c   :  { %912 = vmatprep.subr.bf16.mxu0 %v983_v0  ;;  %932 = vmatprep.subr.bf16.mxu1 %v983_v0 }
  0x3f   :  { %913 = vmatpush3.bf16.msra.mxu0 %v975_v33  ;;  %933 = vmatpush3.bf16.msra.mxu1 %v976_v34 }
  0x42   :  { %915 = vmatmul.mubr.bf16.vlgmr.msra.gmra.mrb[4].mxu0 %v977_v35  ;;  %935 = vmatmul.mubr.bf16.vlgmr.msra.gmra.mrb[4].mxu1 %v978_v36 }
  0xf5   :  { %v1159_v37 = vpop.f32.mrb[0].mxu0  ;;  %v1161_v38 = vpop.f32.mrb[0].mxu1 }
  0xf6   :  { %489 = vadd.xlane.f32.xlu0 %v1159_v37  ;;  %v876_v39 = vpop.f32.mrb[1].mxu0  ;;  %497 = vadd.xlane.f32.xlu1 %v1161_v38  ;;  %v896_v41 = vpop.f32.mrb[1].mxu1 }
  0xf7   :  { %v1165_v40 = vpop.f32.mrb[2].mxu0  ;;  %v1167_v43 = vpop.f32.mrb[2].mxu1 }
  0xf8   :  { %v877_v42 = vpop.f32.mrb[3].mxu0  ;;  %v897_v44 = vpop.f32.mrb[3].mxu1 }
  0xf9   :  { %v576_v44 = vld [vmem:[%s1225_s2] sm:$0xff] }
  0xfa   :  { %491 = vadd.xlane.f32.xlu0 %v1165_v40  ;;  %499 = vadd.xlane.f32.xlu1 %v1167_v43 }
 0x115   :  { %v1171_v45 = vpop.f32.mrb[4].mxu0  ;;  %v1173_v46 = vpop.f32.mrb[4].mxu1 }
 0x116   :  { %505 = vadd.xlane.f32.xlu0 %v1171_v45  ;;  %v916_v47 = vpop.f32.mrb[5].mxu0  ;;  %v936_v49 = vpop.f32.mrb[5].mxu1 }
 0x117   :  { %v1176_v48 = vpop.f32.mrb[6].mxu0  ;;  %v1178_v50 = vpop.f32.mrb[6].mxu1  ;;  %v577_v49 = vld [vmem:[%s1225_s2 + $0x8] sm:$0xff] }
 0x118   :  { %507 = vadd.xlane.f32.xlu1 %v1176_v48  ;;  %v917_v51 = vpop.f32.mrb[7].mxu0  ;;  %v937_v52 = vpop.f32.mrb[7].mxu1 }
 0x11a   :  { %513 = vadd.xlane.f32.xlu0 %v1173_v46 }
 0x11c   :  { %515 = vadd.xlane.f32.xlu1 %v1178_v50 }
 0x183   :  { %v490_v53 = vpop.xlane.xlu0 %489  ;;  %v498_v54 = vpop.xlane.xlu1 %497 }
 0x184   :  { %v501_v58 = vadd.f32 %v498_v54, %v490_v53 }
 0x187   :  { %v492_v55 = vpop.xlane.xlu0 %491  ;;  %v500_v56 = vpop.xlane.xlu1 %499 }
 0x188   :  { %v502_v60 = vadd.f32 %v500_v56, %v492_v55  ;;  %v584_v55 = vld [vmem:[%s1226_s3] sm:$0xff] }
 0x1a3   :  { %v506_v57 = vpop.xlane.xlu0 %505 }
 0x1a4   :  { %v509_v61 = vadd.f32 %v506_v57, %v501_v58  ;;  %v585_v58 = vld [vmem:[%s1226_s3 + $0x8] sm:$0xff] }
 0x1a5   :  { %v508_v59 = vpop.xlane.xlu1 %507 }
 0x1a6   :  { %v510_v63 = vadd.f32 %v508_v59, %v502_v60 }
 0x1a7   :  { %v514_v62 = vpop.xlane.xlu0 %513 }
 0x1a8   :  { %v517_v0 = vadd.f32 %v514_v62, %v509_v61 }
 0x1a9   :  { %v516_v1 = vpop.xlane.xlu1 %515 }
 0x1aa   :  { %v519_v2 = vmul.f32 0.001953125, %v517_v0  ;;  %v518_v3 = vadd.f32 %v516_v1, %v510_v63 }
 0x1ac   :  { %v520_v4 = vmul.f32 0.001953125, %v518_v3  ;;  %v524_v5 = vsub.f32 %v1159_v37, %v519_v2  ;;  %v538_v8 = vsub.f32 %v1161_v38, %v519_v2  ;;  %v550_v12 = vsub.f32 %v1171_v45, %v519_v2 }
 0x1ad   :  { %v562_v16 = vsub.f32 %v1173_v46, %v519_v2 }
 0x1ae   :  { %v530_v6 = vmul.f32 %v524_v5, %v524_v5  ;;  %v525_v7 = vsub.f32 %v1165_v40, %v520_v4  ;;  %v539_v10 = vsub.f32 %v1167_v43, %v520_v4  ;;  %v542_v11 = vmul.f32 %v538_v8, %v538_v8 }
 0x1af   :  { %v551_v14 = vsub.f32 %v1176_v48, %v520_v4  ;;  %v554_v15 = vmul.f32 %v550_v12, %v550_v12  ;;  %v563_v18 = vsub.f32 %v1178_v50, %v520_v4  ;;  %v566_v19 = vmul.f32 %v562_v16, %v562_v16 }
 0x1b0   :  { %532 = vadd.xlane.f32.xlu0 %v530_v6  ;;  %v531_v9 = vmul.f32 %v525_v7, %v525_v7  ;;  %v543_v13 = vmul.f32 %v539_v10, %v539_v10 }
 0x1b1   :  { %v555_v17 = vmul.f32 %v551_v14, %v551_v14  ;;  %v567_v20 = vmul.f32 %v563_v18, %v563_v18 }
 0x1b2   :  { %534 = vadd.xlane.f32.xlu1 %v531_v9 }
 0x1b4   :  { %544 = vadd.xlane.f32.xlu0 %v542_v11 }
 0x1b6   :  { %546 = vadd.xlane.f32.xlu1 %v543_v13 }
 0x1b8   :  { %556 = vadd.xlane.f32.xlu0 %v554_v15 }
 0x1ba   :  { %558 = vadd.xlane.f32.xlu1 %v555_v17 }
 0x1bc   :  { %568 = vadd.xlane.f32.xlu0 %v566_v19 }
 0x1be   :  { %570 = vadd.xlane.f32.xlu1 %v567_v20 }
 0x23d   :  { %v533_v22 = vpop.xlane.xlu0 %532 }
 0x23f   :  { %v535_v23 = vpop.xlane.xlu1 %534 }
 0x241   :  { %v545_v24 = vpop.xlane.xlu0 %544 }
 0x242   :  { %v548_v27 = vadd.f32 %v545_v24, %v533_v22 }
 0x243   :  { %v547_v25 = vpop.xlane.xlu1 %546 }
 0x244   :  { %v549_v29 = vadd.f32 %v547_v25, %v535_v23 }
 0x245   :  { %v557_v26 = vpop.xlane.xlu0 %556 }
 0x246   :  { %v560_v30 = vadd.f32 %v557_v26, %v548_v27 }
 0x247   :  { %v559_v28 = vpop.xlane.xlu1 %558 }
 0x248   :  { %v561_v32 = vadd.f32 %v559_v28, %v549_v29 }
 0x249   :  { %v569_v31 = vpop.xlane.xlu0 %568 }
 0x24a   :  { %v572_v33 = vadd.f32 %v569_v31, %v560_v30 }
 0x24b   :  { %v571_v34 = vpop.xlane.xlu1 %570 }
 0x24c   :  { %v574_v35 = vmul.f32 0.001953125, %v572_v33  ;;  %v573_v36 = vadd.f32 %v571_v34, %v561_v32 }
 0x24e   :  { %v578_v39 = vadd.f32 1e-05, %v574_v35  ;;  %v575_v41 = vmul.f32 0.001953125, %v573_v36 }
 0x250   :  { %979 = vrsqrt.f32 %v578_v39  ;;  %v579_v42 = vadd.f32 1e-05, %v575_v41 }
 0x252   :  { %981 = vrsqrt.f32 %v579_v42 }
 0x25a   :  { %v980_v47 = vpop.eup %979 }
 0x25b   :  { %v582_v51 = vmul.f32 %v980_v47, %v576_v44 }
 0x25c   :  { %v982_v52 = vpop.eup %981 }
 0x25d   :  { %592 = vperm.xlu0 %941, %v582_v51   ;;  %v583_v53 = vmul.f32 %v982_v52, %v577_v49  ;;  %v586_v54 = vmul.f32 %v582_v51, %v519_v2 }
 0x25f   :  { %597 = vperm.xlu1 %942, %v583_v53   ;;  %v588_v56 = vsub.f32 %v584_v55, %v586_v54  ;;  %v587_v57 = vmul.f32 %v583_v53, %v520_v4 }
 0x261   :  { %v589_v59 = vsub.f32 %v585_v58, %v587_v57 }
 0x263   :  { %604 = vperm.xlu1 %942, %v588_v56  }
 0x267   :  { %609 = vperm.xlu1 %942, %v589_v59  }
 0x2dc   :  { %v593_v61 = vpop.permute.xlu0 %592 }
 0x2dd   :  { %v600_v62 = vmul.f32 %v593_v61, %v1159_v37  ;;  %v628_v63 = vmul.f32 %v593_v61, %v1161_v38  ;;  %v647_v0 = vmul.f32 %v593_v61, %v1171_v45  ;;  %v666_v1 = vmul.f32 %v593_v61, %v1173_v46 }
 0x2de   :  { %v598_v60 = vpop.permute.xlu1 %597 }
 0x2df   :  { %v601_v7 = vmul.f32 %v598_v60, %v1165_v40  ;;  %v629_v8 = vmul.f32 %v598_v60, %v1167_v43  ;;  %v648_v9 = vmul.f32 %v598_v60, %v1176_v48  ;;  %v667_v10 = vmul.f32 %v598_v60, %v1178_v50 }
 0x2e2   :  { %v605_v2 = vpop.permute.xlu1 %604 }
 0x2e3   :  { %v612_v3 = vadd.f32 %v605_v2, %v600_v62  ;;  %v630_v4 = vadd.f32 %v628_v63, %v605_v2  ;;  %v649_v5 = vadd.f32 %v647_v0, %v605_v2  ;;  %v668_v6 = vadd.f32 %v666_v1, %v605_v2 }
 0x2e5   :  { %v614_v13 = vmax.f32 %v612_v3, 0.0  ;;  %v632_v46 = vmax.f32 %v630_v4, 0.0  ;;  %v651_v14 = vmax.f32 %v649_v5, 0.0  ;;  %v670_v15 = vmax.f32 %v668_v6, 0.0 }
 0x2e6   :  { %v610_v37 = vpop.permute.xlu1 %609 }
 0x2e7   :  { %v613_v11 = vadd.f32 %v610_v37, %v601_v7  ;;  %v631_v38 = vadd.f32 %v629_v8, %v610_v37  ;;  %v650_v12 = vadd.f32 %v648_v9, %v610_v37  ;;  %v669_v45 = vadd.f32 %v667_v10, %v610_v37 }
 0x2e9   :  { %v615_v16 = vmax.f32 %v613_v11, 0.0  ;;  %v633_v17 = vmax.f32 %v631_v38, 0.0  ;;  %v652_v18 = vmax.f32 %v650_v12, 0.0  ;;  %v671_v19 = vmax.f32 %v669_v45, 0.0 }
 0x2eb   :  { %v802_v40 = vpack.c.bf16 %v615_v16, %v614_v13  ;;  %v807_v20 = vpack.c.bf16 %v633_v17, %v632_v46  ;;  %v812_v43 = vpack.c.bf16 %v652_v18, %v651_v14  ;;  %v817_v21 = vpack.c.bf16 %v671_v19, %v670_v15 }
 0x2ed   :  { %803 = vst [vmem:[%s1227_s4] sm:$0xff] %v802_v40   ;;  %819 = vst [vmem:[%s1227_s4 + $0x8] sm:$0xff] %v807_v20  }
 0x2ee   :  { %820 = vst [vmem:[%s1227_s4 + $0x10] sm:$0xff] %v812_v43   ;;  %821 = vst [vmem:[%s1227_s4 + $0x18] sm:$0xff] %v817_v21  }

// kernel: generator_forward.8
= control target key start
LH: loop header
LB: loop body
LE: loop exit
PB: predicated region body
PF: predicated region fallthrough
CT: control target
= control target key end

     0   :  { %v1305_v1 = vmov 0   ;;  %vm115_vm0 = vcmask 523264   ;;  %s1682_s1 = inlined_call_operand.vmem [shape: bf16[4,64,512], index: 1, kind: input, shape index: {}]   ;;  %s1683_s0 = inlined_call_operand.vmem [shape: bf16[4,8,64], index: 0, kind: input, shape index: {}]   ;;  %s1684_s2 = inlined_call_operand.vmem [shape: f32[8,1], index: 2, kind: input, shape index: {}]   ;;  %s1685_s3 = inlined_call_operand.vmem [shape: f32[8,1], index: 3, kind: input, shape index: {}]   ;;  %s1686_s4 = inlined_call_operand.vmem [shape: bf16[4,8,512], index: 4, kind: output, shape index: {}]  }
   0x1   :  { %v1207_v0 = vld [vmem:[%s1682_s1 + $0x4] ss:$16 sps:$4 sm:$0xff]   ;;  %151 = vmatprep.mubr.bf16.mxu0 %v1305_v1  ;;  %192 = vmatprep.mubr.bf16.mxu1 %v1305_v1  ;;  %v1209_v2 = vld [vmem:[%s1682_s1 + $0xc] ss:$16 sps:$4 sm:$0xff]   ;;  %v1211_v3 = vld [vmem:[%s1682_s1] ss:$16 sps:$4 sm:$0xff]  }
   0x2   :  { %1205 = vset.pattern.permute.xlu0 %v1305_v1  ;;  %1206 = vset.pattern.permute.xlu1 %v1305_v1  ;;  %v1212_v4 = vld [vmem:[%s1682_s1 + $0x8] ss:$16 sps:$4 sm:$0xff]   ;;  %v1213_v5 = vld [vmem:[%s1682_s1 + $0x24] ss:$16 sps:$4 sm:$0xff]   ;;  %v1215_v6 = vld [vmem:[%s1682_s1 + $0x2c] ss:$16 sps:$4 sm:$0xff]  }
   0x3   :  { %119 = vmatprep.subr.bf16.mxu0 %v1207_v0  ;;  %160 = vmatprep.subr.bf16.mxu1 %v1209_v2  ;;  %v1217_v7 = vld [vmem:[%s1682_s1 + $0x20] ss:$16 sps:$4 sm:$0xff]   ;;  %v1218_v8 = vld [vmem:[%s1682_s1 + $0x28] ss:$16 sps:$4 sm:$0xff]   ;;  %v1219_v9 = vld [vmem:[%s1682_s1 + $0x44] ss:$16 sps:$4 sm:$0xff]  }
   0x4   :  { %120 = vmatpush1.bf16.msra.mxu0 %v1211_v3  ;;  %161 = vmatpush1.bf16.msra.mxu1 %v1212_v4  ;;  %v1221_v10 = vld [vmem:[%s1682_s1 + $0x4c] ss:$16 sps:$4 sm:$0xff]   ;;  %v1223_v11 = vld [vmem:[%s1682_s1 + $0x40] ss:$16 sps:$4 sm:$0xff]   ;;  %v1224_v12 = vld [vmem:[%s1682_s1 + $0x48] ss:$16 sps:$4 sm:$0xff]  }
   0x5   :  { %121 = vmatprep.subr.bf16.mxu0 %v1213_v5  ;;  %162 = vmatprep.subr.bf16.mxu1 %v1215_v6  ;;  %v1225_v13 = vld [vmem:[%s1682_s1 + $0x64] ss:$16 sps:$4 sm:$0xff]   ;;  %v1227_v14 = vld [vmem:[%s1682_s1 + $0x6c] ss:$16 sps:$4 sm:$0xff]   ;;  %v1229_v15 = vld [vmem:[%s1682_s1 + $0x60] ss:$16 sps:$4 sm:$0xff]  }
   0x6   :  { %v1230_v16 = vld [vmem:[%s1682_s1 + $0x68] ss:$16 sps:$4 sm:$0xff]   ;;  %v1233_v17 = vld [vmem:[%s1682_s1 + $0x84] ss:$16 sps:$4 sm:$0xff]   ;;  %v1236_v18 = vld [vmem:[%s1682_s1 + $0x8c] ss:$16 sps:$4 sm:$0xff]  }
   0x7   :  { %v18_v19 = vld [vmem:[%s1683_s0] sm:$0xf]  ;;  %v1234_v21 = vld [vmem:[%s1682_s1 + $0x88] ss:$16 sps:$4 sm:$0xff]   ;;  %v1239_v22 = vld [vmem:[%s1682_s1 + $0xa4] ss:$16 sps:$4 sm:$0xff]  }
   0x8   :  { %122 = vmatpush1.bf16.msra.mxu0 %v1217_v7  ;;  %163 = vmatpush1.bf16.msra.mxu1 %v1218_v8  ;;  %v1231_v20 = vld [vmem:[%s1682_s1 + $0x80] ss:$16 sps:$4 sm:$0xff]   ;;  %v1242_v23 = vld [vmem:[%s1682_s1 + $0xac] ss:$16 sps:$4 sm:$0xff]   ;;  %v1240_v25 = vld [vmem:[%s1682_s1 + $0xa8] ss:$16 sps:$4 sm:$0xff]  }
   0x9   :  { %123 = vmatprep.subr.bf16.mxu0 %v1219_v9  ;;  %164 = vmatprep.subr.bf16.mxu1 %v1221_v10  ;;  %v1237_v24 = vld [vmem:[%s1682_s1 + $0xa0] ss:$16 sps:$4 sm:$0xff]   ;;  %v1245_v26 = vld [vmem:[%s1682_s1 + $0xc4] ss:$16 sps:$4 sm:$0xff]   ;;  %v1248_v27 = vld [vmem:[%s1682_s1 + $0xcc] ss:$16 sps:$4 sm:$0xff]  }
   0xa   :  { %v1243_v28 = vld [vmem:[%s1682_s1 + $0xc0] ss:$16 sps:$4 sm:$0xff]   ;;  %v1246_v29 = vld [vmem:[%s1682_s1 + $0xc8] ss:$16 sps:$4 sm:$0xff]   ;;  %v1251_v30 = vld [vmem:[%s1682_s1 + $0xe4] ss:$16 sps:$4 sm:$0xff]  }
   0xb   :  { %v1254_v31 = vld [vmem:[%s1682_s1 + $0xec] ss:$16 sps:$4 sm:$0xff]   ;;  %v1249_v32 = vld [vmem:[%s1682_s1 + $0xe0] ss:$16 sps:$4 sm:$0xff]   ;;  %v1252_v33 = vld [vmem:[%s1682_s1 + $0xe8] ss:$16 sps:$4 sm:$0xff]  }
   0xc   :  { %124 = vmatpush1.bf16.msra.mxu0 %v1223_v11  ;;  %165 = vmatpush1.bf16.msra.mxu1 %v1224_v12  ;;  %v1257_v34 = vld [vmem:[%s1682_s1 + $0x104] ss:$16 sps:$4 sm:$0xff]   ;;  %v1260_v35 = vld [vmem:[%s1682_s1 + $0x10c] ss:$16 sps:$4 sm:$0xff]   ;;  %v1255_v37 = vld [vmem:[%s1682_s1 + $0x100] ss:$16 sps:$4 sm:$0xff]  }
   0xd   :  { %125 = vmatprep.subr.bf16.mxu0 %v1225_v13  ;;  %166 = vmatprep.subr.bf16.mxu1 %v1227_v14  ;;  %v1077_v36 = vld [vmem:[%s1683_s0 + $0x4] sm:$0xf]  ;;  %v1258_v38 = vld [vmem:[%s1682_s1 + $0x108] ss:$16 sps:$4 sm:$0xff]   ;;  %v1266_v40 = vld [vmem:[%s1682_s1 + $0x12c] ss:$16 sps:$4 sm:$0xff]  }
   0xe   :  { %v1263_v39 = vld [vmem:[%s1682_s1 + $0x124] ss:$16 sps:$4 sm:$0xff]   ;;  %v1261_v41 = vld [vmem:[%s1682_s1 + $0x120] ss:$16 sps:$4 sm:$0xff]   ;;  %v1264_v42 = vld [vmem:[%s1682_s1 + $0x128] ss:$16 sps:$4 sm:$0xff]  }
   0xf   :  { %v1269_v43 = vld [vmem:[%s1682_s1 + $0x144] ss:$16 sps:$4 sm:$0xff]   ;;  %v1272_v44 = vld [vmem:[%s1682_s1 + $0x14c] ss:$16 sps:$4 sm:$0xff]   ;;  %v1267_v45 = vld [vmem:[%s1682_s1 + $0x140] ss:$16 sps:$4 sm:$0xff]  }
  0x10   :  { %126 = vmatpush1.bf16.msra.mxu0 %v1229_v15  ;;  %167 = vmatpush1.bf16.msra.mxu1 %v1230_v16  ;;  %v1270_v46 = vld [vmem:[%s1682_s1 + $0x148] ss:$16 sps:$4 sm:$0xff]   ;;  %v1275_v47 = vld [vmem:[%s1682_s1 + $0x164] ss:$16 sps:$4 sm:$0xff]   ;;  %v1278_v48 = vld [vmem:[%s1682_s1 + $0x16c] ss:$16 sps:$4 sm:$0xff]  }
  0x11   :  { %307 = vmatprep.subr.bf16.mxu0 %v1233_v17  ;;  %348 = vmatprep.subr.bf16.mxu1 %v1236_v18  ;;  %v1273_v49 = vld [vmem:[%s1682_s1 + $0x160] ss:$16 sps:$4 sm:$0xff]   ;;  %v1276_v50 = vld [vmem:[%s1682_s1 + $0x168] ss:$16 sps:$4 sm:$0xff]   ;;  %v1281_v51 = vld [vmem:[%s1682_s1 + $0x184] ss:$16 sps:$4 sm:$0xff]  }
  0x12   :  { %v1284_v52 = vld [vmem:[%s1682_s1 + $0x18c] ss:$16 sps:$4 sm:$0xff]   ;;  %v1112_v53 = vld [vmem:[%s1683_s0 + $0x8] sm:$0xf]  ;;  %v1279_v54 = vld [vmem:[%s1682_s1 + $0x180] ss:$16 sps:$4 sm:$0xff]  }
  0x13   :  { %1075 = vmatmul.mubr.msk.bf16.vlgmr.msra.gmra.mrb[0].mxu0 %vm115_vm0, %v18_v19  ;;  %1076 = vmatmul.mubr.msk.bf16.vlgmr.msra.gmra.mrb[0].mxu1 %vm115_vm0, %v18_v19  ;;  %v1282_v55 = vld [vmem:[%s1682_s1 + $0x188] ss:$16 sps:$4 sm:$0xff]   ;;  %v1287_v56 = vld [vmem:[%s1682_s1 + $0x1a4] ss:$16 sps:$4 sm:$0xff]   ;;  %v1290_v57 = vld [vmem:[%s1682_s1 + $0x1ac] ss:$16 sps:$4 sm:$0xff]  }
  0x14   :  { %308 = vmatpush1.bf16.msra.mxu0 %v1231_v20  ;;  %349 = vmatpush1.bf16.msra.mxu1 %v1234_v21  ;;  %v1285_v58 = vld [vmem:[%s1682_s1 + $0x1a0] ss:$16 sps:$4 sm:$0xff]   ;;  %v1288_v59 = vld [vmem:[%s1682_s1 + $0x1a8] ss:$16 sps:$4 sm:$0xff]   ;;  %v1293_v60 = vld [vmem:[%s1682_s1 + $0x1c4] ss:$16 sps:$4 sm:$0xff]  }
  0x15   :  { %309 = vmatprep.subr.bf16.mxu0 %v1239_v22  ;;  %350 = vmatprep.subr.bf16.mxu1 %v1242_v23  ;;  %v1296_v61 = vld [vmem:[%s1682_s1 + $0x1cc] ss:$16 sps:$4 sm:$0xff]   ;;  %v1291_v62 = vld [vmem:[%s1682_s1 + $0x1c0] ss:$16 sps:$4 sm:$0xff]   ;;  %v1294_v63 = vld [vmem:[%s1682_s1 + $0x1c8] ss:$16 sps:$4 sm:$0xff]  }
  0x16   :  { %339 = vmatprep.mubr.bf16.mxu0 %v1305_v1  ;;  %380 = vmatprep.mubr.bf16.mxu1 %v1305_v1  ;;  %v1299_v0 = vld [vmem:[%s1682_s1 + $0x1e4] ss:$16 sps:$4 sm:$0xff]   ;;  %v1297_v2 = vld [vmem:[%s1682_s1 + $0x1e0] ss:$16 sps:$4 sm:$0xff]   ;;  %v1300_v3 = vld [vmem:[%s1682_s1 + $0x1e8] ss:$16 sps:$4 sm:$0xff]  }
  0x17   :  { %v1147_v4 = vld [vmem:[%s1683_s0 + $0xc] sm:$0xf] }
  0x18   :  { %310 = vmatpush1.bf16.msra.mxu0 %v1237_v24  ;;  %351 = vmatpush1.bf16.msra.mxu1 %v1240_v25 }
  0x19   :  { %311 = vmatprep.subr.bf16.mxu0 %v1245_v26  ;;  %352 = vmatprep.subr.bf16.mxu1 %v1248_v27 }
  0x1c   :  { %312 = vmatpush1.bf16.msra.mxu0 %v1243_v28  ;;  %353 = vmatpush1.bf16.msra.mxu1 %v1246_v29 }
  0x1d   :  { %313 = vmatprep.subr.bf16.mxu0 %v1251_v30  ;;  %354 = vmatprep.subr.bf16.mxu1 %v1254_v31 }
  0x20   :  { %314 = vmatpush1.bf16.msra.mxu0 %v1249_v32  ;;  %355 = vmatpush1.bf16.msra.mxu1 %v1252_v33 }
  0x21   :  { %496 = vmatprep.subr.bf16.mxu0 %v1257_v34  ;;  %537 = vmatprep.subr.bf16.mxu1 %v1260_v35 }
  0x23   :  { %1110 = vmatmul.mubr.msk.bf16.vlgmr.msra.gmra.mrb[4].mxu0 %vm115_vm0, %v1077_v36  ;;  %1111 = vmatmul.mubr.msk.bf16.vlgmr.msra.gmra.mrb[4].mxu1 %vm115_vm0, %v1077_v36 }
  0x24   :  { %497 = vmatpush1.bf16.msra.mxu0 %v1255_v37  ;;  %538 = vmatpush1.bf16.msra.mxu1 %v1258_v38 }
  0x25   :  { %498 = vmatprep.subr.bf16.mxu0 %v1263_v39  ;;  %539 = vmatprep.subr.bf16.mxu1 %v1266_v40 }
  0x26   :  { %528 = vmatprep.mubr.bf16.mxu0 %v1305_v1  ;;  %569 = vmatprep.mubr.bf16.mxu1 %v1305_v1 }
  0x28   :  { %499 = vmatpush1.bf16.msra.mxu0 %v1261_v41  ;;  %540 = vmatpush1.bf16.msra.mxu1 %v1264_v42 }
  0x29   :  { %500 = vmatprep.subr.bf16.mxu0 %v1269_v43  ;;  %541 = vmatprep.subr.bf16.mxu1 %v1272_v44 }
  0x2c   :  { %501 = vmatpush1.bf16.msra.mxu0 %v1267_v45  ;;  %542 = vmatpush1.bf16.msra.mxu1 %v1270_v46 }
  0x2d   :  { %502 = vmatprep.subr.bf16.mxu0 %v1275_v47  ;;  %543 = vmatprep.subr.bf16.mxu1 %v1278_v48 }
  0x30   :  { %503 = vmatpush1.bf16.msra.mxu0 %v1273_v49  ;;  %544 = vmatpush1.bf16.msra.mxu1 %v1276_v50 }
  0x31   :  { %685 = vmatprep.subr.bf16.mxu0 %v1281_v51  ;;  %726 = vmatprep.subr.bf16.mxu1 %v1284_v52 }
  0x33   :  { %1145 = vmatmul.mubr.msk.bf16.vlgmr.msra.gmra.mrb[8].mxu0 %vm115_vm0, %v1112_v53  ;;  %1146 = vmatmul.mubr.msk.bf16.vlgmr.msra.gmra.mrb[8].mxu1 %vm115_vm0, %v1112_v53 }
  0x34   :  { %686 = vmatpush1.bf16.msra.mxu0 %v1279_v54  ;;  %727 = vmatpush1.bf16.msra.mxu1 %v1282_v55 }
  0x35   :  { %687 = vmatprep.subr.bf16.mxu0 %v1287_v56  ;;  %728 = vmatprep.subr.bf16.mxu1 %v1290_v57 }
  0x36   :  { %717 = vmatprep.mubr.bf16.mxu0 %v1305_v1  ;;  %758 = vmatprep.mubr.bf16.mxu1 %v1305_v1  ;;  %v1302_v1 = vld [vmem:[%s1682_s1 + $0x1ec] ss:$16 sps:$4 sm:$0xff]  }
  0x38   :  { %688 = vmatpush1.bf16.msra.mxu0 %v1285_v58  ;;  %729 = vmatpush1.bf16.msra.mxu1 %v1288_v59 }
  0x39   :  { %689 = vmatprep.subr.bf16.mxu0 %v1293_v60  ;;  %730 = vmatprep.subr.bf16.mxu1 %v1296_v61 }
  0x3c   :  { %690 = vmatpush1.bf16.msra.mxu0 %v1291_v62  ;;  %731 = vmatpush1.bf16.msra.mxu1 %v1294_v63 }
  0x3d   :  { %691 = vmatprep.subr.bf16.mxu0 %v1299_v0  ;;  %732 = vmatprep.subr.bf16.mxu1 %v1302_v1 }
  0x40   :  { %692 = vmatpush1.bf16.msra.mxu0 %v1297_v2  ;;  %733 = vmatpush1.bf16.msra.mxu1 %v1300_v3 }
  0x43   :  { %1180 = vmatmul.mubr.msk.bf16.vlgmr.msra.gmra.mrb[12].mxu0 %vm115_vm0, %v1147_v4  ;;  %1181 = vmatmul.mubr.msk.bf16.vlgmr.msra.gmra.mrb[12].mxu1 %vm115_vm0, %v1147_v4 }
  0xe6   :  { %v1553_v5 = vpop.f32.mrb[0].mxu0  ;;  %v1555_v6 = vpop.f32.mrb[0].mxu1 }
  0xe7   :  { %v1557_v7 = vpop.f32.mrb[1].mxu0  ;;  %v1559_v8 = vpop.f32.mrb[1].mxu1 }
  0xe8   :  { %v776_v9 = vadd.f32 %v1557_v7, %v1553_v5  ;;  %v157_v10 = vpop.f32.mrb[2].mxu0  ;;  %v198_v11 = vpop.f32.mrb[2].mxu1 }
  0xe9   :  { %v158_v12 = vpop.f32.mrb[3].mxu0  ;;  %v199_v13 = vpop.f32.mrb[3].mxu1 }
  0xea   :  { %v777_v14 = vadd.f32 %v776_v9, %v1555_v6 }
  0xec   :  { %v778_v15 = vadd.f32 %v777_v14, %v1559_v8 }
  0xee   :  { %779 = vadd.xlane.f32.xlu0 %v778_v15 }
  0xf6   :  { %v1565_v16 = vpop.f32.mrb[4].mxu0  ;;  %v1567_v17 = vpop.f32.mrb[4].mxu1 }
  0xf7   :  { %v1569_v18 = vpop.f32.mrb[5].mxu0  ;;  %v1571_v19 = vpop.f32.mrb[5].mxu1 }
  0xf8   :  { %v786_v20 = vadd.f32 %v1569_v18, %v1565_v16  ;;  %v345_v21 = vpop.f32.mrb[6].mxu0  ;;  %v386_v22 = vpop.f32.mrb[6].mxu1 }
  0xf9   :  { %v346_v23 = vpop.f32.mrb[7].mxu0  ;;  %v387_v24 = vpop.f32.mrb[7].mxu1 }
  0xfa   :  { %v787_v25 = vadd.f32 %v786_v20, %v1567_v17 }
  0xfc   :  { %v788_v26 = vadd.f32 %v787_v25, %v1571_v19 }
  0xfe   :  { %789 = vadd.xlane.f32.xlu0 %v788_v26 }
 0x106   :  { %v1577_v27 = vpop.f32.mrb[8].mxu0  ;;  %v1579_v28 = vpop.f32.mrb[8].mxu1 }
 0x107   :  { %v1581_v29 = vpop.f32.mrb[9].mxu0  ;;  %v1583_v30 = vpop.f32.mrb[9].mxu1 }
 0x108   :  { %v796_v31 = vadd.f32 %v1581_v29, %v1577_v27  ;;  %v534_v32 = vpop.f32.mrb[10].mxu0  ;;  %v575_v33 = vpop.f32.mrb[10].mxu1 }
 0x109   :  { %v535_v34 = vpop.f32.mrb[11].mxu0  ;;  %v576_v35 = vpop.f32.mrb[11].mxu1 }
 0x10a   :  { %v797_v36 = vadd.f32 %v796_v31, %v1579_v28 }
 0x10c   :  { %v798_v37 = vadd.f32 %v797_v36, %v1583_v30 }
 0x10e   :  { %799 = vadd.xlane.f32.xlu1 %v798_v37 }
 0x116   :  { %v1589_v38 = vpop.f32.mrb[12].mxu0  ;;  %v1591_v39 = vpop.f32.mrb[12].mxu1 }
 0x117   :  { %v1593_v40 = vpop.f32.mrb[13].mxu0  ;;  %v1595_v41 = vpop.f32.mrb[13].mxu1 }
 0x118   :  { %v806_v42 = vadd.f32 %v1593_v40, %v1589_v38  ;;  %v723_v43 = vpop.f32.mrb[14].mxu0  ;;  %v764_v44 = vpop.f32.mrb[14].mxu1 }
 0x119   :  { %v724_v45 = vpop.f32.mrb[15].mxu0  ;;  %v765_v46 = vpop.f32.mrb[15].mxu1 }
 0x11a   :  { %v807_v47 = vadd.f32 %v806_v42, %v1591_v39 }
 0x11c   :  { %v808_v48 = vadd.f32 %v807_v47, %v1595_v41 }
 0x11e   :  { %809 = vadd.xlane.f32.xlu1 %v808_v48 }
 0x17b   :  { %v780_v49 = vpop.xlane.xlu0 %779 }
 0x18b   :  { %v790_v50 = vpop.xlane.xlu0 %789 }
 0x18c   :  { %v791_v52 = vadd.f32 %v790_v50, %v780_v49 }
 0x19b   :  { %v800_v51 = vpop.xlane.xlu1 %799 }
 0x19c   :  { %v801_v53 = vadd.f32 %v800_v51, %v791_v52 }
 0x1ab   :  { %v810_v54 = vpop.xlane.xlu1 %809 }
 0x1ac   :  { %v811_v55 = vadd.f32 %v810_v54, %v801_v53 }
 0x1ae   :  { %v1601_v56 = vmul.f32 0.00048828125, %v811_v55 }
 0x1b0   :  { %v848_v57 = vsub.f32 %v1565_v16, %v1601_v56  ;;  %v849_v58 = vsub.f32 %v1569_v18, %v1601_v56  ;;  %v850_v59 = vsub.f32 %v1567_v17, %v1601_v56  ;;  %v851_v60 = vsub.f32 %v1571_v19, %v1601_v56 }
 0x1b1   :  { %v822_v61 = vsub.f32 %v1553_v5, %v1601_v56  ;;  %v823_v62 = vsub.f32 %v1557_v7, %v1601_v56  ;;  %v824_v63 = vsub.f32 %v1555_v6, %v1601_v56  ;;  %v825_v0 = vsub.f32 %v1559_v8, %v1601_v56 }
 0x1b2   :  { %v856_v1 = vmul.f32 %v848_v57, %v848_v57  ;;  %v857_v2 = vmul.f32 %v849_v58, %v849_v58  ;;  %v858_v3 = vmul.f32 %v850_v59, %v850_v59  ;;  %v859_v4 = vmul.f32 %v851_v60, %v851_v60 }
 0x1b3   :  { %v838_v9 = vmul.f32 %v822_v61, %v822_v61  ;;  %v839_v10 = vmul.f32 %v823_v62, %v823_v62  ;;  %v840_v11 = vmul.f32 %v824_v63, %v824_v63  ;;  %v884_v13 = vsub.f32 %v1589_v38, %v1601_v56  ;;  %v903_v63 = vld [vmem:[%s1684_s2] sm:$0xff] }
 0x1b4   :  { %v860_v12 = vadd.f32 %v857_v2, %v856_v1  ;;  %v885_v14 = vsub.f32 %v1593_v40, %v1601_v56  ;;  %v886_v15 = vsub.f32 %v1591_v39, %v1601_v56  ;;  %v841_v20 = vmul.f32 %v825_v0, %v825_v0  ;;  %v907_v2 = vld [vmem:[%s1685_s3] sm:$0xff] }
 0x1b5   :  { %v842_v21 = vadd.f32 %v839_v10, %v838_v9  ;;  %v866_v22 = vsub.f32 %v1577_v27, %v1601_v56  ;;  %v867_v23 = vsub.f32 %v1581_v29, %v1601_v56  ;;  %v887_v25 = vsub.f32 %v1595_v41, %v1601_v56 }
 0x1b6   :  { %v861_v24 = vadd.f32 %v860_v12, %v858_v3  ;;  %v892_v26 = vmul.f32 %v884_v13, %v884_v13  ;;  %v893_v31 = vmul.f32 %v885_v14, %v885_v14  ;;  %v894_v33 = vmul.f32 %v886_v15, %v886_v15 }
 0x1b7   :  { %v843_v32 = vadd.f32 %v842_v21, %v840_v11  ;;  %v868_v34 = vsub.f32 %v1579_v28, %v1601_v56  ;;  %v869_v35 = vsub.f32 %v1583_v30, %v1601_v56  ;;  %v874_v42 = vmul.f32 %v866_v22, %v866_v22 }
 0x1b8   :  { %v862_v36 = vadd.f32 %v861_v24, %v859_v4  ;;  %v896_v37 = vadd.f32 %v893_v31, %v892_v26  ;;  %v875_v43 = vmul.f32 %v867_v23, %v867_v23  ;;  %v895_v45 = vmul.f32 %v887_v25, %v887_v25 }
 0x1b9   :  { %v844_v44 = vadd.f32 %v843_v32, %v841_v20  ;;  %v876_v47 = vmul.f32 %v868_v34, %v868_v34  ;;  %v877_v50 = vmul.f32 %v869_v35, %v869_v35 }
 0x1ba   :  { %863 = vadd.xlane.f32.xlu1 %v862_v36  ;;  %v897_v46 = vadd.f32 %v896_v37, %v894_v33  ;;  %v878_v48 = vadd.f32 %v875_v43, %v874_v42 }
 0x1bb   :  { %845 = vadd.xlane.f32.xlu0 %v844_v44 }
 0x1bc   :  { %v898_v49 = vadd.f32 %v897_v46, %v895_v45  ;;  %v879_v51 = vadd.f32 %v878_v48, %v876_v47 }
 0x1be   :  { %899 = vadd.xlane.f32.xlu1 %v898_v49  ;;  %v880_v52 = vadd.f32 %v879_v51, %v877_v50 }
 0x1c0   :  { %881 = vadd.xlane.f32.xlu0 %v880_v52 }
 0x247   :  { %v864_v54 = vpop.xlane.xlu1 %863 }
 0x248   :  { %v846_v53 = vpop.xlane.xlu0 %845 }
 0x249   :  { %v865_v55 = vadd.f32 %v864_v54, %v846_v53 }
 0x24b   :  { %v900_v59 = vpop.xlane.xlu1 %899 }
 0x24d   :  { %v882_v57 = vpop.xlane.xlu0 %881 }
 0x24e   :  { %v883_v58 = vadd.f32 %v882_v57, %v865_v55 }
 0x250   :  { %v901_v60 = vadd.f32 %v900_v59, %v883_v58 }
 0x252   :  { %v902_v61 = vmul.f32 0.00048828125, %v901_v60 }
 0x254   :  { %v904_v62 = vadd.f32 1e-05, %v902_v61 }
 0x256   :  { %1303 = vrsqrt.f32 %v904_v62 }
 0x260   :  { %v1304_v0 = vpop.eup %1303 }
 0x261   :  { %v906_v1 = vmul.f32 %v1304_v0, %v903_v63 }
 0x263   :  { %912 = vperm.xlu0 %1205, %v906_v1   ;;  %v908_v3 = vmul.f32 %v906_v1, %v1601_v56 }
 0x265   :  { %v909_v4 = vsub.f32 %v907_v2, %v908_v3 }
 0x267   :  { %921 = vperm.xlu1 %1206, %v909_v4  }
 0x2e2   :  { %v913_v9 = vpop.permute.xlu0 %912 }
 0x2e3   :  { %v915_v10 = vmul.f32 %v913_v9, %v1553_v5  ;;  %v916_v11 = vmul.f32 %v913_v9, %v1557_v7  ;;  %v917_v12 = vmul.f32 %v913_v9, %v1555_v6  ;;  %v918_v13 = vmul.f32 %v913_v9, %v1559_v8 }
 0x2e4   :  { %v954_v14 = vmul.f32 %v913_v9, %v1565_v16  ;;  %v955_v15 = vmul.f32 %v913_v9, %v1569_v18  ;;  %v956_v20 = vmul.f32 %v913_v9, %v1567_v17  ;;  %v957_v21 = vmul.f32 %v913_v9, %v1571_v19 }
 0x2e5   :  { %v989_v56 = vmul.f32 %v913_v9, %v1577_v27  ;;  %v990_v22 = vmul.f32 %v913_v9, %v1581_v29  ;;  %v991_v5 = vmul.f32 %v913_v9, %v1579_v28  ;;  %v992_v7 = vmul.f32 %v913_v9, %v1583_v30 }
 0x2e6   :  { %v1024_v6 = vmul.f32 %v913_v9, %v1589_v38  ;;  %v1025_v8 = vmul.f32 %v913_v9, %v1593_v40  ;;  %v1026_v16 = vmul.f32 %v913_v9, %v1591_v39  ;;  %v1027_v18 = vmul.f32 %v913_v9, %v1595_v41  ;;  %v922_v23 = vpop.permute.xlu1 %921 }
 0x2e7   :  { %v924_v17 = vadd.f32 %v922_v23, %v915_v10  ;;  %v925_v24 = vadd.f32 %v922_v23, %v916_v11  ;;  %v926_v19 = vadd.f32 %v922_v23, %v917_v12  ;;  %v927_v25 = vadd.f32 %v922_v23, %v918_v13 }
 0x2e8   :  { %v958_v27 = vadd.f32 %v954_v14, %v922_v23  ;;  %v959_v26 = vadd.f32 %v955_v15, %v922_v23  ;;  %v960_v29 = vadd.f32 %v956_v20, %v922_v23  ;;  %v961_v31 = vadd.f32 %v957_v21, %v922_v23 }
 0x2e9   :  { %v928_v28 = vmax.f32 %v924_v17, 0.0  ;;  %v929_v32 = vmax.f32 %v925_v24, 0.0  ;;  %v930_v30 = vmax.f32 %v926_v19, 0.0  ;;  %v931_v33 = vmax.f32 %v927_v25, 0.0 }
 0x2ea   :  { %v962_v38 = vmax.f32 %v958_v27, 0.0  ;;  %v963_v34 = vmax.f32 %v959_v26, 0.0  ;;  %v964_v40 = vmax.f32 %v960_v29, 0.0  ;;  %v965_v35 = vmax.f32 %v961_v31, 0.0 }
 0x2eb   :  { %v1196_v39 = vpack.c.bf16 %v929_v32, %v928_v28  ;;  %v1197_v36 = vpack.c.bf16 %v931_v33, %v930_v30  ;;  %v993_v41 = vadd.f32 %v989_v56, %v922_v23  ;;  %v994_v37 = vadd.f32 %v990_v22, %v922_v23 }
 0x2ec   :  { %v1198_v42 = vpack.c.bf16 %v963_v34, %v962_v38  ;;  %v1199_v43 = vpack.c.bf16 %v965_v35, %v964_v40  ;;  %v995_v44 = vadd.f32 %v991_v5, %v922_v23  ;;  %v996_v45 = vadd.f32 %v992_v7, %v922_v23 }
 0x2ed   :  { %948 = vst [vmem:[%s1686_s4] sm:$0xff] %v1196_v39  ;;  %949 = vst [vmem:[%s1686_s4 + $0x8] sm:$0xff] %v1197_v36  ;;  %v997_v46 = vmax.f32 %v993_v41, 0.0  ;;  %v998_v47 = vmax.f32 %v994_v37, 0.0  ;;  %v1028_v48 = vadd.f32 %v1024_v6, %v922_v23  ;;  %v1029_v49 = vadd.f32 %v1025_v8, %v922_v23 }
 0x2ee   :  { %1186 = vst [vmem:[%s1686_s4 + $0x10] sm:$0xff] %v1198_v42  ;;  %1187 = vst [vmem:[%s1686_s4 + $0x18] sm:$0xff] %v1199_v43  ;;  %v999_v50 = vmax.f32 %v995_v44, 0.0  ;;  %v1000_v51 = vmax.f32 %v996_v45, 0.0  ;;  %v1030_v52 = vadd.f32 %v1026_v16, %v922_v23  ;;  %v1031_v53 = vadd.f32 %v1027_v18, %v922_v23 }
 0x2ef   :  { %v1200_v54 = vpack.c.bf16 %v998_v47, %v997_v46  ;;  %v1032_v55 = vmax.f32 %v1028_v48, 0.0  ;;  %v1033_v57 = vmax.f32 %v1029_v49, 0.0 }
 0x2f0   :  { %v1201_v58 = vpack.c.bf16 %v1000_v51, %v999_v50  ;;  %v1034_v59 = vmax.f32 %v1030_v52, 0.0  ;;  %v1035_v60 = vmax.f32 %v1031_v53, 0.0 }
 0x2f1   :  { %1190 = vst [vmem:[%s1686_s4 + $0x20] sm:$0xff] %v1200_v54  ;;  %v1202_v61 = vpack.c.bf16 %v1033_v57, %v1032_v55 }
 0x2f2   :  { %1191 = vst [vmem:[%s1686_s4 + $0x28] sm:$0xff] %v1201_v58  ;;  %v1203_v62 = vpack.c.bf16 %v1035_v60, %v1034_v59 }
 0x2f3   :  { %1194 = vst [vmem:[%s1686_s4 + $0x30] sm:$0xff] %v1202_v61 }
 0x2f4   :  { %1195 = vst [vmem:[%s1686_s4 + $0x38] sm:$0xff] %v1203_v62 }

// kernel: generator_forward.9
= control target key start
LH: loop header
LB: loop body
LE: loop exit
PB: predicated region body
PF: predicated region fallthrough
CT: control target
= control target key end

     0   :  { %s1032_s9 = smov 0   ;;  %s1034_s10 = smov 0   ;;  %s1143_s0 = inlined_call_operand.vmem [shape: bf16[4,3,32], index: 0, kind: input, shape index: {}]   ;;  %s1144_s1 = inlined_call_operand.vmem [shape: bf16[4,32,2048], index: 1, kind: input, shape index: {}]   ;;  %s1145_s2 = inlined_call_operand.vmem [shape: f32[4,3,2048], index: 2, kind: output, shape index: {}]  }
   0x1   :  { %s1036_s11 = smov 0  }
   0x2 LB: > { %s24_s12 = sadd.s32 1, %s1010_s10  ;;  %p885_p0 = scmp.ge.s32.totalorder %s1014_s11, 1  ;;  %s1014_s11 = sphi %s1036_s11, %s12_s11   ;;  %s1010_s10 = sphi %s1034_s10, %s1147_s10   ;;  %s1006_s9 = sphi %s1032_s9, %s1146_s9  }
   0x3   : > { %p26_p1 = scmp.ge.s32.totalorder %s24_s12, 4  ;;  %p142_p2 = scmp.lt.s32.totalorder %s1014_s11, 5 }
   0x5   : > { %s1149_s12 = smov (%p26_p1, %s24_s12), 0  ;;  %p143_p3 = pnand %p885_p0, %p142_p2 }
   0x6   : > { %p176_p4 = scmp.lt.s32.totalorder (!%p143_p3), %s1006_s9, 3  ;;  %v1016_v0 = vmov (!%p143_p3), 0   ;;  %vm394_vm0 = vcmask (!%p143_p3), 261120  }
   0x7   : > { %146 = sbr.rel (%p143_p3) target bundleno = 282 (0x11a), region = 28  ;;  %430 = vmatprep.mubr.bf16.mxu0 (!%p143_p3), %v1016_v0  ;;  %471 = vmatprep.mubr.bf16.mxu1 (!%p143_p3), %v1016_v0 }
   0xe   : > { %s1151_s9 = smov (!%p176_p4, %s1006_s9), 3 }
   0xf   : > { %s933_s13 = sshll.u32 %s1151_s9, 8  ;;  %s886_s17 = sshll.u32 %s1151_s9, 1 }
  0x10   : > { %s1058_s16 = scalar_lea.vmem %s1144_s1, %s933_s13  ;;  %s179_s20 = scalar_lea.vmem %s1143_s0, %s886_s17 }
  0x11   : > { %v202_v1 = vld [vmem:[%s1058_s16] sm:$0xff]  ;;  %v203_v3 = vld [vmem:[%s1058_s16 + $0x8] sm:$0xff]  ;;  %v204_v15 = vld [vmem:[%s1058_s16 + $0x10] sm:$0xff]  ;;  %s934_s21 = sshll.u32 %s1151_s9, 6 }
  0x12   : > { %v210_v2 = vld [vmem:[%s1058_s16 + $0x40] sm:$0xff]  ;;  %v211_v5 = vld [vmem:[%s1058_s16 + $0x48] sm:$0xff]  ;;  %v212_v16 = vld [vmem:[%s1058_s16 + $0x50] sm:$0xff]  ;;  %s1124_s24 = scalar_lea.vmem %s1145_s2, %s934_s21 }
  0x13   : > { %v892_v4 = vcombine.high %v202_v1, %v210_v2  ;;  %v891_v6 = vcombine.low %v202_v1, %v210_v2  ;;  %v218_v7 = vld [vmem:[%s1058_s16 + $0x80] sm:$0xff]  ;;  %v894_v9 = vcombine.high %v203_v3, %v211_v5  ;;  %v893_v10 = vcombine.low %v203_v3, %v211_v5  ;;  %v219_v12 = vld [vmem:[%s1058_s16 + $0x88] sm:$0xff]  ;;  %v205_v17 = vld [vmem:[%s1058_s16 + $0x18] sm:$0xff] }
  0x14   : > { %v226_v8 = vld [vmem:[%s1058_s16 + $0xc0] sm:$0xff]  ;;  %v227_v13 = vld [vmem:[%s1058_s16 + $0xc8] sm:$0xff]  ;;  %v213_v19 = vld [vmem:[%s1058_s16 + $0x58] sm:$0xff]  ;;  %v896_v21 = vcombine.high %v204_v15, %v212_v16  ;;  %v895_v28 = vcombine.low %v204_v15, %v212_v16 }
  0x15   : > { %v908_v11 = vcombine.high %v218_v7, %v226_v8  ;;  %398 = vmatprep.subr.bf16.mxu0 %v892_v4  ;;  %v910_v14 = vcombine.high %v219_v12, %v227_v13  ;;  %439 = vmatprep.subr.bf16.mxu1 %v894_v9  ;;  %v907_v18 = vcombine.low %v218_v7, %v226_v8  ;;  %v220_v23 = vld [vmem:[%s1058_s16 + $0x90] sm:$0xff]  ;;  %v221_v25 = vld [vmem:[%s1058_s16 + $0x98] sm:$0xff]  ;;  %v1080_v27 = vld [vmem:[%s179_s20] sm:$0x3] }
  0x16   : > { %399 = vmatpush1.bf16.msra.mxu0 %v891_v6  ;;  %440 = vmatpush1.bf16.msra.mxu1 %v893_v10  ;;  %v909_v20 = vcombine.low %v219_v12, %v227_v13  ;;  %v898_v22 = vcombine.high %v205_v17, %v213_v19  ;;  %v228_v24 = vld [vmem:[%s1058_s16 + $0xd0] sm:$0xff]  ;;  %v229_v26 = vld [vmem:[%s1058_s16 + $0xd8] sm:$0xff]  ;;  %v897_v29 = vcombine.low %v205_v17, %v213_v19  ;;  %v206_v32 = vld [vmem:[%s1058_s16 + $0x20] sm:$0xff] }
  0x17   : > { %400 = vmatprep.subr.bf16.mxu0 %v908_v11  ;;  %441 = vmatprep.subr.bf16.mxu1 %v910_v14  ;;  %v912_v30 = vcombine.high %v220_v23, %v228_v24  ;;  %v914_v31 = vcombine.high %v221_v25, %v229_v26  ;;  %v214_v33 = vld [vmem:[%s1058_s16 + $0x60] sm:$0xff]  ;;  %v207_v34 = vld [vmem:[%s1058_s16 + $0x28] sm:$0xff]  ;;  %v911_v36 = vcombine.low %v220_v23, %v228_v24  ;;  %v208_v48 = vld [vmem:[%s1058_s16 + $0x30] sm:$0xff] }
  0x18   : > { %v215_v35 = vld [vmem:[%s1058_s16 + $0x68] sm:$0xff]  ;;  %v913_v37 = vcombine.low %v221_v25, %v229_v26  ;;  %v900_v38 = vcombine.high %v206_v32, %v214_v33  ;;  %v222_v40 = vld [vmem:[%s1058_s16 + $0xa0] sm:$0xff]  ;;  %v899_v44 = vcombine.low %v206_v32, %v214_v33  ;;  %v216_v49 = vld [vmem:[%s1058_s16 + $0x70] sm:$0xff] }
  0x19   : > { %v902_v39 = vcombine.high %v207_v34, %v215_v35  ;;  %v230_v41 = vld [vmem:[%s1058_s16 + $0xe0] sm:$0xff]  ;;  %v223_v42 = vld [vmem:[%s1058_s16 + $0xa8] sm:$0xff]  ;;  %v901_v45 = vcombine.low %v207_v34, %v215_v35  ;;  %v209_v50 = vld [vmem:[%s1058_s16 + $0x38] sm:$0xff]  ;;  %v904_v54 = vcombine.high %v208_v48, %v216_v49  ;;  %v903_v60 = vcombine.low %v208_v48, %v216_v49 }
  0x1a   : > { %401 = vmatpush1.bf16.msra.mxu0 %v907_v18  ;;  %442 = vmatpush1.bf16.msra.mxu1 %v909_v20  ;;  %v231_v43 = vld [vmem:[%s1058_s16 + $0xe8] sm:$0xff]  ;;  %v916_v46 = vcombine.high %v222_v40, %v230_v41  ;;  %v217_v51 = vld [vmem:[%s1058_s16 + $0x78] sm:$0xff]  ;;  %v915_v52 = vcombine.low %v222_v40, %v230_v41  ;;  %v224_v56 = vld [vmem:[%s1058_s16 + $0xb0] sm:$0xff] }
  0x1b   : > { %480 = vmatprep.subr.bf16.mxu0 %v896_v21  ;;  %521 = vmatprep.subr.bf16.mxu1 %v898_v22  ;;  %v918_v47 = vcombine.high %v223_v42, %v231_v43  ;;  %v917_v53 = vcombine.low %v223_v42, %v231_v43  ;;  %v906_v55 = vcombine.high %v209_v50, %v217_v51  ;;  %v232_v57 = vld [vmem:[%s1058_s16 + $0xf0] sm:$0xff]  ;;  %v225_v58 = vld [vmem:[%s1058_s16 + $0xb8] sm:$0xff] }
  0x1c   : > { %v233_v59 = vld [vmem:[%s1058_s16 + $0xf8] sm:$0xff]  ;;  %v905_v61 = vcombine.low %v209_v50, %v217_v51  ;;  %v920_v62 = vcombine.high %v224_v56, %v232_v57  ;;  %v919_v1 = vcombine.low %v224_v56, %v232_v57 }
  0x1d   : > { %923 = vmatmul.mubr.msk.bf16.vlgmr.msra.gmra.mrb[0].mxu0 %vm394_vm0, %v1080_v27  ;;  %924 = vmatmul.mubr.msk.bf16.vlgmr.msra.gmra.mrb[0].mxu1 %vm394_vm0, %v1080_v27  ;;  %v922_v63 = vcombine.high %v225_v58, %v233_v59  ;;  %v921_v2 = vcombine.low %v225_v58, %v233_v59 }
  0x1e   : > { %481 = vmatpush1.bf16.msra.mxu0 %v895_v28  ;;  %522 = vmatpush1.bf16.msra.mxu1 %v897_v29 }
  0x1f   : > { %482 = vmatprep.subr.bf16.mxu0 %v912_v30  ;;  %523 = vmatprep.subr.bf16.mxu1 %v914_v31 }
  0x20   : > { %512 = vmatprep.mubr.bf16.mxu0 %v1016_v0  ;;  %553 = vmatprep.mubr.bf16.mxu1 %v1016_v0 }
  0x22   : > { %483 = vmatpush1.bf16.msra.mxu0 %v911_v36  ;;  %524 = vmatpush1.bf16.msra.mxu1 %v913_v37 }
  0x23   : > { %562 = vmatprep.subr.bf16.mxu0 %v900_v38  ;;  %603 = vmatprep.subr.bf16.mxu1 %v902_v39 }
  0x25   : > { %925 = vmatmul.mubr.msk.bf16.vlgmr.msra.gmra.mrb[4].mxu0 %vm394_vm0, %v1080_v27  ;;  %926 = vmatmul.mubr.msk.bf16.vlgmr.msra.gmra.mrb[4].mxu1 %vm394_vm0, %v1080_v27 }
  0x26   : > { %563 = vmatpush1.bf16.msra.mxu0 %v899_v44  ;;  %604 = vmatpush1.bf16.msra.mxu1 %v901_v45 }
  0x27   : > { %564 = vmatprep.subr.bf16.mxu0 %v916_v46  ;;  %605 = vmatprep.subr.bf16.mxu1 %v918_v47 }
  0x28   : > { %594 = vmatprep.mubr.bf16.mxu0 %v1016_v0  ;;  %635 = vmatprep.mubr.bf16.mxu1 %v1016_v0 }
  0x2a   : > { %565 = vmatpush1.bf16.msra.mxu0 %v915_v52  ;;  %606 = vmatpush1.bf16.msra.mxu1 %v917_v53 }
  0x2b   : > { %644 = vmatprep.subr.bf16.mxu0 %v904_v54  ;;  %685 = vmatprep.subr.bf16.mxu1 %v906_v55 }
  0x2d   : > { %927 = vmatmul.mubr.msk.bf16.vlgmr.msra.gmra.mrb[8].mxu0 %vm394_vm0, %v1080_v27  ;;  %928 = vmatmul.mubr.msk.bf16.vlgmr.msra.gmra.mrb[8].mxu1 %vm394_vm0, %v1080_v27 }
  0x2e   : > { %645 = vmatpush1.bf16.msra.mxu0 %v903_v60  ;;  %686 = vmatpush1.bf16.msra.mxu1 %v905_v61 }
  0x2f   : > { %646 = vmatprep.subr.bf16.mxu0 %v920_v62  ;;  %687 = vmatprep.subr.bf16.mxu1 %v922_v63 }
  0x30   : > { %676 = vmatprep.mubr.bf16.mxu0 %v1016_v0  ;;  %717 = vmatprep.mubr.bf16.mxu1 %v1016_v0 }
  0x32   : > { %647 = vmatpush1.bf16.msra.mxu0 %v919_v1  ;;  %688 = vmatpush1.bf16.msra.mxu1 %v921_v2 }
  0x35   : > { %929 = vmatmul.mubr.msk.bf16.vlgmr.msra.gmra.mrb[12].mxu0 %vm394_vm0, %v1080_v27  ;;  %930 = vmatmul.mubr.msk.bf16.vlgmr.msra.gmra.mrb[12].mxu1 %vm394_vm0, %v1080_v27 }
  0xf0   : > { %v432_v3 = vpop.f32.mrb[0].mxu0  ;;  %v473_v4 = vpop.f32.mrb[0].mxu1 }
  0xf1   : > { %960 = vtanh.f32 %v432_v3  ;;  %v434_v5 = vpop.f32.mrb[1].mxu0  ;;  %v475_v6 = vpop.f32.mrb[1].mxu1 }
  0xf2   : > { %962 = vtanh.f32 %v473_v4  ;;  %v436_v7 = vpop.f32.mrb[2].mxu0  ;;  %v477_v8 = vpop.f32.mrb[2].mxu1 }
  0xf3   : > { %964 = vtanh.f32 %v434_v5  ;;  %v437_v9 = vpop.f32.mrb[3].mxu0  ;;  %v478_v0 = vpop.f32.mrb[3].mxu1 }
  0xf4   : > { %966 = vtanh.f32 %v475_v6 }
  0xf8   : > { %v514_v10 = vpop.f32.mrb[4].mxu0  ;;  %v555_v11 = vpop.f32.mrb[4].mxu1 }
  0xf9   : > { %968 = vtanh.f32 %v514_v10  ;;  %v516_v12 = vpop.f32.mrb[5].mxu0  ;;  %v557_v13 = vpop.f32.mrb[5].mxu1 }
  0xfa   : > { %970 = vtanh.f32 %v555_v11  ;;  %v518_v14 = vpop.f32.mrb[6].mxu0  ;;  %v559_v16 = vpop.f32.mrb[6].mxu1 }
  0xfb   : > { %v961_v15 = vpop.eup %960  ;;  %972 = vtanh.f32 %v516_v12  ;;  %v519_v17 = vpop.f32.mrb[7].mxu0 }
  0xfc   : > { %v963_v18 = vpop.eup %962  ;;  %974 = vtanh.f32 %v557_v13  ;;  %v560_v19 = vpop.f32.mrb[7].mxu1 }
  0xfd   : > { %v965_v20 = vpop.eup %964 }
  0xfe   : > { %v967_v21 = vpop.eup %966  ;;  %v758_v22 = vcombine.low %v961_v15, %v965_v20 }
  0xff   : > { %v759_v23 = vcombine.low %v963_v18, %v967_v21 }
 0x100   : > { %774 = vst [vmem:[%s1124_s24] sm:$0x77] %v758_v22  ;;  %v596_v24 = vpop.f32.mrb[8].mxu0  ;;  %v637_v25 = vpop.f32.mrb[8].mxu1 }
 0x101   : > { %775 = vst [vmem:[%s1124_s24 + $0x8] sm:$0x77] %v759_v23  ;;  %976 = vtanh.f32 %v596_v24  ;;  %v598_v26 = vpop.f32.mrb[9].mxu0  ;;  %v639_v27 = vpop.f32.mrb[9].mxu1 }
 0x102   : > { %978 = vtanh.f32 %v637_v25  ;;  %v600_v28 = vpop.f32.mrb[10].mxu0  ;;  %v641_v30 = vpop.f32.mrb[10].mxu1 }
 0x103   : > { %v969_v29 = vpop.eup %968  ;;  %980 = vtanh.f32 %v598_v26  ;;  %v601_v31 = vpop.f32.mrb[11].mxu0 }
 0x104   : > { %v971_v32 = vpop.eup %970  ;;  %982 = vtanh.f32 %v639_v27  ;;  %v642_v33 = vpop.f32.mrb[11].mxu1 }
 0x105   : > { %v973_v34 = vpop.eup %972 }
 0x106   : > { %v975_v35 = vpop.eup %974  ;;  %v760_v36 = vcombine.low %v969_v29, %v973_v34 }
 0x107   : > { %v761_v37 = vcombine.low %v971_v32, %v975_v35 }
 0x108   : > { %776 = vst [vmem:[%s1124_s24 + $0x10] sm:$0x77] %v760_v36  ;;  %v678_v38 = vpop.f32.mrb[12].mxu0  ;;  %v719_v39 = vpop.f32.mrb[12].mxu1 }
 0x109   : > { %777 = vst [vmem:[%s1124_s24 + $0x18] sm:$0x77] %v761_v37  ;;  %984 = vtanh.f32 %v678_v38  ;;  %v680_v40 = vpop.f32.mrb[13].mxu0  ;;  %v721_v41 = vpop.f32.mrb[13].mxu1 }
 0x10a   : > { %986 = vtanh.f32 %v719_v39  ;;  %v682_v42 = vpop.f32.mrb[14].mxu0  ;;  %v723_v44 = vpop.f32.mrb[14].mxu1 }
 0x10b   : > { %v977_v43 = vpop.eup %976  ;;  %988 = vtanh.f32 %v680_v40  ;;  %v683_v45 = vpop.f32.mrb[15].mxu0 }
 0x10c   : > { %v979_v46 = vpop.eup %978  ;;  %990 = vtanh.f32 %v721_v41  ;;  %v724_v47 = vpop.f32.mrb[15].mxu1 }
 0x10d   : > { %v981_v48 = vpop.eup %980 }
 0x10e   : > { %v983_v49 = vpop.eup %982  ;;  %v762_v50 = vcombine.low %v977_v43, %v981_v48 }
 0x10f   : > { %v763_v51 = vcombine.low %v979_v46, %v983_v49 }
 0x110   : > { %778 = vst [vmem:[%s1124_s24 + $0x20] sm:$0x77] %v762_v50 }
 0x111   : > { %779 = vst [vmem:[%s1124_s24 + $0x28] sm:$0x77] %v763_v51 }
 0x113   : > { %v985_v52 = vpop.eup %984 }
 0x114   : > { %v987_v53 = vpop.eup %986 }
 0x115   : > { %v989_v54 = vpop.eup %988 }
 0x116   : > { %v991_v55 = vpop.eup %990  ;;  %v764_v56 = vcombine.low %v985_v52, %v989_v54 }
 0x117   : > { %v765_v57 = vcombine.low %v987_v53, %v991_v55 }
 0x118   : > { %780 = vst [vmem:[%s1124_s24 + $0x30] sm:$0x77] %v764_v56 }
 0x119   : > { %781 = vst [vmem:[%s1124_s24 + $0x38] sm:$0x77] %v765_v57 }
 0x11a PF: > { %s12_s11 = sadd.s32 1, %s1014_s11   ;;  %s1146_s9 = smov %s1010_s10 }
 0x11b   : > { %p9_p5 = scmp.ge.s32.totalorder %s12_s11, 6   ;;  %s1147_s10 = smov %s1149_s12 }
 0x11d   :  { %11 = sbr.rel (!%p9_p5) target bundleno = 2 (0x2), region = 61 }

</bundles_post_ra>
